<compile_context>
chip_gen: v7x
topology: tpu7x:2x2x1
jax: 0.10.0
libtpu: 0.0.40
codegen_flags: <defaults>
</compile_context>

<pallas_src>
import functools

import numpy as np
import jax
import jax.numpy as jnp
from jax.experimental import pallas as pl
from jax.experimental.pallas import tpu as pltpu


# ----------------------------- Pallas kernel --------------------------------
def krnn_kernel(xcol_ref,
                wih0_ref, bih0_ref, whh0_ref, bhhn0_ref,
                wihR_ref, bihR_ref, whhR_ref, bhhnR_ref,
                fcw_ref, fcb_ref,
                out_ref,
                gi_ref, seq_ref,
                *, t_steps, b_pad, dh_pad, n_seq_buf):
    f32 = jnp.float32
    T, Bp, DH = t_steps, b_pad, dh_pad          # DH = padded fused hidden (128)

    def run_layer(x_seq, wih, bih, whh, bhh_n, dst, write_seq):
        # x_seq [T*Bp, In]; wih [In, 3*DH]; whh [DH, 3*DH]; bih [1, 3*DH];
        # bhh_n [1, DH] (b_hh of r/z gates folded into bih at pack time).
        # Hoisted, gate-fused input projection: ONE sequence-wide lane-dense
        # matmul + ONE wide store per layer.
        gi_ref[...] = jnp.dot(x_seq, wih, preferred_element_type=f32) + bih
        bhh_nb = jnp.broadcast_to(bhh_n, (Bp, DH))    # hoisted broadcast (once)
        h = jnp.zeros((Bp, DH), f32)
        # Statically unrolled recurrence (T=8): one fused [Bp,DH]@[DH,3DH]
        # MXU issue per step (gates sliced at 128-aligned offsets).
        for t in range(T):
            lo = t * Bp
            gh = jnp.dot(h, whh, preferred_element_type=f32)      # [Bp, 3*DH]
            gi_t = gi_ref[lo:lo + Bp, :]
            r = jax.nn.sigmoid(gi_t[:, 0:DH] + gh[:, 0:DH])
            z = jax.nn.sigmoid(gi_t[:, DH:2 * DH] + gh[:, DH:2 * DH])
            n = jnp.tanh(gi_t[:, 2 * DH:3 * DH] + r * (gh[:, 2 * DH:3 * DH] + bhh_nb))
            h = (1.0 - z) * n + z * h
            if write_seq:                              # next layer's input sequence
                seq_ref[dst, lo:lo + Bp, :] = h
        return h

    Lr = wihR_ref.shape[0]                             # extra GRU layers (>= 1)

    # layer 0: Conv1d folded into the (dup-fused, gate-fused) input projection.
    h = run_layer(xcol_ref[...], wih0_ref[...], bih0_ref[...],
                  whh0_ref[...], bhhn0_ref[...], dst=0, write_seq=Lr > 0)
    # layers 1..rnn_layers-1 (input: previous layer's sequence from VMEM scratch)
    for l in range(Lr):
        x_seq = seq_ref[l % n_seq_buf, :, :]
        h = run_layer(x_seq, wihR_ref[l], bihR_ref[l], whhR_ref[l], bhhnR_ref[l],
                      dst=(l + 1) % n_seq_buf, write_seq=l < Lr - 1)

    # out_fc on the last step; mean over dups folded into the lane-dense
    # (zero-padded to 128) fc weight.
    out_ref[...] = jnp.dot(h, fcw_ref[...], preferred_element_type=f32) + fcb_ref[...]


# ------------------------------ wrapper (glue) -------------------------------
@functools.partial(jax.jit, static_argnames=("fea_dim", "k_size"))
def krnn_forward(x_flat, packed, fea_dim, k_size):
    B, total = x_flat.shape
    S = total // fea_dim
    pad = (k_size - 1) // 2
    L_out = S + 2 * pad - k_size + 1          # PyTorch Conv1d output length (stride 1)
    Bp = max(8, ((B + 7) // 8) * 8)           # sublane-full rows

    # im2col (layout plumbing only; all matmuls run inside the kernel)
    x = x_flat.reshape(B, S, fea_dim).astype(jnp.float32)
    xp = jnp.pad(x, ((0, 0), (pad, pad), (0, 0)))
    cols = jnp.stack([xp[:, k:k + L_out, :] for k in range(k_size)], axis=2)
    cols = cols.reshape(B, L_out, k_size * fea_dim)
    cols = jnp.transpose(cols, (1, 0, 2))                        # [L_out, B, K*Cin]
    cols = jnp.pad(cols, ((0, 0), (0, Bp - B), (0, 0)))          # pad batch rows
    x_col = cols.reshape(L_out * Bp, k_size * fea_dim)           # time-major rows

    DHp = packed["whh0"].shape[0]             # padded fused hidden width (128)
    three_dh = packed["whh0"].shape[1]
    out_pad = packed["fcw"].shape[-1]
    Lr = packed["wihR"].shape[0]
    n_seq_buf = 1 if Lr == 1 else 2           # single buffer suffices for 2 layers

    args = (x_col,
            packed["wih0"], packed["bih0"], packed["whh0"], packed["bhhn0"],
            packed["wihR"], packed["bihR"], packed["whhR"], packed["bhhnR"],
            packed["fcw"], packed["fcb"])

    kernel = functools.partial(krnn_kernel, t_steps=L_out, b_pad=Bp,
                               dh_pad=DHp, n_seq_buf=n_seq_buf)

    scratch_shapes = [
        pltpu.VMEM((L_out * Bp, three_dh), jnp.float32),         # fused gi (r|z|n)
        pltpu.VMEM((n_seq_buf, L_out * Bp, DHp), jnp.float32),   # layer sequence(s)
    ]

    # explicit VMEM budget (keeps the footprint visible; matters on v7x 64 MiB)
    arg_bytes = sum(int(np.prod(a.shape)) * 4 for a in args)
    scr_bytes = (L_out * Bp * three_dh + n_seq_buf * L_out * Bp * DHp) * 4
    out_bytes = Bp * out_pad * 4
    vmem_bytes = int(min(64 << 20, max(8 << 20,
                                       2 * (arg_bytes + out_bytes) + scr_bytes + (2 << 20))))

    out_full = pl.pallas_call(
        kernel,
        out_shape=jax.ShapeDtypeStruct((Bp, out_pad), jnp.float32),
        in_specs=[pl.BlockSpec(memory_space=pltpu.MemorySpace.VMEM)
                  for _ in args],
        out_specs=pl.BlockSpec(memory_space=pltpu.MemorySpace.VMEM),
        scratch_shapes=scratch_shapes,
        compiler_params=pltpu.CompilerParams(vmem_limit_bytes=vmem_bytes),
    )(*args)
    return jnp.squeeze(out_full[:B, 0])        # matches torch .squeeze()


# ----------------------- deterministic parameter init ------------------------
def init_params(key, fea_dim, cnn_dim, k_size, rnn_dim, rnn_dups, rnn_layers):
    H = rnn_dim
    kit = iter(jax.random.split(key, 2 + 4 * rnn_dups * rnn_layers + 2))

    def unif(shape, fan):
        b = 1.0 / float(np.sqrt(fan))
        return jax.random.uniform(next(kit), shape, jnp.float32, -b, b)

    conv_w = unif((cnn_dim, fea_dim, k_size), fea_dim * k_size)   # PyTorch [Cout,Cin,K]
    conv_b = unif((cnn_dim,), fea_dim * k_size)

    gru = []                         # gru[d][l] = (w_ih [3H,In], w_hh [3H,H], b_ih, b_hh)
    for _d in range(rnn_dups):
        layers = []
        for l in range(rnn_layers):
            in_dim = cnn_dim if l == 0 else H
            layers.append((unif((3 * H, in_dim), H),   # weight_ih (gate order r,z,n)
                           unif((3 * H, H), H),        # weight_hh
                           unif((3 * H,), H),          # bias_ih
                           unif((3 * H,), H)))         # bias_hh
        gru.append(layers)

    fc_w = unif((1, H), H)
    fc_b = unif((1,), H)
    return {"conv_w": conv_w, "conv_b": conv_b, "gru": gru,
            "fc_w": fc_w, "fc_b": fc_b}


# ----------------- pack raw (PyTorch-layout) params for the kernel -----------
def pack_params(raw, fea_dim, cnn_dim, k_size, rnn_dim, rnn_dups, rnn_layers,
                lane=128, out_pad=128):
    H, D = rnn_dim, rnn_dups
    DH = D * H
    DHp = max(lane, ((DH + lane - 1) // lane) * lane)     # padded fused hidden

    # conv: [Cout, Cin, K] -> im2col weight [K*Cin, Cout] (k-major, c-minor)
    cw = jnp.transpose(raw["conv_w"], (2, 1, 0)).reshape(k_size * fea_dim, cnn_dim)
    cb = raw["conv_b"].reshape(1, cnn_dim)

    def gate(w, g):                       # [3H, In] -> gate block transposed [In, H]
        return w[g * H:(g + 1) * H, :].T

    def bgate(b, g):
        return b[g * H:(g + 1) * H]

    def block_diag(mats):
        rows = sum(m.shape[0] for m in mats)
        cols = sum(m.shape[1] for m in mats)
        out = jnp.zeros((rows, cols), jnp.float32)
        r = c = 0
        for m in mats:
            out = out.at[r:r + m.shape[0], c:c + m.shape[1]].set(m)
            r += m.shape[0]; c += m.shape[1]
        return out

    def pad_c(m):                          # pad columns to DHp (padded lanes = 0)
        return jnp.pad(m, ((0, 0), (0, DHp - m.shape[1])))

    def pad_rc(m):                         # pad rows + columns to DHp
        return jnp.pad(m, ((0, DHp - m.shape[0]), (0, DHp - m.shape[1])))

    def pad_b(v):
        return jnp.pad(v, (0, DHp - v.shape[0]))

    gru = raw["gru"]

    def pack_layer(l, shared_input):
        wih_g, whh_g, bih_g = [], [], []
        for g in range(3):
            if shared_input:   # layer 0: input shared across dups -> column concat
                wih = pad_c(jnp.concatenate(
                    [gate(gru[d][l][0], g) for d in range(D)], axis=1))
            else:              # layers >= 1: per-dup inputs -> block-diag
                wih = pad_rc(block_diag([gate(gru[d][l][0], g) for d in range(D)]))
            whh = pad_rc(block_diag([gate(gru[d][l][1], g) for d in range(D)]))
            b_i = jnp.concatenate([bgate(gru[d][l][2], g) for d in range(D)])
            b_h = jnp.concatenate([bgate(gru[d][l][3], g) for d in range(D)])
            # fold b_hh into b_ih for r/z gates; the n-gate hidden bias sits
            # inside r * (.) and must stay separate
            bih_g.append(pad_b(b_i + b_h if g < 2 else b_i))
            wih_g.append(wih); whh_g.append(whh)
        wih = jnp.concatenate(wih_g, axis=1)            # [In , 3*DHp] gate-major
        whh = jnp.concatenate(whh_g, axis=1)            # [DHp, 3*DHp]
        bih = jnp.concatenate(bih_g).reshape(1, 3 * DHp)
        bhhn = pad_b(jnp.concatenate([bgate(gru[d][l][3], 2)
                                      for d in range(D)])).reshape(1, DHp)
        return wih, whh, bih, bhhn

    # layer 0: fold Conv1d into the input projection (exact linear composition)
    wih0_raw, whh0, bih0_raw, bhhn0 = pack_layer(0, shared_input=True)
    wih0 = cw @ wih0_raw                                # [K*Cin, 3*DHp]
    bih0 = cb @ wih0_raw + bih0_raw                     # [1, 3*DHp]

    # layers >= 1
    wihR, whhR, bihR, bhhnR = [], [], [], []
    for l in range(1, rnn_layers):
        wih, whh, bih, bhhn = pack_layer(l, shared_input=False)
        wihR.append(wih); whhR.append(whh); bihR.append(bih); bhhnR.append(bhhn)
    wihR = jnp.stack(wihR); whhR = jnp.stack(whhR)
    bihR = jnp.stack(bihR); bhhnR = jnp.stack(bhhnR)

    # final fc with the 1/D mean over dups folded in; lane-dense zero-padded
    fc_col = jnp.concatenate([raw["fc_w"].T / D for _ in range(D)], axis=0)  # [DH, 1]
    fcw = jnp.zeros((DHp, out_pad), jnp.float32).at[:DH, 0:1].set(fc_col)
    fcb = jnp.zeros((1, out_pad), jnp.float32).at[0, 0].set(raw["fc_b"][0])

    return {"wih0": wih0, "bih0": bih0, "whh0": whh0, "bhhn0": bhhn0,
            "wihR": wihR, "bihR": bihR, "whhR": whhR, "bhhnR": bhhnR,
            "fcw": fcw, "fcb": fcb}


# ------------------------- pure-JAX reference (check) ------------------------
def reference_forward(x_flat, raw, fea_dim):
    B = x_flat.shape[0]
    S = x_flat.shape[1] // fea_dim
    x = x_flat.reshape(B, S, fea_dim).astype(jnp.float32)
    conv_w, conv_b = raw["conv_w"], raw["conv_b"]
    K = conv_w.shape[2]
    pad = (K - 1) // 2
    L_out = S + 2 * pad - K + 1
    xp = jnp.pad(x, ((0, 0), (pad, pad), (0, 0)))
    conv = sum(jnp.einsum("blc,oc->blo", xp[:, k:k + L_out, :], conv_w[:, :, k])
               for k in range(K)) + conv_b[None, None, :]

    H = raw["fc_w"].shape[1]

    def gru_seq(xs, w_ih, w_hh, b_ih, b_hh):
        def step(h, xt):
            gi = xt @ w_ih.T + b_ih
            gh = h @ w_hh.T + b_hh
            r = jax.nn.sigmoid(gi[:, :H] + gh[:, :H])
            z = jax.nn.sigmoid(gi[:, H:2 * H] + gh[:, H:2 * H])
            n = jnp.tanh(gi[:, 2 * H:] + r * gh[:, 2 * H:])
            h = (1 - z) * n + z * h
            return h, h
        h0 = jnp.zeros((xs.shape[0], H), jnp.float32)
        h_last, ys = jax.lax.scan(step, h0, jnp.swapaxes(xs, 0, 1))
        return jnp.swapaxes(ys, 0, 1), h_last

    h_sum = jnp.zeros((B, H), jnp.float32)
    for layers in raw["gru"]:
        seq, h_last = conv, None
        for (w_ih, w_hh, b_ih, b_hh) in layers:
            seq, h_last = gru_seq(seq, w_ih, w_hh, b_ih, b_hh)
        h_sum = h_sum + h_last
    out = (h_sum / len(raw["gru"])) @ raw["fc_w"].T + raw["fc_b"]
    return jnp.squeeze(out)


# ----------------------------------- main ------------------------------------
if __name__ == "__main__":
    fea_dim, cnn_dim, cnn_kernel_size = 4, 16, 3
    rnn_dim, rnn_dups, rnn_layers = 32, 2, 2
    batch, seq_len = 2, 8

    key = jax.random.PRNGKey(0)
    pkey, xkey = jax.random.split(key)
    raw = init_params(pkey, fea_dim, cnn_dim, cnn_kernel_size,
                      rnn_dim, rnn_dups, rnn_layers)
    packed = pack_params(raw, fea_dim, cnn_dim, cnn_kernel_size,
                         rnn_dim, rnn_dups, rnn_layers)

    # Model input is [batch, seq_len * fea_dim] (flattened), like the PyTorch module.
    x = jax.random.normal(xkey, (batch, seq_len * fea_dim), jnp.float32)

    out = krnn_forward(x, packed, fea_dim, cnn_kernel_size)
    out = jax.block_until_ready(out)

    ref = reference_forward(x, raw, fea_dim)
    np.testing.assert_allclose(np.asarray(out), np.asarray(ref),
                               rtol=1e-4, atol=1e-4)
    print("KERNEL_OK")
</pallas_src>

<mosaic_0001>
module attributes {stable_mosaic.version = 11 : i64} {
  func.func @krnn_kernel(%arg0: memref<64x12xf32, #tpu.memory_space<vmem>>, %arg1: memref<12x384xf32, #tpu.memory_space<vmem>>, %arg2: memref<1x384xf32, #tpu.memory_space<vmem>>, %arg3: memref<128x384xf32, #tpu.memory_space<vmem>>, %arg4: memref<1x128xf32, #tpu.memory_space<vmem>>, %arg5: memref<1x128x384xf32, #tpu.memory_space<vmem>>, %arg6: memref<1x1x384xf32, #tpu.memory_space<vmem>>, %arg7: memref<1x128x384xf32, #tpu.memory_space<vmem>>, %arg8: memref<1x1x128xf32, #tpu.memory_space<vmem>>, %arg9: memref<128x128xf32, #tpu.memory_space<vmem>>, %arg10: memref<1x128xf32, #tpu.memory_space<vmem>>, %arg11: memref<8x128xf32, #tpu.memory_space<vmem>>, %arg12: memref<64x384xf32, #tpu.memory_space<vmem>>, %arg13: memref<1x64x128xf32, #tpu.memory_space<vmem>>) attributes {dimension_semantics = [], scalar_prefetch = 0 : i64, scratch_operands = 2 : i64, tpu.core_type = #tpu.core_type<tc>} {
    %c0 = arith.constant 0 : index
    %c0_0 = arith.constant 0 : index
    %0 = vector.load %arg0[%c0, %c0_0] : memref<64x12xf32, #tpu.memory_space<vmem>>, vector<64x12xf32>
    %c0_1 = arith.constant 0 : index
    %c0_2 = arith.constant 0 : index
    %1 = vector.load %arg1[%c0_1, %c0_2] : memref<12x384xf32, #tpu.memory_space<vmem>>, vector<12x384xf32>
    %c0_3 = arith.constant 0 : index
    %c0_4 = arith.constant 0 : index
    %2 = vector.load %arg2[%c0_3, %c0_4] : memref<1x384xf32, #tpu.memory_space<vmem>>, vector<1x384xf32>
    %c0_5 = arith.constant 0 : index
    %c0_6 = arith.constant 0 : index
    %3 = vector.load %arg3[%c0_5, %c0_6] : memref<128x384xf32, #tpu.memory_space<vmem>>, vector<128x384xf32>
    %c0_7 = arith.constant 0 : index
    %c0_8 = arith.constant 0 : index
    %4 = vector.load %arg4[%c0_7, %c0_8] : memref<1x128xf32, #tpu.memory_space<vmem>>, vector<1x128xf32>
    %cst = arith.constant dense<0.000000e+00> : vector<64x384xf32>
    %5 = tpu.matmul %0, %1, %cst {dimension_numbers = #tpu.dot_dimension_numbers<[1], [0], [0], [1], [0, 0, 1, 1], [], []>} : vector<64x12xf32>, vector<12x384xf32>, vector<64x384xf32> -> vector<64x384xf32>
    %6 = vector.broadcast %2 : vector<1x384xf32> to vector<64x384xf32>
    %7 = arith.addf %5, %6 : vector<64x384xf32>
    %c0_9 = arith.constant 0 : index
    %c0_10 = arith.constant 0 : index
    %8 = vector.load %arg12[%c0_9, %c0_10] : memref<64x384xf32, #tpu.memory_space<vmem>>, vector<64x384xf32>
    tpu.vector_store %arg12[%c0_9, %c0_10], %7 {strides = array<i32>} : memref<64x384xf32, #tpu.memory_space<vmem>>, vector<64x384xf32>,
    %9 = vector.shape_cast %4 : vector<1x128xf32> to vector<1x128xf32>
    %10 = vector.broadcast %9 : vector<1x128xf32> to vector<8x128xf32>
    %cst_11 = arith.constant 0.000000e+00 : f32
    %11 = vector.broadcast %cst_11 : f32 to vector<8x128xf32>
    %cst_12 = arith.constant dense<0.000000e+00> : vector<8x384xf32>
    %12 = tpu.matmul %11, %3, %cst_12 {dimension_numbers = #tpu.dot_dimension_numbers<[1], [0], [0], [1], [0, 0, 1, 1], [], []>} : vector<8x128xf32>, vector<128x384xf32>, vector<8x384xf32> -> vector<8x384xf32>
    %c0_13 = arith.constant 0 : index
    %c0_14 = arith.constant 0 : index
    %13 = vector.load %arg12[%c0_13, %c0_14] : memref<64x384xf32, #tpu.memory_space<vmem>>, vector<8x384xf32>
    %14 = vector.extract_strided_slice %13 {offsets = [0, 0], sizes = [8, 128], strides = [1, 1]} : vector<8x384xf32> to vector<8x128xf32>
    %15 = vector.extract_strided_slice %12 {offsets = [0, 0], sizes = [8, 128], strides = [1, 1]} : vector<8x384xf32> to vector<8x128xf32>
    %16 = arith.addf %14, %15 : vector<8x128xf32>
    %17 = arith.negf %16 : vector<8x128xf32>
    %18 = math.exp %17 : vector<8x128xf32>
    %cst_15 = arith.constant 1.000000e+00 : f32
    %19 = vector.broadcast %cst_15 : f32 to vector<8x128xf32>
    %20 = arith.addf %19, %18 : vector<8x128xf32>
    %21 = arith.divf %19, %20 : vector<8x128xf32>
    %22 = vector.extract_strided_slice %13 {offsets = [0, 128], sizes = [8, 128], strides = [1, 1]} : vector<8x384xf32> to vector<8x128xf32>
    %23 = vector.extract_strided_slice %12 {offsets = [0, 128], sizes = [8, 128], strides = [1, 1]} : vector<8x384xf32> to vector<8x128xf32>
    %24 = arith.addf %22, %23 : vector<8x128xf32>
    %25 = arith.negf %24 : vector<8x128xf32>
    %26 = math.exp %25 : vector<8x128xf32>
    %cst_16 = arith.constant 1.000000e+00 : f32
    %27 = vector.broadcast %cst_16 : f32 to vector<8x128xf32>
    %28 = arith.addf %27, %26 : vector<8x128xf32>
    %29 = arith.divf %27, %28 : vector<8x128xf32>
    %30 = vector.extract_strided_slice %13 {offsets = [0, 256], sizes = [8, 128], strides = [1, 1]} : vector<8x384xf32> to vector<8x128xf32>
    %31 = vector.extract_strided_slice %12 {offsets = [0, 256], sizes = [8, 128], strides = [1, 1]} : vector<8x384xf32> to vector<8x128xf32>
    %32 = arith.addf %31, %10 : vector<8x128xf32>
    %33 = arith.mulf %21, %32 : vector<8x128xf32>
    %34 = arith.addf %30, %33 : vector<8x128xf32>
    %35 = math.tanh %34 : vector<8x128xf32>
    %cst_17 = arith.constant 1.000000e+00 : f32
    %36 = vector.broadcast %cst_17 : f32 to vector<8x128xf32>
    %37 = arith.subf %36, %29 : vector<8x128xf32>
    %38 = arith.mulf %37, %35 : vector<8x128xf32>
    %39 = arith.mulf %29, %11 : vector<8x128xf32>
    %40 = arith.addf %38, %39 : vector<8x128xf32>
    %c0_18 = arith.constant 0 : index
    %c0_19 = arith.constant 0 : index
    %c0_20 = arith.constant 0 : index
    %41 = vector.load %arg13[%c0_18, %c0_19, %c0_20] : memref<1x64x128xf32, #tpu.memory_space<vmem>>, vector<1x8x128xf32>
    %42 = vector.shape_cast %41 : vector<1x8x128xf32> to vector<8x128xf32>
    %43 = vector.shape_cast %40 : vector<8x128xf32> to vector<1x8x128xf32>
    tpu.vector_store %arg13[%c0_18, %c0_19, %c0_20], %43 {strides = array<i32>} : memref<1x64x128xf32, #tpu.memory_space<vmem>>, vector<1x8x128xf32>,
    %cst_21 = arith.constant dense<0.000000e+00> : vector<8x384xf32>
    %44 = tpu.matmul %40, %3, %cst_21 {dimension_numbers = #tpu.dot_dimension_numbers<[1], [0], [0], [1], [0, 0, 1, 1], [], []>} : vector<8x128xf32>, vector<128x384xf32>, vector<8x384xf32> -> vector<8x384xf32>
    %c8 = arith.constant 8 : index
    %c0_22 = arith.constant 0 : index
    %45 = vector.load %arg12[%c8, %c0_22] : memref<64x384xf32, #tpu.memory_space<vmem>>, vector<8x384xf32>
    %46 = vector.extract_strided_slice %45 {offsets = [0, 0], sizes = [8, 128], strides = [1, 1]} : vector<8x384xf32> to vector<8x128xf32>
    %47 = vector.extract_strided_slice %44 {offsets = [0, 0], sizes = [8, 128], strides = [1, 1]} : vector<8x384xf32> to vector<8x128xf32>
    %48 = arith.addf %46, %47 : vector<8x128xf32>
    %49 = arith.negf %48 : vector<8x128xf32>
    %50 = math.exp %49 : vector<8x128xf32>
    %cst_23 = arith.constant 1.000000e+00 : f32
    %51 = vector.broadcast %cst_23 : f32 to vector<8x128xf32>
    %52 = arith.addf %51, %50 : vector<8x128xf32>
    %53 = arith.divf %51, %52 : vector<8x128xf32>
    %54 = vector.extract_strided_slice %45 {offsets = [0, 128], sizes = [8, 128], strides = [1, 1]} : vector<8x384xf32> to vector<8x128xf32>
    %55 = vector.extract_strided_slice %44 {offsets = [0, 128], sizes = [8, 128], strides = [1, 1]} : vector<8x384xf32> to vector<8x128xf32>
    %56 = arith.addf %54, %55 : vector<8x128xf32>
    %57 = arith.negf %56 : vector<8x128xf32>
    %58 = math.exp %57 : vector<8x128xf32>
    %cst_24 = arith.constant 1.000000e+00 : f32
    %59 = vector.broadcast %cst_24 : f32 to vector<8x128xf32>
    %60 = arith.addf %59, %58 : vector<8x128xf32>
    %61 = arith.divf %59, %60 : vector<8x128xf32>
    %62 = vector.extract_strided_slice %45 {offsets = [0, 256], sizes = [8, 128], strides = [1, 1]} : vector<8x384xf32> to vector<8x128xf32>
    %63 = vector.extract_strided_slice %44 {offsets = [0, 256], sizes = [8, 128], strides = [1, 1]} : vector<8x384xf32> to vector<8x128xf32>
    %64 = arith.addf %63, %10 : vector<8x128xf32>
    %65 = arith.mulf %53, %64 : vector<8x128xf32>
    %66 = arith.addf %62, %65 : vector<8x128xf32>
    %67 = math.tanh %66 : vector<8x128xf32>
    %cst_25 = arith.constant 1.000000e+00 : f32
    %68 = vector.broadcast %cst_25 : f32 to vector<8x128xf32>
    %69 = arith.subf %68, %61 : vector<8x128xf32>
    %70 = arith.mulf %69, %67 : vector<8x128xf32>
    %71 = arith.mulf %61, %40 : vector<8x128xf32>
    %72 = arith.addf %70, %71 : vector<8x128xf32>
    %c0_26 = arith.constant 0 : index
    %c8_27 = arith.constant 8 : index
    %c0_28 = arith.constant 0 : index
    %73 = vector.load %arg13[%c0_26, %c8_27, %c0_28] : memref<1x64x128xf32, #tpu.memory_space<vmem>>, vector<1x8x128xf32>
    %74 = vector.shape_cast %73 : vector<1x8x128xf32> to vector<8x128xf32>
    %75 = vector.shape_cast %72 : vector<8x128xf32> to vector<1x8x128xf32>
    tpu.vector_store %arg13[%c0_26, %c8_27, %c0_28], %75 {strides = array<i32>} : memref<1x64x128xf32, #tpu.memory_space<vmem>>, vector<1x8x128xf32>,
    %cst_29 = arith.constant dense<0.000000e+00> : vector<8x384xf32>
    %76 = tpu.matmul %72, %3, %cst_29 {dimension_numbers = #tpu.dot_dimension_numbers<[1], [0], [0], [1], [0, 0, 1, 1], [], []>} : vector<8x128xf32>, vector<128x384xf32>, vector<8x384xf32> -> vector<8x384xf32>
    %c16 = arith.constant 16 : index
    %c0_30 = arith.constant 0 : index
    %77 = vector.load %arg12[%c16, %c0_30] : memref<64x384xf32, #tpu.memory_space<vmem>>, vector<8x384xf32>
    %78 = vector.extract_strided_slice %77 {offsets = [0, 0], sizes = [8, 128], strides = [1, 1]} : vector<8x384xf32> to vector<8x128xf32>
    %79 = vector.extract_strided_slice %76 {offsets = [0, 0], sizes = [8, 128], strides = [1, 1]} : vector<8x384xf32> to vector<8x128xf32>
    %80 = arith.addf %78, %79 : vector<8x128xf32>
    %81 = arith.negf %80 : vector<8x128xf32>
    %82 = math.exp %81 : vector<8x128xf32>
    %cst_31 = arith.constant 1.000000e+00 : f32
    %83 = vector.broadcast %cst_31 : f32 to vector<8x128xf32>
    %84 = arith.addf %83, %82 : vector<8x128xf32>
    %85 = arith.divf %83, %84 : vector<8x128xf32>
    %86 = vector.extract_strided_slice %77 {offsets = [0, 128], sizes = [8, 128], strides = [1, 1]} : vector<8x384xf32> to vector<8x128xf32>
    %87 = vector.extract_strided_slice %76 {offsets = [0, 128], sizes = [8, 128], strides = [1, 1]} : vector<8x384xf32> to vector<8x128xf32>
    %88 = arith.addf %86, %87 : vector<8x128xf32>
    %89 = arith.negf %88 : vector<8x128xf32>
    %90 = math.exp %89 : vector<8x128xf32>
    %cst_32 = arith.constant 1.000000e+00 : f32
    %91 = vector.broadcast %cst_32 : f32 to vector<8x128xf32>
    %92 = arith.addf %91, %90 : vector<8x128xf32>
    %93 = arith.divf %91, %92 : vector<8x128xf32>
    %94 = vector.extract_strided_slice %77 {offsets = [0, 256], sizes = [8, 128], strides = [1, 1]} : vector<8x384xf32> to vector<8x128xf32>
    %95 = vector.extract_strided_slice %76 {offsets = [0, 256], sizes = [8, 128], strides = [1, 1]} : vector<8x384xf32> to vector<8x128xf32>
    %96 = arith.addf %95, %10 : vector<8x128xf32>
    %97 = arith.mulf %85, %96 : vector<8x128xf32>
    %98 = arith.addf %94, %97 : vector<8x128xf32>
    %99 = math.tanh %98 : vector<8x128xf32>
    %cst_33 = arith.constant 1.000000e+00 : f32
    %100 = vector.broadcast %cst_33 : f32 to vector<8x128xf32>
    %101 = arith.subf %100, %93 : vector<8x128xf32>
    %102 = arith.mulf %101, %99 : vector<8x128xf32>
    %103 = arith.mulf %93, %72 : vector<8x128xf32>
    %104 = arith.addf %102, %103 : vector<8x128xf32>
    %c0_34 = arith.constant 0 : index
    %c16_35 = arith.constant 16 : index
    %c0_36 = arith.constant 0 : index
    %105 = vector.load %arg13[%c0_34, %c16_35, %c0_36] : memref<1x64x128xf32, #tpu.memory_space<vmem>>, vector<1x8x128xf32>
    %106 = vector.shape_cast %105 : vector<1x8x128xf32> to vector<8x128xf32>
    %107 = vector.shape_cast %104 : vector<8x128xf32> to vector<1x8x128xf32>
    tpu.vector_store %arg13[%c0_34, %c16_35, %c0_36], %107 {strides = array<i32>} : memref<1x64x128xf32, #tpu.memory_space<vmem>>, vector<1x8x128xf32>,
    %cst_37 = arith.constant dense<0.000000e+00> : vector<8x384xf32>
    %108 = tpu.matmul %104, %3, %cst_37 {dimension_numbers = #tpu.dot_dimension_numbers<[1], [0], [0], [1], [0, 0, 1, 1], [], []>} : vector<8x128xf32>, vector<128x384xf32>, vector<8x384xf32> -> vector<8x384xf32>
    %c24 = arith.constant 24 : index
    %c0_38 = arith.constant 0 : index
    %109 = vector.load %arg12[%c24, %c0_38] : memref<64x384xf32, #tpu.memory_space<vmem>>, vector<8x384xf32>
    %110 = vector.extract_strided_slice %109 {offsets = [0, 0], sizes = [8, 128], strides = [1, 1]} : vector<8x384xf32> to vector<8x128xf32>
    %111 = vector.extract_strided_slice %108 {offsets = [0, 0], sizes = [8, 128], strides = [1, 1]} : vector<8x384xf32> to vector<8x128xf32>
    %112 = arith.addf %110, %111 : vector<8x128xf32>
    %113 = arith.negf %112 : vector<8x128xf32>
    %114 = math.exp %113 : vector<8x128xf32>
    %cst_39 = arith.constant 1.000000e+00 : f32
    %115 = vector.broadcast %cst_39 : f32 to vector<8x128xf32>
    %116 = arith.addf %115, %114 : vector<8x128xf32>
    %117 = arith.divf %115, %116 : vector<8x128xf32>
    %118 = vector.extract_strided_slice %109 {offsets = [0, 128], sizes = [8, 128], strides = [1, 1]} : vector<8x384xf32> to vector<8x128xf32>
    %119 = vector.extract_strided_slice %108 {offsets = [0, 128], sizes = [8, 128], strides = [1, 1]} : vector<8x384xf32> to vector<8x128xf32>
    %120 = arith.addf %118, %119 : vector<8x128xf32>
    %121 = arith.negf %120 : vector<8x128xf32>
    %122 = math.exp %121 : vector<8x128xf32>
    %cst_40 = arith.constant 1.000000e+00 : f32
    %123 = vector.broadcast %cst_40 : f32 to vector<8x128xf32>
    %124 = arith.addf %123, %122 : vector<8x128xf32>
    %125 = arith.divf %123, %124 : vector<8x128xf32>
    %126 = vector.extract_strided_slice %109 {offsets = [0, 256], sizes = [8, 128], strides = [1, 1]} : vector<8x384xf32> to vector<8x128xf32>
    %127 = vector.extract_strided_slice %108 {offsets = [0, 256], sizes = [8, 128], strides = [1, 1]} : vector<8x384xf32> to vector<8x128xf32>
    %128 = arith.addf %127, %10 : vector<8x128xf32>
    %129 = arith.mulf %117, %128 : vector<8x128xf32>
    %130 = arith.addf %126, %129 : vector<8x128xf32>
    %131 = math.tanh %130 : vector<8x128xf32>
    %cst_41 = arith.constant 1.000000e+00 : f32
    %132 = vector.broadcast %cst_41 : f32 to vector<8x128xf32>
    %133 = arith.subf %132, %125 : vector<8x128xf32>
    %134 = arith.mulf %133, %131 : vector<8x128xf32>
    %135 = arith.mulf %125, %104 : vector<8x128xf32>
    %136 = arith.addf %134, %135 : vector<8x128xf32>
    %c0_42 = arith.constant 0 : index
    %c24_43 = arith.constant 24 : index
    %c0_44 = arith.constant 0 : index
    %137 = vector.load %arg13[%c0_42, %c24_43, %c0_44] : memref<1x64x128xf32, #tpu.memory_space<vmem>>, vector<1x8x128xf32>
    %138 = vector.shape_cast %137 : vector<1x8x128xf32> to vector<8x128xf32>
    %139 = vector.shape_cast %136 : vector<8x128xf32> to vector<1x8x128xf32>
    tpu.vector_store %arg13[%c0_42, %c24_43, %c0_44], %139 {strides = array<i32>} : memref<1x64x128xf32, #tpu.memory_space<vmem>>, vector<1x8x128xf32>,
    %cst_45 = arith.constant dense<0.000000e+00> : vector<8x384xf32>
    %140 = tpu.matmul %136, %3, %cst_45 {dimension_numbers = #tpu.dot_dimension_numbers<[1], [0], [0], [1], [0, 0, 1, 1], [], []>} : vector<8x128xf32>, vector<128x384xf32>, vector<8x384xf32> -> vector<8x384xf32>
    %c32 = arith.constant 32 : index
    %c0_46 = arith.constant 0 : index
    %141 = vector.load %arg12[%c32, %c0_46] : memref<64x384xf32, #tpu.memory_space<vmem>>, vector<8x384xf32>
    %142 = vector.extract_strided_slice %141 {offsets = [0, 0], sizes = [8, 128], strides = [1, 1]} : vector<8x384xf32> to vector<8x128xf32>
    %143 = vector.extract_strided_slice %140 {offsets = [0, 0], sizes = [8, 128], strides = [1, 1]} : vector<8x384xf32> to vector<8x128xf32>
    %144 = arith.addf %142, %143 : vector<8x128xf32>
    %145 = arith.negf %144 : vector<8x128xf32>
    %146 = math.exp %145 : vector<8x128xf32>
    %cst_47 = arith.constant 1.000000e+00 : f32
    %147 = vector.broadcast %cst_47 : f32 to vector<8x128xf32>
    %148 = arith.addf %147, %146 : vector<8x128xf32>
    %149 = arith.divf %147, %148 : vector<8x128xf32>
    %150 = vector.extract_strided_slice %141 {offsets = [0, 128], sizes = [8, 128], strides = [1, 1]} : vector<8x384xf32> to vector<8x128xf32>
    %151 = vector.extract_strided_slice %140 {offsets = [0, 128], sizes = [8, 128], strides = [1, 1]} : vector<8x384xf32> to vector<8x128xf32>
    %152 = arith.addf %150, %151 : vector<8x128xf32>
    %153 = arith.negf %152 : vector<8x128xf32>
    %154 = math.exp %153 : vector<8x128xf32>
    %cst_48 = arith.constant 1.000000e+00 : f32
    %155 = vector.broadcast %cst_48 : f32 to vector<8x128xf32>
    %156 = arith.addf %155, %154 : vector<8x128xf32>
    %157 = arith.divf %155, %156 : vector<8x128xf32>
    %158 = vector.extract_strided_slice %141 {offsets = [0, 256], sizes = [8, 128], strides = [1, 1]} : vector<8x384xf32> to vector<8x128xf32>
    %159 = vector.extract_strided_slice %140 {offsets = [0, 256], sizes = [8, 128], strides = [1, 1]} : vector<8x384xf32> to vector<8x128xf32>
    %160 = arith.addf %159, %10 : vector<8x128xf32>
    %161 = arith.mulf %149, %160 : vector<8x128xf32>
    %162 = arith.addf %158, %161 : vector<8x128xf32>
    %163 = math.tanh %162 : vector<8x128xf32>
    %cst_49 = arith.constant 1.000000e+00 : f32
    %164 = vector.broadcast %cst_49 : f32 to vector<8x128xf32>
    %165 = arith.subf %164, %157 : vector<8x128xf32>
    %166 = arith.mulf %165, %163 : vector<8x128xf32>
    %167 = arith.mulf %157, %136 : vector<8x128xf32>
    %168 = arith.addf %166, %167 : vector<8x128xf32>
    %c0_50 = arith.constant 0 : index
    %c32_51 = arith.constant 32 : index
    %c0_52 = arith.constant 0 : index
    %169 = vector.load %arg13[%c0_50, %c32_51, %c0_52] : memref<1x64x128xf32, #tpu.memory_space<vmem>>, vector<1x8x128xf32>
    %170 = vector.shape_cast %169 : vector<1x8x128xf32> to vector<8x128xf32>
    %171 = vector.shape_cast %168 : vector<8x128xf32> to vector<1x8x128xf32>
    tpu.vector_store %arg13[%c0_50, %c32_51, %c0_52], %171 {strides = array<i32>} : memref<1x64x128xf32, #tpu.memory_space<vmem>>, vector<1x8x128xf32>,
    %cst_53 = arith.constant dense<0.000000e+00> : vector<8x384xf32>
    %172 = tpu.matmul %168, %3, %cst_53 {dimension_numbers = #tpu.dot_dimension_numbers<[1], [0], [0], [1], [0, 0, 1, 1], [], []>} : vector<8x128xf32>, vector<128x384xf32>, vector<8x384xf32> -> vector<8x384xf32>
    %c40 = arith.constant 40 : index
    %c0_54 = arith.constant 0 : index
    %173 = vector.load %arg12[%c40, %c0_54] : memref<64x384xf32, #tpu.memory_space<vmem>>, vector<8x384xf32>
    %174 = vector.extract_strided_slice %173 {offsets = [0, 0], sizes = [8, 128], strides = [1, 1]} : vector<8x384xf32> to vector<8x128xf32>
    %175 = vector.extract_strided_slice %172 {offsets = [0, 0], sizes = [8, 128], strides = [1, 1]} : vector<8x384xf32> to vector<8x128xf32>
    %176 = arith.addf %174, %175 : vector<8x128xf32>
    %177 = arith.negf %176 : vector<8x128xf32>
    %178 = math.exp %177 : vector<8x128xf32>
    %cst_55 = arith.constant 1.000000e+00 : f32
    %179 = vector.broadcast %cst_55 : f32 to vector<8x128xf32>
    %180 = arith.addf %179, %178 : vector<8x128xf32>
    %181 = arith.divf %179, %180 : vector<8x128xf32>
    %182 = vector.extract_strided_slice %173 {offsets = [0, 128], sizes = [8, 128], strides = [1, 1]} : vector<8x384xf32> to vector<8x128xf32>
    %183 = vector.extract_strided_slice %172 {offsets = [0, 128], sizes = [8, 128], strides = [1, 1]} : vector<8x384xf32> to vector<8x128xf32>
    %184 = arith.addf %182, %183 : vector<8x128xf32>
    %185 = arith.negf %184 : vector<8x128xf32>
    %186 = math.exp %185 : vector<8x128xf32>
    %cst_56 = arith.constant 1.000000e+00 : f32
    %187 = vector.broadcast %cst_56 : f32 to vector<8x128xf32>
    %188 = arith.addf %187, %186 : vector<8x128xf32>
    %189 = arith.divf %187, %188 : vector<8x128xf32>
    %190 = vector.extract_strided_slice %173 {offsets = [0, 256], sizes = [8, 128], strides = [1, 1]} : vector<8x384xf32> to vector<8x128xf32>
    %191 = vector.extract_strided_slice %172 {offsets = [0, 256], sizes = [8, 128], strides = [1, 1]} : vector<8x384xf32> to vector<8x128xf32>
    %192 = arith.addf %191, %10 : vector<8x128xf32>
    %193 = arith.mulf %181, %192 : vector<8x128xf32>
    %194 = arith.addf %190, %193 : vector<8x128xf32>
    %195 = math.tanh %194 : vector<8x128xf32>
    %cst_57 = arith.constant 1.000000e+00 : f32
    %196 = vector.broadcast %cst_57 : f32 to vector<8x128xf32>
    %197 = arith.subf %196, %189 : vector<8x128xf32>
    %198 = arith.mulf %197, %195 : vector<8x128xf32>
    %199 = arith.mulf %189, %168 : vector<8x128xf32>
    %200 = arith.addf %198, %199 : vector<8x128xf32>
    %c0_58 = arith.constant 0 : index
    %c40_59 = arith.constant 40 : index
    %c0_60 = arith.constant 0 : index
    %201 = vector.load %arg13[%c0_58, %c40_59, %c0_60] : memref<1x64x128xf32, #tpu.memory_space<vmem>>, vector<1x8x128xf32>
    %202 = vector.shape_cast %201 : vector<1x8x128xf32> to vector<8x128xf32>
    %203 = vector.shape_cast %200 : vector<8x128xf32> to vector<1x8x128xf32>
    tpu.vector_store %arg13[%c0_58, %c40_59, %c0_60], %203 {strides = array<i32>} : memref<1x64x128xf32, #tpu.memory_space<vmem>>, vector<1x8x128xf32>,
    %cst_61 = arith.constant dense<0.000000e+00> : vector<8x384xf32>
    %204 = tpu.matmul %200, %3, %cst_61 {dimension_numbers = #tpu.dot_dimension_numbers<[1], [0], [0], [1], [0, 0, 1, 1], [], []>} : vector<8x128xf32>, vector<128x384xf32>, vector<8x384xf32> -> vector<8x384xf32>
    %c48 = arith.constant 48 : index
    %c0_62 = arith.constant 0 : index
    %205 = vector.load %arg12[%c48, %c0_62] : memref<64x384xf32, #tpu.memory_space<vmem>>, vector<8x384xf32>
    %206 = vector.extract_strided_slice %205 {offsets = [0, 0], sizes = [8, 128], strides = [1, 1]} : vector<8x384xf32> to vector<8x128xf32>
    %207 = vector.extract_strided_slice %204 {offsets = [0, 0], sizes = [8, 128], strides = [1, 1]} : vector<8x384xf32> to vector<8x128xf32>
    %208 = arith.addf %206, %207 : vector<8x128xf32>
    %209 = arith.negf %208 : vector<8x128xf32>
    %210 = math.exp %209 : vector<8x128xf32>
    %cst_63 = arith.constant 1.000000e+00 : f32
    %211 = vector.broadcast %cst_63 : f32 to vector<8x128xf32>
    %212 = arith.addf %211, %210 : vector<8x128xf32>
    %213 = arith.divf %211, %212 : vector<8x128xf32>
    %214 = vector.extract_strided_slice %205 {offsets = [0, 128], sizes = [8, 128], strides = [1, 1]} : vector<8x384xf32> to vector<8x128xf32>
    %215 = vector.extract_strided_slice %204 {offsets = [0, 128], sizes = [8, 128], strides = [1, 1]} : vector<8x384xf32> to vector<8x128xf32>
    %216 = arith.addf %214, %215 : vector<8x128xf32>
    %217 = arith.negf %216 : vector<8x128xf32>
    %218 = math.exp %217 : vector<8x128xf32>
    %cst_64 = arith.constant 1.000000e+00 : f32
    %219 = vector.broadcast %cst_64 : f32 to vector<8x128xf32>
    %220 = arith.addf %219, %218 : vector<8x128xf32>
    %221 = arith.divf %219, %220 : vector<8x128xf32>
    %222 = vector.extract_strided_slice %205 {offsets = [0, 256], sizes = [8, 128], strides = [1, 1]} : vector<8x384xf32> to vector<8x128xf32>
    %223 = vector.extract_strided_slice %204 {offsets = [0, 256], sizes = [8, 128], strides = [1, 1]} : vector<8x384xf32> to vector<8x128xf32>
    %224 = arith.addf %223, %10 : vector<8x128xf32>
    %225 = arith.mulf %213, %224 : vector<8x128xf32>
    %226 = arith.addf %222, %225 : vector<8x128xf32>
    %227 = math.tanh %226 : vector<8x128xf32>
    %cst_65 = arith.constant 1.000000e+00 : f32
    %228 = vector.broadcast %cst_65 : f32 to vector<8x128xf32>
    %229 = arith.subf %228, %221 : vector<8x128xf32>
    %230 = arith.mulf %229, %227 : vector<8x128xf32>
    %231 = arith.mulf %221, %200 : vector<8x128xf32>
    %232 = arith.addf %230, %231 : vector<8x128xf32>
    %c0_66 = arith.constant 0 : index
    %c48_67 = arith.constant 48 : index
    %c0_68 = arith.constant 0 : index
    %233 = vector.load %arg13[%c0_66, %c48_67, %c0_68] : memref<1x64x128xf32, #tpu.memory_space<vmem>>, vector<1x8x128xf32>
    %234 = vector.shape_cast %233 : vector<1x8x128xf32> to vector<8x128xf32>
    %235 = vector.shape_cast %232 : vector<8x128xf32> to vector<1x8x128xf32>
    tpu.vector_store %arg13[%c0_66, %c48_67, %c0_68], %235 {strides = array<i32>} : memref<1x64x128xf32, #tpu.memory_space<vmem>>, vector<1x8x128xf32>,
    %cst_69 = arith.constant dense<0.000000e+00> : vector<8x384xf32>
    %236 = tpu.matmul %232, %3, %cst_69 {dimension_numbers = #tpu.dot_dimension_numbers<[1], [0], [0], [1], [0, 0, 1, 1], [], []>} : vector<8x128xf32>, vector<128x384xf32>, vector<8x384xf32> -> vector<8x384xf32>
    %c56 = arith.constant 56 : index
    %c0_70 = arith.constant 0 : index
    %237 = vector.load %arg12[%c56, %c0_70] : memref<64x384xf32, #tpu.memory_space<vmem>>, vector<8x384xf32>
    %238 = vector.extract_strided_slice %237 {offsets = [0, 0], sizes = [8, 128], strides = [1, 1]} : vector<8x384xf32> to vector<8x128xf32>
    %239 = vector.extract_strided_slice %236 {offsets = [0, 0], sizes = [8, 128], strides = [1, 1]} : vector<8x384xf32> to vector<8x128xf32>
    %240 = arith.addf %238, %239 : vector<8x128xf32>
    %241 = arith.negf %240 : vector<8x128xf32>
    %242 = math.exp %241 : vector<8x128xf32>
    %cst_71 = arith.constant 1.000000e+00 : f32
    %243 = vector.broadcast %cst_71 : f32 to vector<8x128xf32>
    %244 = arith.addf %243, %242 : vector<8x128xf32>
    %245 = arith.divf %243, %244 : vector<8x128xf32>
    %246 = vector.extract_strided_slice %237 {offsets = [0, 128], sizes = [8, 128], strides = [1, 1]} : vector<8x384xf32> to vector<8x128xf32>
    %247 = vector.extract_strided_slice %236 {offsets = [0, 128], sizes = [8, 128], strides = [1, 1]} : vector<8x384xf32> to vector<8x128xf32>
    %248 = arith.addf %246, %247 : vector<8x128xf32>
    %249 = arith.negf %248 : vector<8x128xf32>
    %250 = math.exp %249 : vector<8x128xf32>
    %cst_72 = arith.constant 1.000000e+00 : f32
    %251 = vector.broadcast %cst_72 : f32 to vector<8x128xf32>
    %252 = arith.addf %251, %250 : vector<8x128xf32>
    %253 = arith.divf %251, %252 : vector<8x128xf32>
    %254 = vector.extract_strided_slice %237 {offsets = [0, 256], sizes = [8, 128], strides = [1, 1]} : vector<8x384xf32> to vector<8x128xf32>
    %255 = vector.extract_strided_slice %236 {offsets = [0, 256], sizes = [8, 128], strides = [1, 1]} : vector<8x384xf32> to vector<8x128xf32>
    %256 = arith.addf %255, %10 : vector<8x128xf32>
    %257 = arith.mulf %245, %256 : vector<8x128xf32>
    %258 = arith.addf %254, %257 : vector<8x128xf32>
    %259 = math.tanh %258 : vector<8x128xf32>
    %cst_73 = arith.constant 1.000000e+00 : f32
    %260 = vector.broadcast %cst_73 : f32 to vector<8x128xf32>
    %261 = arith.subf %260, %253 : vector<8x128xf32>
    %262 = arith.mulf %261, %259 : vector<8x128xf32>
    %263 = arith.mulf %253, %232 : vector<8x128xf32>
    %264 = arith.addf %262, %263 : vector<8x128xf32>
    %c0_74 = arith.constant 0 : index
    %c56_75 = arith.constant 56 : index
    %c0_76 = arith.constant 0 : index
    %265 = vector.load %arg13[%c0_74, %c56_75, %c0_76] : memref<1x64x128xf32, #tpu.memory_space<vmem>>, vector<1x8x128xf32>
    %266 = vector.shape_cast %265 : vector<1x8x128xf32> to vector<8x128xf32>
    %267 = vector.shape_cast %264 : vector<8x128xf32> to vector<1x8x128xf32>
    tpu.vector_store %arg13[%c0_74, %c56_75, %c0_76], %267 {strides = array<i32>} : memref<1x64x128xf32, #tpu.memory_space<vmem>>, vector<1x8x128xf32>,
    %c0_77 = arith.constant 0 : index
    %c0_78 = arith.constant 0 : index
    %c0_79 = arith.constant 0 : index
    %268 = vector.load %arg13[%c0_77, %c0_78, %c0_79] : memref<1x64x128xf32, #tpu.memory_space<vmem>>, vector<1x64x128xf32>
    %269 = vector.shape_cast %268 : vector<1x64x128xf32> to vector<64x128xf32>
    %c0_80 = arith.constant 0 : index
    %c0_81 = arith.constant 0 : index
    %c0_82 = arith.constant 0 : index
    %270 = vector.load %arg5[%c0_80, %c0_81, %c0_82] : memref<1x128x384xf32, #tpu.memory_space<vmem>>, vector<1x128x384xf32>
    %271 = vector.shape_cast %270 : vector<1x128x384xf32> to vector<128x384xf32>
    %c0_83 = arith.constant 0 : index
    %c0_84 = arith.constant 0 : index
    %c0_85 = arith.constant 0 : index
    %272 = vector.load %arg6[%c0_83, %c0_84, %c0_85] : memref<1x1x384xf32, #tpu.memory_space<vmem>>, vector<1x1x384xf32>
    %273 = vector.shape_cast %272 : vector<1x1x384xf32> to vector<1x384xf32>
    %c0_86 = arith.constant 0 : index
    %c0_87 = arith.constant 0 : index
    %c0_88 = arith.constant 0 : index
    %274 = vector.load %arg7[%c0_86, %c0_87, %c0_88] : memref<1x128x384xf32, #tpu.memory_space<vmem>>, vector<1x128x384xf32>
    %275 = vector.shape_cast %274 : vector<1x128x384xf32> to vector<128x384xf32>
    %c0_89 = arith.constant 0 : index
    %c0_90 = arith.constant 0 : index
    %c0_91 = arith.constant 0 : index
    %276 = vector.load %arg8[%c0_89, %c0_90, %c0_91] : memref<1x1x128xf32, #tpu.memory_space<vmem>>, vector<1x1x128xf32>
    %277 = vector.shape_cast %276 : vector<1x1x128xf32> to vector<1x128xf32>
    %cst_92 = arith.constant dense<0.000000e+00> : vector<64x384xf32>
    %278 = tpu.matmul %269, %271, %cst_92 {dimension_numbers = #tpu.dot_dimension_numbers<[1], [0], [0], [1], [0, 0, 1, 1], [], []>} : vector<64x128xf32>, vector<128x384xf32>, vector<64x384xf32> -> vector<64x384xf32>
    %279 = vector.broadcast %273 : vector<1x384xf32> to vector<64x384xf32>
    %280 = arith.addf %278, %279 : vector<64x384xf32>
    %c0_93 = arith.constant 0 : index
    %c0_94 = arith.constant 0 : index
    %281 = vector.load %arg12[%c0_93, %c0_94] : memref<64x384xf32, #tpu.memory_space<vmem>>, vector<64x384xf32>
    tpu.vector_store %arg12[%c0_93, %c0_94], %280 {strides = array<i32>} : memref<64x384xf32, #tpu.memory_space<vmem>>, vector<64x384xf32>,
    %282 = vector.shape_cast %277 : vector<1x128xf32> to vector<1x128xf32>
    %283 = vector.broadcast %282 : vector<1x128xf32> to vector<8x128xf32>
    %cst_95 = arith.constant 0.000000e+00 : f32
    %284 = vector.broadcast %cst_95 : f32 to vector<8x128xf32>
    %cst_96 = arith.constant dense<0.000000e+00> : vector<8x384xf32>
    %285 = tpu.matmul %284, %275, %cst_96 {dimension_numbers = #tpu.dot_dimension_numbers<[1], [0], [0], [1], [0, 0, 1, 1], [], []>} : vector<8x128xf32>, vector<128x384xf32>, vector<8x384xf32> -> vector<8x384xf32>
    %c0_97 = arith.constant 0 : index
    %c0_98 = arith.constant 0 : index
    %286 = vector.load %arg12[%c0_97, %c0_98] : memref<64x384xf32, #tpu.memory_space<vmem>>, vector<8x384xf32>
    %287 = vector.extract_strided_slice %286 {offsets = [0, 0], sizes = [8, 128], strides = [1, 1]} : vector<8x384xf32> to vector<8x128xf32>
    %288 = vector.extract_strided_slice %285 {offsets = [0, 0], sizes = [8, 128], strides = [1, 1]} : vector<8x384xf32> to vector<8x128xf32>
    %289 = arith.addf %287, %288 : vector<8x128xf32>
    %290 = arith.negf %289 : vector<8x128xf32>
    %291 = math.exp %290 : vector<8x128xf32>
    %cst_99 = arith.constant 1.000000e+00 : f32
    %292 = vector.broadcast %cst_99 : f32 to vector<8x128xf32>
    %293 = arith.addf %292, %291 : vector<8x128xf32>
    %294 = arith.divf %292, %293 : vector<8x128xf32>
    %295 = vector.extract_strided_slice %286 {offsets = [0, 128], sizes = [8, 128], strides = [1, 1]} : vector<8x384xf32> to vector<8x128xf32>
    %296 = vector.extract_strided_slice %285 {offsets = [0, 128], sizes = [8, 128], strides = [1, 1]} : vector<8x384xf32> to vector<8x128xf32>
    %297 = arith.addf %295, %296 : vector<8x128xf32>
    %298 = arith.negf %297 : vector<8x128xf32>
    %299 = math.exp %298 : vector<8x128xf32>
    %cst_100 = arith.constant 1.000000e+00 : f32
    %300 = vector.broadcast %cst_100 : f32 to vector<8x128xf32>
    %301 = arith.addf %300, %299 : vector<8x128xf32>
    %302 = arith.divf %300, %301 : vector<8x128xf32>
    %303 = vector.extract_strided_slice %286 {offsets = [0, 256], sizes = [8, 128], strides = [1, 1]} : vector<8x384xf32> to vector<8x128xf32>
    %304 = vector.extract_strided_slice %285 {offsets = [0, 256], sizes = [8, 128], strides = [1, 1]} : vector<8x384xf32> to vector<8x128xf32>
    %305 = arith.addf %304, %283 : vector<8x128xf32>
    %306 = arith.mulf %294, %305 : vector<8x128xf32>
    %307 = arith.addf %303, %306 : vector<8x128xf32>
    %308 = math.tanh %307 : vector<8x128xf32>
    %cst_101 = arith.constant 1.000000e+00 : f32
    %309 = vector.broadcast %cst_101 : f32 to vector<8x128xf32>
    %310 = arith.subf %309, %302 : vector<8x128xf32>
    %311 = arith.mulf %310, %308 : vector<8x128xf32>
    %312 = arith.mulf %302, %284 : vector<8x128xf32>
    %313 = arith.addf %311, %312 : vector<8x128xf32>
    %cst_102 = arith.constant dense<0.000000e+00> : vector<8x384xf32>
    %314 = tpu.matmul %313, %275, %cst_102 {dimension_numbers = #tpu.dot_dimension_numbers<[1], [0], [0], [1], [0, 0, 1, 1], [], []>} : vector<8x128xf32>, vector<128x384xf32>, vector<8x384xf32> -> vector<8x384xf32>
    %c8_103 = arith.constant 8 : index
    %c0_104 = arith.constant 0 : index
    %315 = vector.load %arg12[%c8_103, %c0_104] : memref<64x384xf32, #tpu.memory_space<vmem>>, vector<8x384xf32>
    %316 = vector.extract_strided_slice %315 {offsets = [0, 0], sizes = [8, 128], strides = [1, 1]} : vector<8x384xf32> to vector<8x128xf32>
    %317 = vector.extract_strided_slice %314 {offsets = [0, 0], sizes = [8, 128], strides = [1, 1]} : vector<8x384xf32> to vector<8x128xf32>
    %318 = arith.addf %316, %317 : vector<8x128xf32>
    %319 = arith.negf %318 : vector<8x128xf32>
    %320 = math.exp %319 : vector<8x128xf32>
    %cst_105 = arith.constant 1.000000e+00 : f32
    %321 = vector.broadcast %cst_105 : f32 to vector<8x128xf32>
    %322 = arith.addf %321, %320 : vector<8x128xf32>
    %323 = arith.divf %321, %322 : vector<8x128xf32>
    %324 = vector.extract_strided_slice %315 {offsets = [0, 128], sizes = [8, 128], strides = [1, 1]} : vector<8x384xf32> to vector<8x128xf32>
    %325 = vector.extract_strided_slice %314 {offsets = [0, 128], sizes = [8, 128], strides = [1, 1]} : vector<8x384xf32> to vector<8x128xf32>
    %326 = arith.addf %324, %325 : vector<8x128xf32>
    %327 = arith.negf %326 : vector<8x128xf32>
    %328 = math.exp %327 : vector<8x128xf32>
    %cst_106 = arith.constant 1.000000e+00 : f32
    %329 = vector.broadcast %cst_106 : f32 to vector<8x128xf32>
    %330 = arith.addf %329, %328 : vector<8x128xf32>
    %331 = arith.divf %329, %330 : vector<8x128xf32>
    %332 = vector.extract_strided_slice %315 {offsets = [0, 256], sizes = [8, 128], strides = [1, 1]} : vector<8x384xf32> to vector<8x128xf32>
    %333 = vector.extract_strided_slice %314 {offsets = [0, 256], sizes = [8, 128], strides = [1, 1]} : vector<8x384xf32> to vector<8x128xf32>
    %334 = arith.addf %333, %283 : vector<8x128xf32>
    %335 = arith.mulf %323, %334 : vector<8x128xf32>
    %336 = arith.addf %332, %335 : vector<8x128xf32>
    %337 = math.tanh %336 : vector<8x128xf32>
    %cst_107 = arith.constant 1.000000e+00 : f32
    %338 = vector.broadcast %cst_107 : f32 to vector<8x128xf32>
    %339 = arith.subf %338, %331 : vector<8x128xf32>
    %340 = arith.mulf %339, %337 : vector<8x128xf32>
    %341 = arith.mulf %331, %313 : vector<8x128xf32>
    %342 = arith.addf %340, %341 : vector<8x128xf32>
    %cst_108 = arith.constant dense<0.000000e+00> : vector<8x384xf32>
    %343 = tpu.matmul %342, %275, %cst_108 {dimension_numbers = #tpu.dot_dimension_numbers<[1], [0], [0], [1], [0, 0, 1, 1], [], []>} : vector<8x128xf32>, vector<128x384xf32>, vector<8x384xf32> -> vector<8x384xf32>
    %c16_109 = arith.constant 16 : index
    %c0_110 = arith.constant 0 : index
    %344 = vector.load %arg12[%c16_109, %c0_110] : memref<64x384xf32, #tpu.memory_space<vmem>>, vector<8x384xf32>
    %345 = vector.extract_strided_slice %344 {offsets = [0, 0], sizes = [8, 128], strides = [1, 1]} : vector<8x384xf32> to vector<8x128xf32>
    %346 = vector.extract_strided_slice %343 {offsets = [0, 0], sizes = [8, 128], strides = [1, 1]} : vector<8x384xf32> to vector<8x128xf32>
    %347 = arith.addf %345, %346 : vector<8x128xf32>
    %348 = arith.negf %347 : vector<8x128xf32>
    %349 = math.exp %348 : vector<8x128xf32>
    %cst_111 = arith.constant 1.000000e+00 : f32
    %350 = vector.broadcast %cst_111 : f32 to vector<8x128xf32>
    %351 = arith.addf %350, %349 : vector<8x128xf32>
    %352 = arith.divf %350, %351 : vector<8x128xf32>
    %353 = vector.extract_strided_slice %344 {offsets = [0, 128], sizes = [8, 128], strides = [1, 1]} : vector<8x384xf32> to vector<8x128xf32>
    %354 = vector.extract_strided_slice %343 {offsets = [0, 128], sizes = [8, 128], strides = [1, 1]} : vector<8x384xf32> to vector<8x128xf32>
    %355 = arith.addf %353, %354 : vector<8x128xf32>
    %356 = arith.negf %355 : vector<8x128xf32>
    %357 = math.exp %356 : vector<8x128xf32>
    %cst_112 = arith.constant 1.000000e+00 : f32
    %358 = vector.broadcast %cst_112 : f32 to vector<8x128xf32>
    %359 = arith.addf %358, %357 : vector<8x128xf32>
    %360 = arith.divf %358, %359 : vector<8x128xf32>
    %361 = vector.extract_strided_slice %344 {offsets = [0, 256], sizes = [8, 128], strides = [1, 1]} : vector<8x384xf32> to vector<8x128xf32>
    %362 = vector.extract_strided_slice %343 {offsets = [0, 256], sizes = [8, 128], strides = [1, 1]} : vector<8x384xf32> to vector<8x128xf32>
    %363 = arith.addf %362, %283 : vector<8x128xf32>
    %364 = arith.mulf %352, %363 : vector<8x128xf32>
    %365 = arith.addf %361, %364 : vector<8x128xf32>
    %366 = math.tanh %365 : vector<8x128xf32>
    %cst_113 = arith.constant 1.000000e+00 : f32
    %367 = vector.broadcast %cst_113 : f32 to vector<8x128xf32>
    %368 = arith.subf %367, %360 : vector<8x128xf32>
    %369 = arith.mulf %368, %366 : vector<8x128xf32>
    %370 = arith.mulf %360, %342 : vector<8x128xf32>
    %371 = arith.addf %369, %370 : vector<8x128xf32>
    %cst_114 = arith.constant dense<0.000000e+00> : vector<8x384xf32>
    %372 = tpu.matmul %371, %275, %cst_114 {dimension_numbers = #tpu.dot_dimension_numbers<[1], [0], [0], [1], [0, 0, 1, 1], [], []>} : vector<8x128xf32>, vector<128x384xf32>, vector<8x384xf32> -> vector<8x384xf32>
    %c24_115 = arith.constant 24 : index
    %c0_116 = arith.constant 0 : index
    %373 = vector.load %arg12[%c24_115, %c0_116] : memref<64x384xf32, #tpu.memory_space<vmem>>, vector<8x384xf32>
    %374 = vector.extract_strided_slice %373 {offsets = [0, 0], sizes = [8, 128], strides = [1, 1]} : vector<8x384xf32> to vector<8x128xf32>
    %375 = vector.extract_strided_slice %372 {offsets = [0, 0], sizes = [8, 128], strides = [1, 1]} : vector<8x384xf32> to vector<8x128xf32>
    %376 = arith.addf %374, %375 : vector<8x128xf32>
    %377 = arith.negf %376 : vector<8x128xf32>
    %378 = math.exp %377 : vector<8x128xf32>
    %cst_117 = arith.constant 1.000000e+00 : f32
    %379 = vector.broadcast %cst_117 : f32 to vector<8x128xf32>
    %380 = arith.addf %379, %378 : vector<8x128xf32>
    %381 = arith.divf %379, %380 : vector<8x128xf32>
    %382 = vector.extract_strided_slice %373 {offsets = [0, 128], sizes = [8, 128], strides = [1, 1]} : vector<8x384xf32> to vector<8x128xf32>
    %383 = vector.extract_strided_slice %372 {offsets = [0, 128], sizes = [8, 128], strides = [1, 1]} : vector<8x384xf32> to vector<8x128xf32>
    %384 = arith.addf %382, %383 : vector<8x128xf32>
    %385 = arith.negf %384 : vector<8x128xf32>
    %386 = math.exp %385 : vector<8x128xf32>
    %cst_118 = arith.constant 1.000000e+00 : f32
    %387 = vector.broadcast %cst_118 : f32 to vector<8x128xf32>
    %388 = arith.addf %387, %386 : vector<8x128xf32>
    %389 = arith.divf %387, %388 : vector<8x128xf32>
    %390 = vector.extract_strided_slice %373 {offsets = [0, 256], sizes = [8, 128], strides = [1, 1]} : vector<8x384xf32> to vector<8x128xf32>
    %391 = vector.extract_strided_slice %372 {offsets = [0, 256], sizes = [8, 128], strides = [1, 1]} : vector<8x384xf32> to vector<8x128xf32>
    %392 = arith.addf %391, %283 : vector<8x128xf32>
    %393 = arith.mulf %381, %392 : vector<8x128xf32>
    %394 = arith.addf %390, %393 : vector<8x128xf32>
    %395 = math.tanh %394 : vector<8x128xf32>
    %cst_119 = arith.constant 1.000000e+00 : f32
    %396 = vector.broadcast %cst_119 : f32 to vector<8x128xf32>
    %397 = arith.subf %396, %389 : vector<8x128xf32>
    %398 = arith.mulf %397, %395 : vector<8x128xf32>
    %399 = arith.mulf %389, %371 : vector<8x128xf32>
    %400 = arith.addf %398, %399 : vector<8x128xf32>
    %cst_120 = arith.constant dense<0.000000e+00> : vector<8x384xf32>
    %401 = tpu.matmul %400, %275, %cst_120 {dimension_numbers = #tpu.dot_dimension_numbers<[1], [0], [0], [1], [0, 0, 1, 1], [], []>} : vector<8x128xf32>, vector<128x384xf32>, vector<8x384xf32> -> vector<8x384xf32>
    %c32_121 = arith.constant 32 : index
    %c0_122 = arith.constant 0 : index
    %402 = vector.load %arg12[%c32_121, %c0_122] : memref<64x384xf32, #tpu.memory_space<vmem>>, vector<8x384xf32>
    %403 = vector.extract_strided_slice %402 {offsets = [0, 0], sizes = [8, 128], strides = [1, 1]} : vector<8x384xf32> to vector<8x128xf32>
    %404 = vector.extract_strided_slice %401 {offsets = [0, 0], sizes = [8, 128], strides = [1, 1]} : vector<8x384xf32> to vector<8x128xf32>
    %405 = arith.addf %403, %404 : vector<8x128xf32>
    %406 = arith.negf %405 : vector<8x128xf32>
    %407 = math.exp %406 : vector<8x128xf32>
    %cst_123 = arith.constant 1.000000e+00 : f32
    %408 = vector.broadcast %cst_123 : f32 to vector<8x128xf32>
    %409 = arith.addf %408, %407 : vector<8x128xf32>
    %410 = arith.divf %408, %409 : vector<8x128xf32>
    %411 = vector.extract_strided_slice %402 {offsets = [0, 128], sizes = [8, 128], strides = [1, 1]} : vector<8x384xf32> to vector<8x128xf32>
    %412 = vector.extract_strided_slice %401 {offsets = [0, 128], sizes = [8, 128], strides = [1, 1]} : vector<8x384xf32> to vector<8x128xf32>
    %413 = arith.addf %411, %412 : vector<8x128xf32>
    %414 = arith.negf %413 : vector<8x128xf32>
    %415 = math.exp %414 : vector<8x128xf32>
    %cst_124 = arith.constant 1.000000e+00 : f32
    %416 = vector.broadcast %cst_124 : f32 to vector<8x128xf32>
    %417 = arith.addf %416, %415 : vector<8x128xf32>
    %418 = arith.divf %416, %417 : vector<8x128xf32>
    %419 = vector.extract_strided_slice %402 {offsets = [0, 256], sizes = [8, 128], strides = [1, 1]} : vector<8x384xf32> to vector<8x128xf32>
    %420 = vector.extract_strided_slice %401 {offsets = [0, 256], sizes = [8, 128], strides = [1, 1]} : vector<8x384xf32> to vector<8x128xf32>
    %421 = arith.addf %420, %283 : vector<8x128xf32>
    %422 = arith.mulf %410, %421 : vector<8x128xf32>
    %423 = arith.addf %419, %422 : vector<8x128xf32>
    %424 = math.tanh %423 : vector<8x128xf32>
    %cst_125 = arith.constant 1.000000e+00 : f32
    %425 = vector.broadcast %cst_125 : f32 to vector<8x128xf32>
    %426 = arith.subf %425, %418 : vector<8x128xf32>
    %427 = arith.mulf %426, %424 : vector<8x128xf32>
    %428 = arith.mulf %418, %400 : vector<8x128xf32>
    %429 = arith.addf %427, %428 : vector<8x128xf32>
    %cst_126 = arith.constant dense<0.000000e+00> : vector<8x384xf32>
    %430 = tpu.matmul %429, %275, %cst_126 {dimension_numbers = #tpu.dot_dimension_numbers<[1], [0], [0], [1], [0, 0, 1, 1], [], []>} : vector<8x128xf32>, vector<128x384xf32>, vector<8x384xf32> -> vector<8x384xf32>
    %c40_127 = arith.constant 40 : index
    %c0_128 = arith.constant 0 : index
    %431 = vector.load %arg12[%c40_127, %c0_128] : memref<64x384xf32, #tpu.memory_space<vmem>>, vector<8x384xf32>
    %432 = vector.extract_strided_slice %431 {offsets = [0, 0], sizes = [8, 128], strides = [1, 1]} : vector<8x384xf32> to vector<8x128xf32>
    %433 = vector.extract_strided_slice %430 {offsets = [0, 0], sizes = [8, 128], strides = [1, 1]} : vector<8x384xf32> to vector<8x128xf32>
    %434 = arith.addf %432, %433 : vector<8x128xf32>
    %435 = arith.negf %434 : vector<8x128xf32>
    %436 = math.exp %435 : vector<8x128xf32>
    %cst_129 = arith.constant 1.000000e+00 : f32
    %437 = vector.broadcast %cst_129 : f32 to vector<8x128xf32>
    %438 = arith.addf %437, %436 : vector<8x128xf32>
    %439 = arith.divf %437, %438 : vector<8x128xf32>
    %440 = vector.extract_strided_slice %431 {offsets = [0, 128], sizes = [8, 128], strides = [1, 1]} : vector<8x384xf32> to vector<8x128xf32>
    %441 = vector.extract_strided_slice %430 {offsets = [0, 128], sizes = [8, 128], strides = [1, 1]} : vector<8x384xf32> to vector<8x128xf32>
    %442 = arith.addf %440, %441 : vector<8x128xf32>
    %443 = arith.negf %442 : vector<8x128xf32>
    %444 = math.exp %443 : vector<8x128xf32>
    %cst_130 = arith.constant 1.000000e+00 : f32
    %445 = vector.broadcast %cst_130 : f32 to vector<8x128xf32>
    %446 = arith.addf %445, %444 : vector<8x128xf32>
    %447 = arith.divf %445, %446 : vector<8x128xf32>
    %448 = vector.extract_strided_slice %431 {offsets = [0, 256], sizes = [8, 128], strides = [1, 1]} : vector<8x384xf32> to vector<8x128xf32>
    %449 = vector.extract_strided_slice %430 {offsets = [0, 256], sizes = [8, 128], strides = [1, 1]} : vector<8x384xf32> to vector<8x128xf32>
    %450 = arith.addf %449, %283 : vector<8x128xf32>
    %451 = arith.mulf %439, %450 : vector<8x128xf32>
    %452 = arith.addf %448, %451 : vector<8x128xf32>
    %453 = math.tanh %452 : vector<8x128xf32>
    %cst_131 = arith.constant 1.000000e+00 : f32
    %454 = vector.broadcast %cst_131 : f32 to vector<8x128xf32>
    %455 = arith.subf %454, %447 : vector<8x128xf32>
    %456 = arith.mulf %455, %453 : vector<8x128xf32>
    %457 = arith.mulf %447, %429 : vector<8x128xf32>
    %458 = arith.addf %456, %457 : vector<8x128xf32>
    %cst_132 = arith.constant dense<0.000000e+00> : vector<8x384xf32>
    %459 = tpu.matmul %458, %275, %cst_132 {dimension_numbers = #tpu.dot_dimension_numbers<[1], [0], [0], [1], [0, 0, 1, 1], [], []>} : vector<8x128xf32>, vector<128x384xf32>, vector<8x384xf32> -> vector<8x384xf32>
    %c48_133 = arith.constant 48 : index
    %c0_134 = arith.constant 0 : index
    %460 = vector.load %arg12[%c48_133, %c0_134] : memref<64x384xf32, #tpu.memory_space<vmem>>, vector<8x384xf32>
    %461 = vector.extract_strided_slice %460 {offsets = [0, 0], sizes = [8, 128], strides = [1, 1]} : vector<8x384xf32> to vector<8x128xf32>
    %462 = vector.extract_strided_slice %459 {offsets = [0, 0], sizes = [8, 128], strides = [1, 1]} : vector<8x384xf32> to vector<8x128xf32>
    %463 = arith.addf %461, %462 : vector<8x128xf32>
    %464 = arith.negf %463 : vector<8x128xf32>
    %465 = math.exp %464 : vector<8x128xf32>
    %cst_135 = arith.constant 1.000000e+00 : f32
    %466 = vector.broadcast %cst_135 : f32 to vector<8x128xf32>
    %467 = arith.addf %466, %465 : vector<8x128xf32>
    %468 = arith.divf %466, %467 : vector<8x128xf32>
    %469 = vector.extract_strided_slice %460 {offsets = [0, 128], sizes = [8, 128], strides = [1, 1]} : vector<8x384xf32> to vector<8x128xf32>
    %470 = vector.extract_strided_slice %459 {offsets = [0, 128], sizes = [8, 128], strides = [1, 1]} : vector<8x384xf32> to vector<8x128xf32>
    %471 = arith.addf %469, %470 : vector<8x128xf32>
    %472 = arith.negf %471 : vector<8x128xf32>
    %473 = math.exp %472 : vector<8x128xf32>
    %cst_136 = arith.constant 1.000000e+00 : f32
    %474 = vector.broadcast %cst_136 : f32 to vector<8x128xf32>
    %475 = arith.addf %474, %473 : vector<8x128xf32>
    %476 = arith.divf %474, %475 : vector<8x128xf32>
    %477 = vector.extract_strided_slice %460 {offsets = [0, 256], sizes = [8, 128], strides = [1, 1]} : vector<8x384xf32> to vector<8x128xf32>
    %478 = vector.extract_strided_slice %459 {offsets = [0, 256], sizes = [8, 128], strides = [1, 1]} : vector<8x384xf32> to vector<8x128xf32>
    %479 = arith.addf %478, %283 : vector<8x128xf32>
    %480 = arith.mulf %468, %479 : vector<8x128xf32>
    %481 = arith.addf %477, %480 : vector<8x128xf32>
    %482 = math.tanh %481 : vector<8x128xf32>
    %cst_137 = arith.constant 1.000000e+00 : f32
    %483 = vector.broadcast %cst_137 : f32 to vector<8x128xf32>
    %484 = arith.subf %483, %476 : vector<8x128xf32>
    %485 = arith.mulf %484, %482 : vector<8x128xf32>
    %486 = arith.mulf %476, %458 : vector<8x128xf32>
    %487 = arith.addf %485, %486 : vector<8x128xf32>
    %cst_138 = arith.constant dense<0.000000e+00> : vector<8x384xf32>
    %488 = tpu.matmul %487, %275, %cst_138 {dimension_numbers = #tpu.dot_dimension_numbers<[1], [0], [0], [1], [0, 0, 1, 1], [], []>} : vector<8x128xf32>, vector<128x384xf32>, vector<8x384xf32> -> vector<8x384xf32>
    %c56_139 = arith.constant 56 : index
    %c0_140 = arith.constant 0 : index
    %489 = vector.load %arg12[%c56_139, %c0_140] : memref<64x384xf32, #tpu.memory_space<vmem>>, vector<8x384xf32>
    %490 = vector.extract_strided_slice %489 {offsets = [0, 0], sizes = [8, 128], strides = [1, 1]} : vector<8x384xf32> to vector<8x128xf32>
    %491 = vector.extract_strided_slice %488 {offsets = [0, 0], sizes = [8, 128], strides = [1, 1]} : vector<8x384xf32> to vector<8x128xf32>
    %492 = arith.addf %490, %491 : vector<8x128xf32>
    %493 = arith.negf %492 : vector<8x128xf32>
    %494 = math.exp %493 : vector<8x128xf32>
    %cst_141 = arith.constant 1.000000e+00 : f32
    %495 = vector.broadcast %cst_141 : f32 to vector<8x128xf32>
    %496 = arith.addf %495, %494 : vector<8x128xf32>
    %497 = arith.divf %495, %496 : vector<8x128xf32>
    %498 = vector.extract_strided_slice %489 {offsets = [0, 128], sizes = [8, 128], strides = [1, 1]} : vector<8x384xf32> to vector<8x128xf32>
    %499 = vector.extract_strided_slice %488 {offsets = [0, 128], sizes = [8, 128], strides = [1, 1]} : vector<8x384xf32> to vector<8x128xf32>
    %500 = arith.addf %498, %499 : vector<8x128xf32>
    %501 = arith.negf %500 : vector<8x128xf32>
    %502 = math.exp %501 : vector<8x128xf32>
    %cst_142 = arith.constant 1.000000e+00 : f32
    %503 = vector.broadcast %cst_142 : f32 to vector<8x128xf32>
    %504 = arith.addf %503, %502 : vector<8x128xf32>
    %505 = arith.divf %503, %504 : vector<8x128xf32>
    %506 = vector.extract_strided_slice %489 {offsets = [0, 256], sizes = [8, 128], strides = [1, 1]} : vector<8x384xf32> to vector<8x128xf32>
    %507 = vector.extract_strided_slice %488 {offsets = [0, 256], sizes = [8, 128], strides = [1, 1]} : vector<8x384xf32> to vector<8x128xf32>
    %508 = arith.addf %507, %283 : vector<8x128xf32>
    %509 = arith.mulf %497, %508 : vector<8x128xf32>
    %510 = arith.addf %506, %509 : vector<8x128xf32>
    %511 = math.tanh %510 : vector<8x128xf32>
    %cst_143 = arith.constant 1.000000e+00 : f32
    %512 = vector.broadcast %cst_143 : f32 to vector<8x128xf32>
    %513 = arith.subf %512, %505 : vector<8x128xf32>
    %514 = arith.mulf %513, %511 : vector<8x128xf32>
    %515 = arith.mulf %505, %487 : vector<8x128xf32>
    %516 = arith.addf %514, %515 : vector<8x128xf32>
    %c0_144 = arith.constant 0 : index
    %c0_145 = arith.constant 0 : index
    %517 = vector.load %arg9[%c0_144, %c0_145] : memref<128x128xf32, #tpu.memory_space<vmem>>, vector<128x128xf32>
    %cst_146 = arith.constant dense<0.000000e+00> : vector<8x128xf32>
    %518 = tpu.matmul %516, %517, %cst_146 {dimension_numbers = #tpu.dot_dimension_numbers<[1], [0], [0], [1], [0, 0, 1, 1], [], []>} : vector<8x128xf32>, vector<128x128xf32>, vector<8x128xf32> -> vector<8x128xf32>
    %c0_147 = arith.constant 0 : index
    %c0_148 = arith.constant 0 : index
    %519 = vector.load %arg10[%c0_147, %c0_148] : memref<1x128xf32, #tpu.memory_space<vmem>>, vector<1x128xf32>
    %520 = vector.broadcast %519 : vector<1x128xf32> to vector<8x128xf32>
    %521 = arith.addf %518, %520 : vector<8x128xf32>
    %c0_149 = arith.constant 0 : index
    %c0_150 = arith.constant 0 : index
    %522 = vector.load %arg11[%c0_149, %c0_150] : memref<8x128xf32, #tpu.memory_space<vmem>>, vector<8x128xf32>
    tpu.vector_store %arg11[%c0_149, %c0_150], %521 {strides = array<i32>} : memref<8x128xf32, #tpu.memory_space<vmem>>, vector<8x128xf32>,
    return
  }
}

</mosaic_0001>

<bundles_post_ra>
// kernel: krnn_forward.1
= control target key start
LH: loop header
LB: loop body
LE: loop exit
PB: predicated region body
PF: predicated region fallthrough
CT: control target
= control target key end

     0   :  { %16 = vsyncpa [#allocation5], 0  ;;  %s7206_s0 = inlined_call_operand.vmem [shape: f32[64,12], index: 0, kind: input, shape index: {}]   ;;  %s7207_s1 = inlined_call_operand.hbm [shape: f32[12,384], index: 1, kind: input, shape index: {}]   ;;  %s7208_s2 = inlined_call_operand.vmem [shape: f32[1,384], index: 2, kind: input, shape index: {}]   ;;  %s7209_s3 = inlined_call_operand.vmem [shape: f32[128,384], index: 3, kind: input, shape index: {}]   ;;  %s7210_s4 = inlined_call_operand.vmem [shape: f32[1,128], index: 4, kind: input, shape index: {}]   ;;  %s7211_s5 = inlined_call_operand.hbm [shape: f32[1,128,384], index: 5, kind: input, shape index: {}]   ;;  %s7212_s6 = inlined_call_operand.vmem [shape: f32[1,1,384], index: 6, kind: input, shape index: {}]   ;;  %s7213_s7 = inlined_call_operand.hbm [shape: f32[1,128,384], index: 7, kind: input, shape index: {}]   ;;  %s7214_s8 = inlined_call_operand.vmem [shape: f32[1,1,128], index: 8, kind: input, shape index: {}]   ;;  %s7215_s9 = inlined_call_operand.hbm [shape: f32[128,128], index: 9, kind: input, shape index: {}]   ;;  %s7216_s10 = inlined_call_operand.vmem [shape: f32[1,128], index: 10, kind: input, shape index: {}]   ;;  %s7217_s11 = inlined_call_operand.vmem [shape: f32[8,128], index: 11, kind: output, shape index: {}]  }
   0x1   :  { %17 = vsyncpa [#allocation7], 0 }
   0x2   :  { %18 = vsyncpa [#allocation10], 0  ;;  %s5950_s17 = smov [#allocation6]   ;;  %s5951_s19 = smov [#allocation4]  }
   0x3   :  { %s44_s18 = sshll.u32 %s5950_s17, 4  ;;  %s26_s20 = sshll.u32 %s5951_s19, 4  ;;  %s45_s18 = int_to_ptr.vmem [resolvable:$true] %s44_s18  ;;  %s6022_s20 = int_to_ptr.vmem [resolvable:$true] %s26_s20 }
   0x4   :  { %s5856_s23 = scalar_lea.hbm %s7211_s5, 6144 }
   0x5   :  { %p5857_p0 = scmp.ne.s32.totalorder %s7211_s5, %s5856_s23  ;;  %p5860_p1 = scmp.lt.u32.totalorder %s5856_s23, %s7211_s5 }
   0x7   :  { %p5862_p2 = pnand %p5860_p1, %p5857_p0 }
   0x9   :  { %5865 = shalt.err (!%p5862_p2)
}
   0xa   :  { %s5866_s28 = scalar_lea.vmem %s45_s18, 6144  ;;  %p5871_p4 = scmp.lt.s32.totalorder %s45_s18, %s45_s18 }
   0xb   :  { %p5867_p3 = scmp.ne.s32.totalorder %s45_s18, %s5866_s28  ;;  %p5872_p5 = scmp.lt.s32.totalorder %s5866_s28, %s5866_s28 }
   0xd   :  { %p5873_p6 = por %p5872_p5, %p5871_p4 }
   0xf   :  { %p5874_p7 = pnand %p5873_p6, %p5867_p3 }
  0x11   :  { %5877 = shalt.err (!%p5874_p7)
}
  0x12   :  { %s5952_s29 = smov 384   ;;  %s5953_s30 = smov 24  }
  0x13   :  { %50 = dma.hbm_to_vmem [thread:$0]  %s7211_s5, 6144, %s45_s18, [#allocation7], %s5952_s29, %s5952_s29, %s5953_s30  }
  0x14   :  { %s5878_s16 = scalar_lea.hbm %s7207_s1, 768 }
  0x15   :  { %p5879_p8 = scmp.ne.s32.totalorder %s7207_s1, %s5878_s16  ;;  %p5882_p9 = scmp.lt.u32.totalorder %s5878_s16, %s7207_s1 }
  0x17   :  { %p5884_p10 = pnand %p5882_p9, %p5879_p8 }
  0x19   :  { %5887 = shalt.err (!%p5884_p10)
}
  0x1a   :  { %s5888_s23 = scalar_lea.vmem %s6022_s20, 768  ;;  %p5893_p12 = scmp.lt.s32.totalorder %s6022_s20, %s6022_s20 }
  0x1b   :  { %p5889_p11 = scmp.ne.s32.totalorder %s6022_s20, %s5888_s23  ;;  %p5894_p13 = scmp.lt.s32.totalorder %s5888_s23, %s5888_s23 }
  0x1d   :  { %p5895_p0 = por %p5894_p13, %p5893_p12 }
  0x1f   :  { %p5896_p1 = pnand %p5895_p0, %p5889_p11 }
  0x21   :  { %5899 = shalt.err (!%p5896_p1)
}
  0x22   :  { %32 = dma.hbm_to_vmem [thread:$0]  %s7207_s1, 768, %s6022_s20, [#allocation5], %s5952_s29, %s5952_s29, %s5953_s30  }
  0x23   :  { %s5954_s24 = smov [#allocation8]   ;;  %s5955_s26 = smov [#allocation9]  }
  0x24   :  { %s58_s25 = sshll.u32 %s5954_s24, 4  ;;  %s72_s27 = sshll.u32 %s5955_s26, 4  ;;  %s59_s25 = int_to_ptr.vmem [resolvable:$true] %s58_s25  ;;  %s6059_s27 = int_to_ptr.vmem [resolvable:$true] %s72_s27 }
  0x25   :  { %s5900_s13 = scalar_lea.hbm %s7213_s7, 6144 }
  0x26   :  { %p5901_p2 = scmp.ne.s32.totalorder %s7213_s7, %s5900_s13  ;;  %p5904_p3 = scmp.lt.u32.totalorder %s5900_s13, %s7213_s7 }
  0x28   :  { %p5906_p4 = pnand %p5904_p3, %p5901_p2 }
  0x2a   :  { %5909 = shalt.err (!%p5906_p4)
}
  0x2b   :  { %s5910_s1 = scalar_lea.vmem %s59_s25, 6144  ;;  %p5915_p6 = scmp.lt.s32.totalorder %s59_s25, %s59_s25 }
  0x2c   :  { %p5911_p5 = scmp.ne.s32.totalorder %s59_s25, %s5910_s1  ;;  %p5916_p7 = scmp.lt.s32.totalorder %s5910_s1, %s5910_s1 }
  0x2e   :  { %p5917_p8 = por %p5916_p7, %p5915_p6 }
  0x30   :  { %p5918_p9 = pnand %p5917_p8, %p5911_p5 }
  0x32   :  { %5921 = shalt.err (!%p5918_p9)
}
  0x33   :  { %64 = dma.hbm_to_vmem [thread:$0]  %s7213_s7, 6144, %s59_s25, [#allocation7], %s5952_s29, %s5952_s29, %s5953_s30  }
  0x34   :  { %s5922_s23 = scalar_lea.hbm %s7215_s9, 2048 }
  0x35   :  { %p5923_p10 = scmp.ne.s32.totalorder %s7215_s9, %s5922_s23  ;;  %p5926_p11 = scmp.lt.u32.totalorder %s5922_s23, %s7215_s9 }
  0x37   :  { %p5928_p12 = pnand %p5926_p11, %p5923_p10 }
  0x39   :  { %5931 = shalt.err (!%p5928_p12)
}
  0x3a   :  { %s5932_s28 = scalar_lea.vmem %s6059_s27, 2048  ;;  %p5937_p0 = scmp.lt.s32.totalorder %s6059_s27, %s6059_s27 }
  0x3b   :  { %p5933_p13 = scmp.ne.s32.totalorder %s6059_s27, %s5932_s28  ;;  %p5938_p1 = scmp.lt.s32.totalorder %s5932_s28, %s5932_s28 }
  0x3d   :  { %p5939_p2 = por %p5938_p1, %p5937_p0 }
  0x3f   :  { %p5940_p3 = pnand %p5939_p2, %p5933_p13 }
  0x41   :  { %5943 = shalt.err (!%p5940_p3)
}
  0x42   :  { %s5956_s7 = smov 128   ;;  %s5957_s29 = smov 8  }
  0x43   :  { %78 = dma.hbm_to_vmem [thread:$0]  %s7215_s9, 2048, %s6059_s27, [#allocation10], %s5956_s7, %s5956_s7, %s5957_s29  }
  0x44   :  { %5944 = dma.done.wait [#allocation5], 768  }
  0x45   :  { %5945 = vsyncadd [#allocation5], 4294966528 }
  0x46   :  { %5946 = dma.done.wait [#allocation7], 12288  }
  0x47   :  { %5947 = vsyncadd [#allocation7], 4294955008 }
  0x48   :  { %5948 = dma.done.wait [#allocation10], 2048  }
  0x49   :  { %5949 = vsyncadd [#allocation10], 4294965248  ;;  %v5958_v0 = vmov 0.0   ;;  %vm198_vm0 = vcmask 1043456   ;;  %vm5959_vm1 = vmmov 1   ;;  %v102_v2 = vld [vmem:[#allocation4 + $0x8] sm:$0xff] }
  0x4a   :  { %272 = vmatprep.mubr.f32.mxu0 %v5958_v0  ;;  %vm6094_vm2 = vmpackc.low %vm198_vm0, %vm5959_vm1  ;;  %v105_v3 = vld [vmem:[#allocation4 + $0x20] sm:$0xf]  ;;  %v104_v6 = vld [vmem:[#allocation4 + $0x18] sm:$0xf]  ;;  %vm173_vm3 = vcmask 97280   ;;  %v5960_v49 = vmov 0.0|0.0  }
  0x4b   :  { %v101_v4 = vld [vmem:[#allocation4] sm:$0xff]  ;;  %v4623_v5 = vpack.c.bf16 %v105_v3, %v102_v2  ;;  %v109_v8 = vld [vmem:[%s7209_s3 + $0x8] sm:$0xff]  ;;  %v111_v12 = vld [vmem:[%s7209_s3 + $0x18] sm:$0xff]  ;;  %vm5961_vm4 = vmmov 0  }
  0x4c   :  { %v93_v7 = vld [vmem:[%s7206_s0] sm:$0xff]  ;;  %v4626_v9 = vpack.c.bf16 %v104_v6, %v101_v4  ;;  %v115_v14 = vld [vmem:[%s7209_s3 + $0x38] sm:$0xff]  ;;  %v118_v15 = vld [vmem:[%s7209_s3 + $0x50] sm:$0xff] }
  0x4d   :  { %v112_v10 = vld [vmem:[%s7209_s3 + $0x20] sm:$0xff]  ;;  %3972 = vmatprep.mubr.msk.f32.mxu1 %vm173_vm3, %v93_v7  ;;  %4625 = vmatprep.subr.msk.bf16.mxu0 %vm6094_vm2, %v4623_v5  ;;  %v6129_v17 = vpack.c.bf16 %v118_v15, %v115_v14  ;;  %v114_v18 = vld [vmem:[%s7209_s3 + $0x30] sm:$0xff]  ;;  %v117_v19 = vld [vmem:[%s7209_s3 + $0x48] sm:$0xff] }
  0x4e   :  { %v108_v11 = vld [vmem:[%s7209_s3] sm:$0xff]  ;;  %v6116_v13 = vpack.c.bf16 %v112_v10, %v109_v8  ;;  %4628 = vmatpush1.bf16.msk.msra.mxu0 %vm6094_vm2, %v4626_v9  ;;  %v121_v20 = vld [vmem:[%s7209_s3 + $0x68] sm:$0xff]  ;;  %v6149_v23 = vpack.c.bf16 %v117_v19, %v114_v18  ;;  %v123_v26 = vld [vmem:[%s7209_s3 + $0x78] sm:$0xff] }
  0x4f   :  { %v6126_v16 = vpack.c.bf16 %v111_v12, %v108_v11  ;;  %v124_v21 = vld [vmem:[%s7209_s3 + $0x80] sm:$0xff]  ;;  %v94_v22 = vld [vmem:[%s7206_s0 + $0x8] sm:$0xff]  ;;  %v127_v27 = vld [vmem:[%s7209_s3 + $0x98] sm:$0xff] }
  0x50   :  { %4636 = vmatprep.subr.bf16.mxu0 %v6116_v13  ;;  %v6152_v24 = vpack.c.bf16 %v124_v21, %v121_v20  ;;  %v120_v25 = vld [vmem:[%s7209_s3 + $0x60] sm:$0xff]  ;;  %v130_v28 = vld [vmem:[%s7209_s3 + $0xb0] sm:$0xff]  ;;  %v106_v30 = vld [vmem:[#allocation4 + $0x28] sm:$0xf] }
  0x51   :  { %3593 = vmatmul.mubr.msk.f32.vlgmr.msra.gmra.mrb[0].mxu0 %vm173_vm3, %v93_v7  ;;  %v103_v29 = vld [vmem:[#allocation4 + $0x10] sm:$0xff]  ;;  %v6172_v32 = vpack.c.bf16 %v123_v26, %v120_v25  ;;  %v6175_v34 = vpack.c.bf16 %v130_v28, %v127_v27  ;;  %v129_v36 = vld [vmem:[%s7209_s3 + $0xa8] sm:$0xff]  ;;  %v136_v39 = vld [vmem:[%s7209_s3 + $0xe0] sm:$0xff] }
  0x52   :  { %4638 = vmatpush1.bf16.msra.mxu0 %v6126_v16  ;;  %278 = vmatprep.mubr.f32.mxu0 %v5958_v0  ;;  %v95_v31 = vld [vmem:[%s7206_s0 + $0x10] sm:$0xff]  ;;  %v4629_v33 = vpack.c.bf16 %v106_v30, %v103_v29  ;;  %v133_v38 = vld [vmem:[%s7209_s3 + $0xc8] sm:$0xff]  ;;  %v96_v42 = vld [vmem:[%s7206_s0 + $0x18] sm:$0xff] }
  0x53   :  { %4640 = vmatprep.subr.bf16.mxu0 %v6129_v17  ;;  %v126_v35 = vld [vmem:[%s7209_s3 + $0x90] sm:$0xff]  ;;  %v113_v40 = vld [vmem:[%s7209_s3 + $0x28] sm:$0xff]  ;;  %v116_v44 = vld [vmem:[%s7209_s3 + $0x40] sm:$0xff]  ;;  %v6216_v46 = vpack.c.bf16 %v136_v39, %v133_v38 }
  0x54   :  { %v110_v37 = vld [vmem:[%s7209_s3 + $0x10] sm:$0xff]  ;;  %4631 = vmatprep.subr.msk.bf16.mxu1 %vm6094_vm2, %v4629_v33  ;;  %v6207_v43 = vpack.c.bf16 %v129_v36, %v126_v35  ;;  %v119_v45 = vld [vmem:[%s7209_s3 + $0x58] sm:$0xff]  ;;  %v132_v47 = vld [vmem:[%s7209_s3 + $0xc0] sm:$0xff]  ;;  %v158_v36 = vlaneseq }
  0x55   :  { %3594 = vmatmul.mubr.msk.f32.gmra.mrb[2].mxu0 %vm173_vm3, %v94_v22  ;;  %4634 = vmatpush3.bf16.msk.msra.mxu1 %vm6094_vm2, %v4629_v33  ;;  %v6200_v41 = vpack.c.bf16 %v113_v40, %v110_v37  ;;  %v135_v48 = vld [vmem:[%s7209_s3 + $0xd8] sm:$0xff]  ;;  %v142_v51 = vld [vmem:[%s7209_s3 + $0x110] sm:$0xff]  ;;  %v6234_v52 = vpack.c.bf16 %v119_v45, %v116_v44  ;;  %v97_v53 = vld [vmem:[%s7206_s0 + $0x20] sm:$0xff] }
  0x56   :  { %4642 = vmatpush1.bf16.msra.mxu0 %v6149_v23  ;;  %284 = vmatprep.mubr.f32.mxu0 %v5958_v0  ;;  %v139_v50 = vld [vmem:[%s7209_s3 + $0xf8] sm:$0xff]  ;;  %v6241_v54 = vpack.c.bf16 %v135_v48, %v132_v47  ;;  %v122_v55 = vld [vmem:[%s7209_s3 + $0x70] sm:$0xff]  ;;  %v125_v56 = vld [vmem:[%s7209_s3 + $0x88] sm:$0xff]  ;;  %v6419_v37 = vshrl.u32 %v158_v36, 7 }
  0x57   :  { %4644 = vmatprep.subr.bf16.mxu0 %v6152_v24  ;;  %4667 = vmatprep.subr.bf16.mxu1 %v5960_v49  ;;  %v6250_v57 = vpack.c.bf16 %v142_v51, %v139_v50  ;;  %v138_v58 = vld [vmem:[%s7209_s3 + $0xf0] sm:$0xff]  ;;  %v141_v59 = vld [vmem:[%s7209_s3 + $0x108] sm:$0xff]  ;;  %v148_v61 = vld [vmem:[%s7209_s3 + $0x140] sm:$0xff]  ;;  %v6268_v62 = vpack.c.bf16 %v125_v56, %v122_v55 }
  0x58   :  { %3973 = vmatmul.mubr.msk.f32.vlgmr.msra.gmra.mrb[0].mxu1 %vm173_vm3, %v94_v22  ;;  %v145_v60 = vld [vmem:[%s7209_s3 + $0x128] sm:$0xff]  ;;  %v6275_v1 = vpack.c.bf16 %v141_v59, %v138_v58  ;;  %v128_v2 = vld [vmem:[%s7209_s3 + $0xa0] sm:$0xff]  ;;  %v131_v3 = vld [vmem:[%s7209_s3 + $0xb8] sm:$0xff]  ;;  %v168_v38 = vsub.s32 2, %v6419_v37  ;;  %v164_v56 = vsub.s32 1, %v6419_v37 }
  0x59   :  { %3595 = vmatmul.mubr.msk.f32.gmra.mrb[4].mxu0 %vm173_vm3, %v95_v31  ;;  %4669 = vmatpush3.bf16.msra.mxu1 %v6200_v41  ;;  %v98_v63 = vld [vmem:[%s7206_s0 + $0x28] sm:$0xff]  ;;  %v6284_v4 = vpack.c.bf16 %v148_v61, %v145_v60  ;;  %v144_v5 = vld [vmem:[%s7209_s3 + $0x120] sm:$0xff]  ;;  %v147_v6 = vld [vmem:[%s7209_s3 + $0x138] sm:$0xff]  ;;  %v6302_v9 = vpack.c.bf16 %v131_v3, %v128_v2 }
  0x5a   :  { %4646 = vmatpush1.bf16.msra.mxu0 %v6172_v32  ;;  %290 = vmatprep.mubr.f32.mxu0 %v5958_v0  ;;  %v151_v7 = vld [vmem:[%s7209_s3 + $0x158] sm:$0xff]  ;;  %v154_v8 = vld [vmem:[%s7209_s3 + $0x170] sm:$0xff]  ;;  %v6309_v11 = vpack.c.bf16 %v147_v6, %v144_v5  ;;  %v137_v14 = vld [vmem:[%s7209_s3 + $0xe8] sm:$0xff] }
  0x5b   :  { %4648 = vmatprep.subr.bf16.mxu0 %v6175_v34  ;;  %4670 = vmatprep.subr.bf16.mxu1 %v5960_v49  ;;  %v99_v10 = vld [vmem:[%s7206_s0 + $0x30] sm:$0xff]  ;;  %v6318_v15 = vpack.c.bf16 %v154_v8, %v151_v7  ;;  %v153_v19 = vld [vmem:[%s7209_s3 + $0x168] sm:$0xff]  ;;  %v100_v21 = vld [vmem:[%s7206_s0 + $0x38] sm:$0xff] }
  0x5c   :  { %3975 = vmatprep.mubr.msk.f32.mxu1 %vm173_vm3, %v95_v31  ;;  %v134_v12 = vld [vmem:[%s7209_s3 + $0xd0] sm:$0xff]  ;;  %v140_v25 = vld [vmem:[%s7209_s3 + $0x100] sm:$0xff]  ;;  %v143_v26 = vld [vmem:[%s7209_s3 + $0x118] sm:$0xff] }
  0x5d   :  { %3596 = vmatmul.mubr.msk.f32.gmra.mrb[6].mxu0 %vm173_vm3, %v96_v42  ;;  %4672 = vmatpush3.bf16.msra.mxu1 %v6234_v52  ;;  %v150_v18 = vld [vmem:[%s7209_s3 + $0x150] sm:$0xff]  ;;  %v6330_v20 = vpack.c.bf16 %v137_v14, %v134_v12  ;;  %v6350_v27 = vpack.c.bf16 %v143_v26, %v140_v25  ;;  %v149_v29 = vld [vmem:[%s7209_s3 + $0x148] sm:$0xff]  ;;  %v152_v31 = vld [vmem:[%s7209_s3 + $0x160] sm:$0xff] }
  0x5e   :  { %4650 = vmatpush1.bf16.msra.mxu0 %v6207_v43  ;;  %296 = vmatprep.mubr.f32.mxu0 %v5958_v0  ;;  %v6337_v22 = vpack.c.bf16 %v153_v19, %v150_v18  ;;  %v146_v28 = vld [vmem:[%s7209_s3 + $0x130] sm:$0xff]  ;;  %v155_v33 = vld [vmem:[%s7209_s3 + $0x178] sm:$0xff]  ;;  %v107_v39 = vld [vmem:[%s7208_s2] sm:$0x7] }
  0x5f   :  { %4652 = vmatprep.subr.bf16.mxu0 %v6216_v46  ;;  %4673 = vmatprep.subr.bf16.mxu1 %v5960_v49  ;;  %v6366_v30 = vpack.c.bf16 %v149_v29, %v146_v28  ;;  %v6381_v35 = vpack.c.bf16 %v155_v33, %v152_v31  ;;  %v169_v40 = vrot.slane %v107_v39, %v168_v38  ;;  %v6456_v29 = vld [vmem:[%s7210_s4] ss:$0 sm:$0xff] }
  0x60   :  { %3976 = vmatmul.mubr.msk.f32.gmra.mrb[2].mxu1 %vm173_vm3, %v96_v42  ;;  %v6445_v3 = vrot.slane %v107_v39, %v164_v56 }
  0x61   :  { %3597 = vmatmul.mubr.msk.f32.gmra.mrb[8].mxu0 %vm173_vm3, %v97_v53  ;;  %4675 = vmatpush3.bf16.msra.mxu1 %v6268_v62 }
  0x62   :  { %4654 = vmatpush1.bf16.msra.mxu0 %v6241_v54  ;;  %302 = vmatprep.mubr.f32.mxu0 %v5958_v0 }
  0x63   :  { %4656 = vmatprep.subr.bf16.mxu0 %v6250_v57  ;;  %4676 = vmatprep.subr.bf16.mxu1 %v5960_v49 }
  0x64   :  { %3978 = vmatprep.mubr.msk.f32.mxu1 %vm173_vm3, %v97_v53  ;;  %v160_v53 = vsub.s32 0, %v6419_v37 }
  0x65   :  { %3598 = vmatmul.mubr.msk.f32.gmra.mrb[10].mxu0 %vm173_vm3, %v98_v63  ;;  %4678 = vmatpush3.bf16.msra.mxu1 %v6302_v9 }
  0x66   :  { %4658 = vmatpush1.bf16.msra.mxu0 %v6275_v1  ;;  %308 = vmatprep.mubr.f32.mxu0 %v5958_v0  ;;  %v6439_v60 = vrot.slane %v107_v39, %v160_v53 }
  0x67   :  { %4660 = vmatprep.subr.bf16.mxu0 %v6284_v4  ;;  %4679 = vmatprep.subr.bf16.mxu1 %v5960_v49 }
  0x68   :  { %3979 = vmatmul.mubr.msk.f32.gmra.mrb[4].mxu1 %vm173_vm3, %v98_v63 }
  0x69   :  { %3599 = vmatmul.mubr.msk.f32.gmra.mrb[12].mxu0 %vm173_vm3, %v99_v10  ;;  %4681 = vmatpush3.bf16.msra.mxu1 %v6330_v20 }
  0x6a   :  { %4662 = vmatpush1.bf16.msra.mxu0 %v6309_v11  ;;  %314 = vmatprep.mubr.f32.mxu0 %v5958_v0 }
  0x6b   :  { %4664 = vmatprep.subr.bf16.mxu0 %v6318_v15  ;;  %4682 = vmatprep.subr.bf16.mxu1 %v5960_v49 }
  0x6c   :  { %3981 = vmatprep.mubr.msk.f32.mxu1 %vm173_vm3, %v99_v10 }
  0x6d   :  { %3600 = vmatmul.mubr.msk.f32.gmra.mrb[14].mxu0 %vm173_vm3, %v100_v21  ;;  %3982 = vmatmul.mubr.msk.f32.gmra.mrb[6].mxu1 %vm173_vm3, %v100_v21 }
  0x6e   :  { %4666 = vmatpush1.bf16.msra.mxu0 %v6337_v22  ;;  %520 = vmatprep.mubr.f32.mxu0 %v5958_v0 }
  0x6f   :  { %4692 = vmatprep.subr.bf16.mxu0 %v6116_v13  ;;  %4684 = vmatpush3.bf16.msra.mxu1 %v6350_v27 }
  0x70   :  { %4685 = vmatprep.subr.bf16.mxu1 %v5960_v49  ;;  %4016 = vmatprep.mubr.msk.f32.mxu1 %vm5961_vm4, %v5958_v0 }
  0x71   :  { %521 = vmatmul.mubr.f32.vlgmr.msra.gmra.mrb[0].mxu0 %v5958_v0 }
  0x72   :  { %4694 = vmatpush1.bf16.msra.mxu0 %v6126_v16  ;;  %687 = vmatprep.mubr.f32.mxu0 %v5958_v0 }
  0x73   :  { %4696 = vmatprep.subr.bf16.mxu0 %v6129_v17  ;;  %4687 = vmatpush3.bf16.msra.mxu1 %v6366_v30 }
  0x74   :  { %4688 = vmatprep.subr.bf16.mxu1 %v5960_v49 }
  0x76   :  { %4698 = vmatpush1.bf16.msra.mxu0 %v6149_v23 }
  0x77   :  { %4700 = vmatprep.subr.bf16.mxu0 %v6152_v24  ;;  %4690 = vmatpush3.bf16.msra.mxu1 %v6381_v35 }
  0x78   :  { %4723 = vmatprep.subr.bf16.mxu1 %v5960_v49 }
  0x7a   :  { %4702 = vmatpush1.bf16.msra.mxu0 %v6172_v32  ;;  %4017 = vmatmul.mubr.f32.vlgmr.msra.gmra.mrb[8].mxu1 %v5958_v0 }
  0x7b   :  { %4704 = vmatprep.subr.bf16.mxu0 %v6175_v34  ;;  %4725 = vmatpush3.bf16.msra.mxu1 %v6200_v41 }
  0x7c   :  { %4051 = vmatprep.mubr.msk.f32.mxu1 %vm5961_vm4, %v5958_v0  ;;  %4726 = vmatprep.subr.bf16.mxu1 %v5960_v49 }
  0x7e   :  { %4706 = vmatpush1.bf16.msra.mxu0 %v6207_v43 }
  0x7f   :  { %4708 = vmatprep.subr.bf16.mxu0 %v6216_v46  ;;  %4728 = vmatpush3.bf16.msra.mxu1 %v6234_v52 }
  0x80   :  { %4729 = vmatprep.subr.bf16.mxu1 %v5960_v49 }
  0x82   :  { %4710 = vmatpush1.bf16.msra.mxu0 %v6241_v54 }
  0x83   :  { %4712 = vmatprep.subr.bf16.mxu0 %v6250_v57  ;;  %4731 = vmatpush3.bf16.msra.mxu1 %v6268_v62 }
  0x84   :  { %4732 = vmatprep.subr.bf16.mxu1 %v5960_v49 }
  0x86   :  { %4714 = vmatpush1.bf16.msra.mxu0 %v6275_v1 }
  0x87   :  { %4716 = vmatprep.subr.bf16.mxu0 %v6284_v4  ;;  %4734 = vmatpush3.bf16.msra.mxu1 %v6302_v9 }
  0x88   :  { %4735 = vmatprep.subr.bf16.mxu1 %v5960_v49 }
  0x8a   :  { %4718 = vmatpush1.bf16.msra.mxu0 %v6309_v11 }
  0x8b   :  { %4720 = vmatprep.subr.bf16.mxu0 %v6318_v15  ;;  %4737 = vmatpush3.bf16.msra.mxu1 %v6330_v20 }
  0x8c   :  { %4738 = vmatprep.subr.bf16.mxu1 %v5960_v49 }
  0x8e   :  { %4722 = vmatpush1.bf16.msra.mxu0 %v6337_v22 }
  0x8f   :  { %4748 = vmatprep.subr.bf16.mxu0 %v6116_v13  ;;  %4740 = vmatpush3.bf16.msra.mxu1 %v6350_v27 }
  0x90   :  { %4741 = vmatprep.subr.bf16.mxu1 %v5960_v49 }
  0x93   :  { %4743 = vmatpush3.bf16.msra.mxu1 %v6366_v30 }
  0x94   :  { %4744 = vmatprep.subr.bf16.mxu1 %v5960_v49 }
  0x97   :  { %4746 = vmatpush3.bf16.msra.mxu1 %v6381_v35 }
  0x98   :  { %4779 = vmatprep.subr.bf16.mxu1 %v5960_v49 }
 0x12b   :  { %v3974_v42 = vpop.f32.mrb[0].mxu1 }
 0x12c   :  { %v6427_v44 = vadd.f32 %v3974_v42, %v169_v40  ;;  %v387_v45 = vpop.f32.mrb[1].mxu1 }
 0x12d   :  { %v388_v39 = vadd.f32 %v387_v45, %v169_v40 }
 0x133   :  { %v3977_v47 = vpop.f32.mrb[2].mxu1 }
 0x134   :  { %v6429_v48 = vadd.f32 %v3977_v47, %v169_v40  ;;  %v397_v50 = vpop.f32.mrb[3].mxu1 }
 0x135   :  { %v6431_v51 = vadd.f32 %v397_v50, %v169_v40 }
 0x13b   :  { %v3980_v55 = vpop.f32.mrb[4].mxu1 }
 0x13c   :  { %v6435_v58 = vadd.f32 %v3980_v55, %v169_v40  ;;  %v407_v59 = vpop.f32.mrb[5].mxu1 }
 0x13d   :  { %v6441_v61 = vadd.f32 %v407_v59, %v169_v40 }
 0x140   :  { %v3983_v63 = vpop.f32.mrb[6].mxu1 }
 0x141   :  { %v6447_v5 = vadd.f32 %v3983_v63, %v169_v40  ;;  %v417_v6 = vpop.f32.mrb[7].mxu1 }
 0x142   :  { %v6450_v10 = vadd.f32 %v417_v6, %v169_v40 }
 0x144   :  { %v522_v2 = vpop.f32.mrb[0].mxu0 }
 0x145   :  { %v5619_v7 = vadd.f32 %v522_v2, %v6439_v60  ;;  %v524_v8 = vpop.f32.mrb[1].mxu0 }
 0x146   :  { %v5620_v14 = vadd.f32 %v524_v8, %v6445_v3 }
 0x147   :  { %v3611_v12 = vmul.f32 -1.442695, %v5619_v7 }
 0x148   :  { %v3612_v18 = vmul.f32 -1.442695, %v5620_v14 }
 0x149   :  { %5695 = vpow2.f32 %v3611_v12 }
 0x14a   :  { %5697 = vpow2.f32 %v3612_v18 }
 0x14d   :  { %v593_v19 = vpop.f32.mrb[8].mxu1 }
 0x14e   :  { %v4018_v21 = vpop.f32.mrb[9].mxu1  ;;  %v614_v33 = vadd.f32 %v6456_v29, %v593_v19 }
 0x153   :  { %v5696_v25 = vpop.eup %5695 }
 0x154   :  { %v604_v26 = vadd.f32 1.0, %v5696_v25  ;;  %v5698_v28 = vpop.eup %5697 }
 0x155   :  { %v611_v31 = vadd.f32 1.0, %v5698_v28 }
 0x156   :  { %5699 = vrcp.f32 %v604_v26 }
 0x157   :  { %5701 = vrcp.f32 %v611_v31 }
 0x160   :  { %v5700_v36 = vpop.eup %5699 }
 0x161   :  { %v615_v42 = vmul.f32 %v5700_v36, %v614_v33  ;;  %v5702_v50 = vpop.eup %5701 }
 0x162   :  { %v618_v55 = vsub.f32 1.0, %v5702_v50  ;;  %v620_v2 = vmul.f32 0.0, %v5702_v50 }
 0x163   :  { %v616_v47 = vadd.f32 %v615_v42, %v388_v39 }
 0x165   :  { %5703 = vtanh.f32 %v616_v47 }
 0x16f   :  { %v5704_v59 = vpop.eup %5703 }
 0x170   :  { %v619_v63 = vmul.f32 %v5704_v59, %v618_v55 }
 0x172   :  { %v6459_v6 = vadd.f32 %v620_v2, %v619_v63 }
 0x174   :  { %688 = vmatmul.mubr.f32.vlgmr.msra.gmra.mrb[2].mxu0 %v6459_v6  ;;  %4052 = vmatmul.mubr.f32.vlgmr.msra.gmra.mrb[10].mxu1 %v6459_v6 }
 0x175   :  { %4750 = vmatpush1.bf16.msra.mxu0 %v6126_v16  ;;  %4781 = vmatpush3.bf16.msra.mxu1 %v6200_v41 }
 0x176   :  { %4752 = vmatprep.subr.bf16.mxu0 %v6129_v17  ;;  %4782 = vmatprep.subr.bf16.mxu1 %v5960_v49 }
 0x177   :  { %854 = vmatprep.mubr.f32.mxu0 %v5958_v0  ;;  %4086 = vmatprep.mubr.msk.f32.mxu1 %vm5961_vm4, %v5958_v0 }
 0x179   :  { %4754 = vmatpush1.bf16.msra.mxu0 %v6149_v23  ;;  %4784 = vmatpush3.bf16.msra.mxu1 %v6234_v52 }
 0x17a   :  { %4756 = vmatprep.subr.bf16.mxu0 %v6152_v24  ;;  %4785 = vmatprep.subr.bf16.mxu1 %v5960_v49 }
 0x17d   :  { %4758 = vmatpush1.bf16.msra.mxu0 %v6172_v32  ;;  %4787 = vmatpush3.bf16.msra.mxu1 %v6268_v62 }
 0x17e   :  { %4760 = vmatprep.subr.bf16.mxu0 %v6175_v34  ;;  %4788 = vmatprep.subr.bf16.mxu1 %v5960_v49 }
 0x181   :  { %4762 = vmatpush1.bf16.msra.mxu0 %v6207_v43  ;;  %4790 = vmatpush3.bf16.msra.mxu1 %v6302_v9 }
 0x182   :  { %4764 = vmatprep.subr.bf16.mxu0 %v6216_v46  ;;  %4791 = vmatprep.subr.bf16.mxu1 %v5960_v49 }
 0x185   :  { %4766 = vmatpush1.bf16.msra.mxu0 %v6241_v54  ;;  %4793 = vmatpush3.bf16.msra.mxu1 %v6330_v20 }
 0x186   :  { %4768 = vmatprep.subr.bf16.mxu0 %v6250_v57  ;;  %4794 = vmatprep.subr.bf16.mxu1 %v5960_v49 }
 0x189   :  { %4770 = vmatpush1.bf16.msra.mxu0 %v6275_v1  ;;  %4796 = vmatpush3.bf16.msra.mxu1 %v6350_v27 }
 0x18a   :  { %4772 = vmatprep.subr.bf16.mxu0 %v6284_v4  ;;  %4797 = vmatprep.subr.bf16.mxu1 %v5960_v49 }
 0x18d   :  { %4774 = vmatpush1.bf16.msra.mxu0 %v6309_v11  ;;  %4799 = vmatpush3.bf16.msra.mxu1 %v6366_v30 }
 0x18e   :  { %4776 = vmatprep.subr.bf16.mxu0 %v6318_v15  ;;  %4800 = vmatprep.subr.bf16.mxu1 %v5960_v49 }
 0x191   :  { %4778 = vmatpush1.bf16.msra.mxu0 %v6337_v22  ;;  %4802 = vmatpush3.bf16.msra.mxu1 %v6381_v35 }
 0x192   :  { %4804 = vmatprep.subr.bf16.mxu0 %v6116_v13  ;;  %4835 = vmatprep.subr.bf16.mxu1 %v5960_v49 }
 0x247   :  { %v689_v40 = vpop.f32.mrb[2].mxu0  ;;  %v760_v45 = vpop.f32.mrb[10].mxu1 }
 0x248   :  { %v5621_v7 = vadd.f32 %v689_v40, %v6439_v60  ;;  %v691_v8 = vpop.f32.mrb[3].mxu0  ;;  %v4053_v12 = vpop.f32.mrb[11].mxu1  ;;  %v781_v31 = vadd.f32 %v6456_v29, %v760_v45 }
 0x249   :  { %v5622_v18 = vadd.f32 %v691_v8, %v6445_v3 }
 0x24a   :  { %v3613_v14 = vmul.f32 -1.442695, %v5621_v7 }
 0x24b   :  { %v3614_v19 = vmul.f32 -1.442695, %v5622_v18 }
 0x24c   :  { %5705 = vpow2.f32 %v3613_v14 }
 0x24d   :  { %5707 = vpow2.f32 %v3614_v19 }
 0x256   :  { %v5706_v21 = vpop.eup %5705 }
 0x257   :  { %v771_v25 = vadd.f32 1.0, %v5706_v21  ;;  %v5708_v26 = vpop.eup %5707 }
 0x258   :  { %v778_v28 = vadd.f32 1.0, %v5708_v26 }
 0x259   :  { %5709 = vrcp.f32 %v771_v25 }
 0x25a   :  { %5711 = vrcp.f32 %v778_v28 }
 0x263   :  { %v5710_v33 = vpop.eup %5709 }
 0x264   :  { %v782_v36 = vmul.f32 %v5710_v33, %v781_v31  ;;  %v5712_v42 = vpop.eup %5711 }
 0x265   :  { %v785_v47 = vsub.f32 1.0, %v5712_v42  ;;  %v787_v59 = vmul.f32 %v5712_v42, %v6459_v6 }
 0x266   :  { %v783_v39 = vadd.f32 %v782_v36, %v6427_v44 }
 0x268   :  { %5713 = vtanh.f32 %v783_v39 }
 0x272   :  { %v5714_v50 = vpop.eup %5713 }
 0x273   :  { %v786_v55 = vmul.f32 %v5714_v50, %v785_v47 }
 0x275   :  { %v6503_v63 = vadd.f32 %v787_v59, %v786_v55 }
 0x277   :  { %855 = vmatmul.mubr.f32.vlgmr.msra.gmra.mrb[4].mxu0 %v6503_v63  ;;  %4087 = vmatmul.mubr.f32.vlgmr.msra.gmra.mrb[12].mxu1 %v6503_v63 }
 0x278   :  { %4806 = vmatpush1.bf16.msra.mxu0 %v6126_v16  ;;  %4837 = vmatpush3.bf16.msra.mxu1 %v6200_v41 }
 0x279   :  { %4808 = vmatprep.subr.bf16.mxu0 %v6129_v17  ;;  %4838 = vmatprep.subr.bf16.mxu1 %v5960_v49 }
 0x27a   :  { %1021 = vmatprep.mubr.f32.mxu0 %v5958_v0  ;;  %4121 = vmatprep.mubr.msk.f32.mxu1 %vm5961_vm4, %v5958_v0 }
 0x27c   :  { %4810 = vmatpush1.bf16.msra.mxu0 %v6149_v23  ;;  %4840 = vmatpush3.bf16.msra.mxu1 %v6234_v52 }
 0x27d   :  { %4812 = vmatprep.subr.bf16.mxu0 %v6152_v24  ;;  %4841 = vmatprep.subr.bf16.mxu1 %v5960_v49 }
 0x280   :  { %4814 = vmatpush1.bf16.msra.mxu0 %v6172_v32  ;;  %4843 = vmatpush3.bf16.msra.mxu1 %v6268_v62 }
 0x281   :  { %4816 = vmatprep.subr.bf16.mxu0 %v6175_v34  ;;  %4844 = vmatprep.subr.bf16.mxu1 %v5960_v49 }
 0x284   :  { %4818 = vmatpush1.bf16.msra.mxu0 %v6207_v43  ;;  %4846 = vmatpush3.bf16.msra.mxu1 %v6302_v9 }
 0x285   :  { %4820 = vmatprep.subr.bf16.mxu0 %v6216_v46  ;;  %4847 = vmatprep.subr.bf16.mxu1 %v5960_v49 }
 0x288   :  { %4822 = vmatpush1.bf16.msra.mxu0 %v6241_v54  ;;  %4849 = vmatpush3.bf16.msra.mxu1 %v6330_v20 }
 0x289   :  { %4824 = vmatprep.subr.bf16.mxu0 %v6250_v57  ;;  %4850 = vmatprep.subr.bf16.mxu1 %v5960_v49 }
 0x28c   :  { %4826 = vmatpush1.bf16.msra.mxu0 %v6275_v1  ;;  %4852 = vmatpush3.bf16.msra.mxu1 %v6350_v27 }
 0x28d   :  { %4828 = vmatprep.subr.bf16.mxu0 %v6284_v4  ;;  %4853 = vmatprep.subr.bf16.mxu1 %v5960_v49 }
 0x290   :  { %4830 = vmatpush1.bf16.msra.mxu0 %v6309_v11  ;;  %4855 = vmatpush3.bf16.msra.mxu1 %v6366_v30 }
 0x291   :  { %4832 = vmatprep.subr.bf16.mxu0 %v6318_v15  ;;  %4856 = vmatprep.subr.bf16.mxu1 %v5960_v49 }
 0x294   :  { %4834 = vmatpush1.bf16.msra.mxu0 %v6337_v22  ;;  %4858 = vmatpush3.bf16.msra.mxu1 %v6381_v35 }
 0x295   :  { %4860 = vmatprep.subr.bf16.mxu0 %v6116_v13  ;;  %4891 = vmatprep.subr.bf16.mxu1 %v5960_v49 }
 0x34a   :  { %v856_v44 = vpop.f32.mrb[4].mxu0  ;;  %v927_v2 = vpop.f32.mrb[12].mxu1 }
 0x34b   :  { %v5623_v40 = vadd.f32 %v856_v44, %v6439_v60  ;;  %v858_v45 = vpop.f32.mrb[5].mxu0  ;;  %v4088_v7 = vpop.f32.mrb[13].mxu1  ;;  %v948_v26 = vadd.f32 %v6456_v29, %v927_v2 }
 0x34c   :  { %v5624_v12 = vadd.f32 %v858_v45, %v6445_v3 }
 0x34d   :  { %v3615_v8 = vmul.f32 -1.442695, %v5623_v40 }
 0x34e   :  { %v3616_v14 = vmul.f32 -1.442695, %v5624_v12 }
 0x34f   :  { %5715 = vpow2.f32 %v3615_v8 }
 0x350   :  { %5717 = vpow2.f32 %v3616_v14 }
 0x359   :  { %v5716_v18 = vpop.eup %5715 }
 0x35a   :  { %v938_v19 = vadd.f32 1.0, %v5716_v18  ;;  %v5718_v21 = vpop.eup %5717 }
 0x35b   :  { %v945_v25 = vadd.f32 1.0, %v5718_v21 }
 0x35c   :  { %5719 = vrcp.f32 %v938_v19 }
 0x35d   :  { %5721 = vrcp.f32 %v945_v25 }
 0x366   :  { %v5720_v28 = vpop.eup %5719 }
 0x367   :  { %v949_v31 = vmul.f32 %v5720_v28, %v948_v26  ;;  %v5722_v36 = vpop.eup %5721 }
 0x368   :  { %v952_v39 = vsub.f32 1.0, %v5722_v36  ;;  %v954_v50 = vmul.f32 %v5722_v36, %v6503_v63 }
 0x369   :  { %v950_v33 = vadd.f32 %v949_v31, %v6431_v51 }
 0x36b   :  { %5723 = vtanh.f32 %v950_v33 }
 0x375   :  { %v5724_v42 = vpop.eup %5723 }
 0x376   :  { %v953_v47 = vmul.f32 %v5724_v42, %v952_v39 }
 0x378   :  { %v6547_v55 = vadd.f32 %v954_v50, %v953_v47 }
 0x37a   :  { %1022 = vmatmul.mubr.f32.vlgmr.msra.gmra.mrb[6].mxu0 %v6547_v55  ;;  %4122 = vmatmul.mubr.f32.vlgmr.msra.gmra.mrb[14].mxu1 %v6547_v55 }
 0x37b   :  { %4862 = vmatpush1.bf16.msra.mxu0 %v6126_v16  ;;  %4893 = vmatpush3.bf16.msra.mxu1 %v6200_v41 }
 0x37c   :  { %4864 = vmatprep.subr.bf16.mxu0 %v6129_v17  ;;  %4894 = vmatprep.subr.bf16.mxu1 %v5960_v49 }
 0x37d   :  { %1188 = vmatprep.mubr.f32.mxu0 %v5958_v0  ;;  %4156 = vmatprep.mubr.msk.f32.mxu1 %vm5961_vm4, %v5958_v0 }
 0x37f   :  { %4866 = vmatpush1.bf16.msra.mxu0 %v6149_v23  ;;  %4896 = vmatpush3.bf16.msra.mxu1 %v6234_v52 }
 0x380   :  { %4868 = vmatprep.subr.bf16.mxu0 %v6152_v24  ;;  %4897 = vmatprep.subr.bf16.mxu1 %v5960_v49 }
 0x383   :  { %4870 = vmatpush1.bf16.msra.mxu0 %v6172_v32  ;;  %4899 = vmatpush3.bf16.msra.mxu1 %v6268_v62 }
 0x384   :  { %4872 = vmatprep.subr.bf16.mxu0 %v6175_v34  ;;  %4900 = vmatprep.subr.bf16.mxu1 %v5960_v49 }
 0x387   :  { %4874 = vmatpush1.bf16.msra.mxu0 %v6207_v43  ;;  %4902 = vmatpush3.bf16.msra.mxu1 %v6302_v9 }
 0x388   :  { %4876 = vmatprep.subr.bf16.mxu0 %v6216_v46  ;;  %4903 = vmatprep.subr.bf16.mxu1 %v5960_v49 }
 0x38b   :  { %4878 = vmatpush1.bf16.msra.mxu0 %v6241_v54  ;;  %4905 = vmatpush3.bf16.msra.mxu1 %v6330_v20 }
 0x38c   :  { %4880 = vmatprep.subr.bf16.mxu0 %v6250_v57  ;;  %4906 = vmatprep.subr.bf16.mxu1 %v5960_v49 }
 0x38f   :  { %4882 = vmatpush1.bf16.msra.mxu0 %v6275_v1  ;;  %4908 = vmatpush3.bf16.msra.mxu1 %v6350_v27 }
 0x390   :  { %4884 = vmatprep.subr.bf16.mxu0 %v6284_v4  ;;  %4909 = vmatprep.subr.bf16.mxu1 %v5960_v49 }
 0x393   :  { %4886 = vmatpush1.bf16.msra.mxu0 %v6309_v11  ;;  %4911 = vmatpush3.bf16.msra.mxu1 %v6366_v30 }
 0x394   :  { %4888 = vmatprep.subr.bf16.mxu0 %v6318_v15  ;;  %4912 = vmatprep.subr.bf16.mxu1 %v5960_v49 }
 0x397   :  { %4890 = vmatpush1.bf16.msra.mxu0 %v6337_v22  ;;  %4914 = vmatpush3.bf16.msra.mxu1 %v6381_v35 }
 0x398   :  { %4916 = vmatprep.subr.bf16.mxu0 %v6116_v13  ;;  %4947 = vmatprep.subr.bf16.mxu1 %v5960_v49 }
 0x44d   :  { %v1023_v51 = vpop.f32.mrb[6].mxu0  ;;  %v1094_v59 = vpop.f32.mrb[14].mxu1 }
 0x44e   :  { %v5625_v44 = vadd.f32 %v1023_v51, %v6439_v60  ;;  %v1025_v2 = vpop.f32.mrb[7].mxu0  ;;  %v4123_v40 = vpop.f32.mrb[15].mxu1  ;;  %v1115_v21 = vadd.f32 %v6456_v29, %v1094_v59 }
 0x44f   :  { %v5626_v7 = vadd.f32 %v1025_v2, %v6445_v3 }
 0x450   :  { %v3617_v45 = vmul.f32 -1.442695, %v5625_v44 }
 0x451   :  { %v3618_v8 = vmul.f32 -1.442695, %v5626_v7 }
 0x452   :  { %5725 = vpow2.f32 %v3617_v45 }
 0x453   :  { %5727 = vpow2.f32 %v3618_v8 }
 0x45c   :  { %v5726_v12 = vpop.eup %5725 }
 0x45d   :  { %v1105_v14 = vadd.f32 1.0, %v5726_v12  ;;  %v5728_v18 = vpop.eup %5727 }
 0x45e   :  { %v1112_v19 = vadd.f32 1.0, %v5728_v18 }
 0x45f   :  { %5729 = vrcp.f32 %v1105_v14 }
 0x460   :  { %5731 = vrcp.f32 %v1112_v19 }
 0x469   :  { %v5730_v25 = vpop.eup %5729 }
 0x46a   :  { %v1116_v26 = vmul.f32 %v5730_v25, %v1115_v21  ;;  %v5732_v31 = vpop.eup %5731 }
 0x46b   :  { %v1119_v33 = vsub.f32 1.0, %v5732_v31  ;;  %v1121_v42 = vmul.f32 %v5732_v31, %v6547_v55 }
 0x46c   :  { %v1117_v28 = vadd.f32 %v1116_v26, %v6429_v48 }
 0x46e   :  { %5733 = vtanh.f32 %v1117_v28 }
 0x478   :  { %v5734_v36 = vpop.eup %5733 }
 0x479   :  { %v1120_v39 = vmul.f32 %v5734_v36, %v1119_v33 }
 0x47b   :  { %v6591_v47 = vadd.f32 %v1121_v42, %v1120_v39 }
 0x47d   :  { %1189 = vmatmul.mubr.f32.vlgmr.msra.gmra.mrb[8].mxu0 %v6591_v47  ;;  %4157 = vmatmul.mubr.f32.vlgmr.msra.gmra.mrb[16].mxu1 %v6591_v47 }
 0x47e   :  { %4918 = vmatpush1.bf16.msra.mxu0 %v6126_v16  ;;  %4949 = vmatpush3.bf16.msra.mxu1 %v6200_v41 }
 0x47f   :  { %4920 = vmatprep.subr.bf16.mxu0 %v6129_v17  ;;  %4950 = vmatprep.subr.bf16.mxu1 %v5960_v49 }
 0x480   :  { %1355 = vmatprep.mubr.f32.mxu0 %v5958_v0  ;;  %4191 = vmatprep.mubr.msk.f32.mxu1 %vm5961_vm4, %v5958_v0 }
 0x482   :  { %4922 = vmatpush1.bf16.msra.mxu0 %v6149_v23  ;;  %4952 = vmatpush3.bf16.msra.mxu1 %v6234_v52 }
 0x483   :  { %4924 = vmatprep.subr.bf16.mxu0 %v6152_v24  ;;  %4953 = vmatprep.subr.bf16.mxu1 %v5960_v49 }
 0x486   :  { %4926 = vmatpush1.bf16.msra.mxu0 %v6172_v32  ;;  %4955 = vmatpush3.bf16.msra.mxu1 %v6268_v62 }
 0x487   :  { %4928 = vmatprep.subr.bf16.mxu0 %v6175_v34  ;;  %4956 = vmatprep.subr.bf16.mxu1 %v5960_v49 }
 0x48a   :  { %4930 = vmatpush1.bf16.msra.mxu0 %v6207_v43  ;;  %4958 = vmatpush3.bf16.msra.mxu1 %v6302_v9 }
 0x48b   :  { %4932 = vmatprep.subr.bf16.mxu0 %v6216_v46  ;;  %4959 = vmatprep.subr.bf16.mxu1 %v5960_v49 }
 0x48e   :  { %4934 = vmatpush1.bf16.msra.mxu0 %v6241_v54  ;;  %4961 = vmatpush3.bf16.msra.mxu1 %v6330_v20 }
 0x48f   :  { %4936 = vmatprep.subr.bf16.mxu0 %v6250_v57  ;;  %4962 = vmatprep.subr.bf16.mxu1 %v5960_v49 }
 0x492   :  { %4938 = vmatpush1.bf16.msra.mxu0 %v6275_v1  ;;  %4964 = vmatpush3.bf16.msra.mxu1 %v6350_v27 }
 0x493   :  { %4940 = vmatprep.subr.bf16.mxu0 %v6284_v4  ;;  %4965 = vmatprep.subr.bf16.mxu1 %v5960_v49 }
 0x496   :  { %4942 = vmatpush1.bf16.msra.mxu0 %v6309_v11  ;;  %4967 = vmatpush3.bf16.msra.mxu1 %v6366_v30 }
 0x497   :  { %4944 = vmatprep.subr.bf16.mxu0 %v6318_v15  ;;  %4968 = vmatprep.subr.bf16.mxu1 %v5960_v49 }
 0x49a   :  { %4946 = vmatpush1.bf16.msra.mxu0 %v6337_v22  ;;  %4970 = vmatpush3.bf16.msra.mxu1 %v6381_v35 }
 0x49b   :  { %4972 = vmatprep.subr.bf16.mxu0 %v6116_v13  ;;  %5003 = vmatprep.subr.bf16.mxu1 %v5960_v49 }
 0x550   :  { %v1190_v48 = vpop.f32.mrb[8].mxu0  ;;  %v1261_v50 = vpop.f32.mrb[16].mxu1 }
 0x551   :  { %v5627_v51 = vadd.f32 %v1190_v48, %v6439_v60  ;;  %v1192_v59 = vpop.f32.mrb[9].mxu0  ;;  %v4158_v44 = vpop.f32.mrb[17].mxu1  ;;  %v1282_v18 = vadd.f32 %v6456_v29, %v1261_v50 }
 0x552   :  { %v5628_v40 = vadd.f32 %v1192_v59, %v6445_v3 }
 0x553   :  { %v3619_v2 = vmul.f32 -1.442695, %v5627_v51 }
 0x554   :  { %v3620_v45 = vmul.f32 -1.442695, %v5628_v40 }
 0x555   :  { %5735 = vpow2.f32 %v3619_v2 }
 0x556   :  { %5737 = vpow2.f32 %v3620_v45 }
 0x55f   :  { %v5736_v7 = vpop.eup %5735 }
 0x560   :  { %v1272_v8 = vadd.f32 1.0, %v5736_v7  ;;  %v5738_v12 = vpop.eup %5737 }
 0x561   :  { %v1279_v14 = vadd.f32 1.0, %v5738_v12 }
 0x562   :  { %5739 = vrcp.f32 %v1272_v8 }
 0x563   :  { %5741 = vrcp.f32 %v1279_v14 }
 0x56c   :  { %v5740_v19 = vpop.eup %5739 }
 0x56d   :  { %v1283_v21 = vmul.f32 %v5740_v19, %v1282_v18  ;;  %v5742_v26 = vpop.eup %5741 }
 0x56e   :  { %v1286_v28 = vsub.f32 1.0, %v5742_v26  ;;  %v1288_v36 = vmul.f32 %v5742_v26, %v6591_v47 }
 0x56f   :  { %v1284_v25 = vadd.f32 %v1283_v21, %v6441_v61 }
 0x571   :  { %5743 = vtanh.f32 %v1284_v25 }
 0x57b   :  { %v5744_v31 = vpop.eup %5743 }
 0x57c   :  { %v1287_v33 = vmul.f32 %v5744_v31, %v1286_v28 }
 0x57e   :  { %v6635_v39 = vadd.f32 %v1288_v36, %v1287_v33  ;;  %v1800_v33 = vld [vmem:[#allocation6] sm:$0xff]  ;;  %v1803_v36 = vld [vmem:[#allocation6 + $0x18] sm:$0xff] }
 0x580   :  { %1356 = vmatmul.mubr.f32.vlgmr.msra.gmra.mrb[10].mxu0 %v6635_v39  ;;  %4192 = vmatmul.mubr.f32.vlgmr.msra.gmra.mrb[18].mxu1 %v6635_v39 }
 0x581   :  { %4974 = vmatpush1.bf16.msra.mxu0 %v6126_v16  ;;  %5005 = vmatpush3.bf16.msra.mxu1 %v6200_v41 }
 0x582   :  { %4976 = vmatprep.subr.bf16.mxu0 %v6129_v17  ;;  %5006 = vmatprep.subr.bf16.mxu1 %v5960_v49 }
 0x583   :  { %1522 = vmatprep.mubr.f32.mxu0 %v5958_v0  ;;  %4226 = vmatprep.mubr.msk.f32.mxu1 %vm5961_vm4, %v5958_v0 }
 0x585   :  { %4978 = vmatpush1.bf16.msra.mxu0 %v6149_v23  ;;  %5008 = vmatpush3.bf16.msra.mxu1 %v6234_v52 }
 0x586   :  { %4980 = vmatprep.subr.bf16.mxu0 %v6152_v24  ;;  %5009 = vmatprep.subr.bf16.mxu1 %v5960_v49 }
 0x589   :  { %4982 = vmatpush1.bf16.msra.mxu0 %v6172_v32  ;;  %5011 = vmatpush3.bf16.msra.mxu1 %v6268_v62 }
 0x58a   :  { %4984 = vmatprep.subr.bf16.mxu0 %v6175_v34  ;;  %5012 = vmatprep.subr.bf16.mxu1 %v5960_v49 }
 0x58d   :  { %4986 = vmatpush1.bf16.msra.mxu0 %v6207_v43  ;;  %5014 = vmatpush3.bf16.msra.mxu1 %v6302_v9 }
 0x58e   :  { %4988 = vmatprep.subr.bf16.mxu0 %v6216_v46  ;;  %5015 = vmatprep.subr.bf16.mxu1 %v5960_v49 }
 0x591   :  { %4990 = vmatpush1.bf16.msra.mxu0 %v6241_v54  ;;  %5017 = vmatpush3.bf16.msra.mxu1 %v6330_v20 }
 0x592   :  { %4992 = vmatprep.subr.bf16.mxu0 %v6250_v57  ;;  %5018 = vmatprep.subr.bf16.mxu1 %v5960_v49 }
 0x595   :  { %4994 = vmatpush1.bf16.msra.mxu0 %v6275_v1  ;;  %5020 = vmatpush3.bf16.msra.mxu1 %v6350_v27 }
 0x596   :  { %4996 = vmatprep.subr.bf16.mxu0 %v6284_v4  ;;  %5021 = vmatprep.subr.bf16.mxu1 %v5960_v49 }
 0x599   :  { %4998 = vmatpush1.bf16.msra.mxu0 %v6309_v11  ;;  %5023 = vmatpush3.bf16.msra.mxu1 %v6366_v30 }
 0x59a   :  { %5000 = vmatprep.subr.bf16.mxu0 %v6318_v15  ;;  %5024 = vmatprep.subr.bf16.mxu1 %v5960_v49 }
 0x59d   :  { %5002 = vmatpush1.bf16.msra.mxu0 %v6337_v22  ;;  %5026 = vmatpush3.bf16.msra.mxu1 %v6381_v35 }
 0x59e   :  { %5028 = vmatprep.subr.bf16.mxu0 %v6116_v13  ;;  %5059 = vmatprep.subr.bf16.mxu1 %v5960_v49 }
 0x653   :  { %v1357_v61 = vpop.f32.mrb[10].mxu0  ;;  %v1428_v42 = vpop.f32.mrb[18].mxu1 }
 0x654   :  { %v5629_v48 = vadd.f32 %v1357_v61, %v6439_v60  ;;  %v1359_v50 = vpop.f32.mrb[11].mxu0  ;;  %v4193_v51 = vpop.f32.mrb[19].mxu1  ;;  %v1449_v13 = vadd.f32 %v6456_v29, %v1428_v42  ;;  %v1807_v42 = vld [vmem:[#allocation6 + $0x38] sm:$0xff] }
 0x655   :  { %v5630_v44 = vadd.f32 %v1359_v50, %v6445_v3 }
 0x656   :  { %v3621_v59 = vmul.f32 -1.442695, %v5629_v48  ;;  %v1810_v48 = vld [vmem:[#allocation6 + $0x50] sm:$0xff] }
 0x657   :  { %v3622_v2 = vmul.f32 -1.442695, %v5630_v44  ;;  %v1811_v44 = vld [vmem:[#allocation6 + $0x58] sm:$0xff] }
 0x658   :  { %5745 = vpow2.f32 %v3621_v59  ;;  %v1808_v59 = vld [vmem:[#allocation6 + $0x40] sm:$0xff] }
 0x659   :  { %5747 = vpow2.f32 %v3622_v2  ;;  %v5085_v2 = vpack.c.bf16 %v1803_v36, %v1800_v33  ;;  %v1830_v33 = vld [vmem:[#allocation6 + $0xf0] sm:$0xff]  ;;  %v1833_v36 = vld [vmem:[#allocation6 + $0x108] sm:$0xff] }
 0x662   :  { %v5746_v40 = vpop.eup %5745 }
 0x663   :  { %v1439_v45 = vadd.f32 1.0, %v5746_v40  ;;  %v5748_v7 = vpop.eup %5747  ;;  %v5087_v40 = vpack.c.bf16 %v1810_v48, %v1807_v42  ;;  %v1840_v42 = vld [vmem:[#allocation6 + $0x140] sm:$0xff]  ;;  %v1838_v48 = vld [vmem:[#allocation6 + $0x130] sm:$0xff] }
 0x664   :  { %v1446_v8 = vadd.f32 1.0, %v5748_v7  ;;  %v1809_v7 = vld [vmem:[#allocation6 + $0x48] sm:$0xff] }
 0x665   :  { %5749 = vrcp.f32 %v1439_v45  ;;  %v1806_v45 = vld [vmem:[#allocation6 + $0x30] sm:$0xff] }
 0x666   :  { %5751 = vrcp.f32 %v1446_v8  ;;  %v5119_v8 = vpack.c.bf16 %v1811_v44, %v1808_v59 }
 0x66f   :  { %v5750_v12 = vpop.eup %5749 }
 0x670   :  { %v1450_v14 = vmul.f32 %v5750_v12, %v1449_v13  ;;  %v5752_v19 = vpop.eup %5751  ;;  %v1816_v13 = vld [vmem:[#allocation6 + $0x80] sm:$0xff]  ;;  %v1814_v12 = vld [vmem:[#allocation6 + $0x70] sm:$0xff] }
 0x671   :  { %v1453_v21 = vsub.f32 1.0, %v5752_v19  ;;  %v1455_v28 = vmul.f32 %v5752_v19, %v6635_v39 }
 0x672   :  { %v1451_v18 = vadd.f32 %v1450_v14, %v6435_v58  ;;  %v1817_v14 = vld [vmem:[#allocation6 + $0x88] sm:$0xff] }
 0x674   :  { %5753 = vtanh.f32 %v1451_v18  ;;  %v5089_v18 = vpack.c.bf16 %v1809_v7, %v1806_v45  ;;  %v1843_v45 = vld [vmem:[#allocation6 + $0x158] sm:$0xff]  ;;  %v1846_v7 = vld [vmem:[#allocation6 + $0x170] sm:$0xff] }
 0x67e   :  { %v5754_v25 = vpop.eup %5753 }
 0x67f   :  { %v1454_v26 = vmul.f32 %v5754_v25, %v1453_v21  ;;  %v5123_v21 = vpack.c.bf16 %v1817_v14, %v1814_v12  ;;  %v1812_v25 = vld [vmem:[#allocation6 + $0x60] sm:$0xff]  ;;  %v5111_v12 = vpack.c.bf16 %v1846_v7, %v1843_v45  ;;  %v1892_v7 = vld [vmem:[#allocation8 + $0x158] sm:$0xff] }
 0x681   :  { %v6679_v31 = vadd.f32 %v1455_v28, %v1454_v26  ;;  %v1815_v26 = vld [vmem:[#allocation6 + $0x78] sm:$0xff] }
 0x682   :  { %v1819_v28 = vld [vmem:[#allocation6 + $0x98] sm:$0xff] }
 0x683   :  { %1523 = vmatmul.mubr.f32.vlgmr.msra.gmra.mrb[12].mxu0 %v6679_v31  ;;  %4227 = vmatmul.mubr.f32.vlgmr.msra.gmra.mrb[20].mxu1 %v6679_v31 }
 0x684   :  { %5030 = vmatpush1.bf16.msra.mxu0 %v6126_v16  ;;  %5061 = vmatpush3.bf16.msra.mxu1 %v6200_v41  ;;  %v1801_v16 = vld [vmem:[#allocation6 + $0x8] sm:$0xff] }
 0x685   :  { %5032 = vmatprep.subr.bf16.mxu0 %v6129_v17  ;;  %5062 = vmatprep.subr.bf16.mxu1 %v5960_v49  ;;  %v1804_v17 = vld [vmem:[#allocation6 + $0x20] sm:$0xff] }
 0x686   :  { %1689 = vmatprep.mubr.f32.mxu0 %v5958_v0  ;;  %4261 = vmatprep.mubr.msk.f32.mxu1 %vm5961_vm4, %v5958_v0 }
 0x688   :  { %5034 = vmatpush1.bf16.msra.mxu0 %v6149_v23  ;;  %5064 = vmatpush3.bf16.msra.mxu1 %v6234_v52  ;;  %v1802_v23 = vld [vmem:[#allocation6 + $0x10] sm:$0xff] }
 0x689   :  { %5036 = vmatprep.subr.bf16.mxu0 %v6152_v24  ;;  %5065 = vmatprep.subr.bf16.mxu1 %v5960_v49  ;;  %v5083_v24 = vpack.c.bf16 %v1804_v17, %v1801_v16  ;;  %v1822_v16 = vld [vmem:[#allocation6 + $0xb0] sm:$0xff]  ;;  %v1820_v17 = vld [vmem:[#allocation6 + $0xa0] sm:$0xff] }
 0x68c   :  { %5038 = vmatpush1.bf16.msra.mxu0 %v6172_v32  ;;  %5067 = vmatpush3.bf16.msra.mxu1 %v6268_v62  ;;  %v1805_v32 = vld [vmem:[#allocation6 + $0x28] sm:$0xff] }
 0x68d   :  { %5040 = vmatprep.subr.bf16.mxu0 %v6175_v34  ;;  %5068 = vmatprep.subr.bf16.mxu1 %v5960_v49  ;;  %v5115_v34 = vpack.c.bf16 %v1805_v32, %v1802_v23  ;;  %v1823_v23 = vld [vmem:[#allocation6 + $0xb8] sm:$0xff]  ;;  %v5095_v32 = vpack.c.bf16 %v1822_v16, %v1819_v28  ;;  %v1855_v16 = vld [vmem:[#allocation8 + $0x30] sm:$0xff] }
 0x690   :  { %5042 = vmatpush1.bf16.msra.mxu0 %v6207_v43  ;;  %5070 = vmatpush3.bf16.msra.mxu1 %v6302_v9 }
 0x691   :  { %5044 = vmatprep.subr.bf16.mxu0 %v6216_v46  ;;  %5071 = vmatprep.subr.bf16.mxu1 %v5960_v49 }
 0x694   :  { %5046 = vmatpush1.bf16.msra.mxu0 %v6241_v54  ;;  %5073 = vmatpush3.bf16.msra.mxu1 %v6330_v20 }
 0x695   :  { %5048 = vmatprep.subr.bf16.mxu0 %v6250_v57  ;;  %5074 = vmatprep.subr.bf16.mxu1 %v5960_v49 }
 0x698   :  { %5050 = vmatpush1.bf16.msra.mxu0 %v6275_v1  ;;  %5076 = vmatpush3.bf16.msra.mxu1 %v6350_v27 }
 0x699   :  { %5052 = vmatprep.subr.bf16.mxu0 %v6284_v4  ;;  %5077 = vmatprep.subr.bf16.mxu1 %v5960_v49 }
 0x69c   :  { %5054 = vmatpush1.bf16.msra.mxu0 %v6309_v11  ;;  %5079 = vmatpush3.bf16.msra.mxu1 %v6366_v30 }
 0x69d   :  { %5056 = vmatprep.subr.bf16.mxu0 %v6318_v15  ;;  %5080 = vmatprep.subr.bf16.mxu1 %v5960_v49 }
 0x6a0   :  { %5058 = vmatpush1.bf16.msra.mxu0 %v6337_v22  ;;  %5082 = vmatpush3.bf16.msra.mxu1 %v6381_v35 }
 0x6a1   :  { %5084 = vmatprep.subr.bf16.mxu0 %v5083_v24  ;;  %5116 = vmatprep.subr.bf16.mxu1 %v5115_v34  ;;  %v5093_v24 = vpack.c.bf16 %v1815_v26, %v1812_v25  ;;  %v1849_v25 = vld [vmem:[#allocation8] sm:$0xff] }
 0x756   :  { %v1524_v41 = vpop.f32.mrb[12].mxu0  ;;  %v1595_v43 = vpop.f32.mrb[20].mxu1 }
 0x757   :  { %v5631_v46 = vadd.f32 %v1524_v41, %v6439_v60  ;;  %v1526_v52 = vpop.f32.mrb[13].mxu0  ;;  %v4228_v54 = vpop.f32.mrb[21].mxu1  ;;  %v1616_v20 = vadd.f32 %v6456_v29, %v1595_v43  ;;  %v1818_v41 = vld [vmem:[#allocation6 + $0x90] sm:$0xff]  ;;  %v1821_v43 = vld [vmem:[#allocation6 + $0xa8] sm:$0xff] }
 0x758   :  { %v5632_v62 = vadd.f32 %v1526_v52, %v6445_v3  ;;  %v1828_v52 = vld [vmem:[#allocation6 + $0xe0] sm:$0xff]  ;;  %v1826_v54 = vld [vmem:[#allocation6 + $0xd0] sm:$0xff] }
 0x759   :  { %v3623_v57 = vmul.f32 -1.442695, %v5631_v46  ;;  %v1825_v46 = vld [vmem:[#allocation6 + $0xc8] sm:$0xff] }
 0x75a   :  { %v3624_v1 = vmul.f32 -1.442695, %v5632_v62  ;;  %v5097_v62 = vpack.c.bf16 %v1821_v43, %v1818_v41  ;;  %v1861_v41 = vld [vmem:[#allocation8 + $0x60] sm:$0xff]  ;;  %v1864_v43 = vld [vmem:[#allocation8 + $0x78] sm:$0xff] }
 0x75b   :  { %5755 = vpow2.f32 %v3623_v57  ;;  %v1829_v57 = vld [vmem:[#allocation6 + $0xe8] sm:$0xff] }
 0x75c   :  { %5757 = vpow2.f32 %v3624_v1  ;;  %v5099_v1 = vpack.c.bf16 %v1828_v52, %v1825_v46  ;;  %v6762_v46 = vpack.c.bf16 %v1864_v43, %v1861_v41  ;;  %v1868_v52 = vld [vmem:[#allocation8 + $0x98] sm:$0xff] }
 0x75d   :  { %v1884_v41 = vld [vmem:[#allocation8 + $0x118] sm:$0xff] }
 0x765   :  { %v5756_v4 = vpop.eup %5755 }
 0x766   :  { %v1606_v9 = vadd.f32 1.0, %v5756_v4  ;;  %v5758_v11 = vpop.eup %5757  ;;  %v5131_v4 = vpack.c.bf16 %v1829_v57, %v1826_v54  ;;  %v1871_v54 = vld [vmem:[#allocation8 + $0xb0] sm:$0xff] }
 0x767   :  { %v1613_v15 = vadd.f32 1.0, %v5758_v11  ;;  %v1827_v11 = vld [vmem:[#allocation6 + $0xd8] sm:$0xff]  ;;  %v6766_v57 = vpack.c.bf16 %v1871_v54, %v1868_v52  ;;  %v1887_v52 = vld [vmem:[#allocation8 + $0x130] sm:$0xff]  ;;  %v1890_v54 = vld [vmem:[#allocation8 + $0x148] sm:$0xff] }
 0x768   :  { %5759 = vrcp.f32 %v1606_v9  ;;  %v1824_v9 = vld [vmem:[#allocation6 + $0xc0] sm:$0xff] }
 0x769   :  { %5761 = vrcp.f32 %v1613_v15  ;;  %v1831_v15 = vld [vmem:[#allocation6 + $0xf8] sm:$0xff] }
 0x772   :  { %v5760_v22 = vpop.eup %5759 }
 0x773   :  { %v1617_v27 = vmul.f32 %v5760_v22, %v1616_v20  ;;  %v5762_v35 = vpop.eup %5761  ;;  %v1834_v20 = vld [vmem:[#allocation6 + $0x110] sm:$0xff]  ;;  %v1832_v22 = vld [vmem:[#allocation6 + $0x100] sm:$0xff] }
 0x774   :  { %v1620_v58 = vsub.f32 1.0, %v5762_v35  ;;  %v1622_v51 = vmul.f32 %v5762_v35, %v6679_v31  ;;  %v5103_v35 = vpack.c.bf16 %v1834_v20, %v1831_v15  ;;  %v1873_v20 = vld [vmem:[#allocation8 + $0xc0] sm:$0xff] }
 0x775   :  { %v1618_v30 = vadd.f32 %v1617_v27, %v6450_v10  ;;  %v1813_v10 = vld [vmem:[#allocation6 + $0x68] sm:$0xff]  ;;  %v1835_v27 = vld [vmem:[#allocation6 + $0x118] sm:$0xff] }
 0x776   :  { %v5091_v19 = vpack.c.bf16 %v1816_v13, %v1813_v10  ;;  %v1844_v10 = vld [vmem:[#allocation6 + $0x160] sm:$0xff] }
 0x777   :  { %5763 = vtanh.f32 %v1618_v30  ;;  %v5101_v30 = vpack.c.bf16 %v1827_v11, %v1824_v9  ;;  %v1874_v9 = vld [vmem:[#allocation8 + $0xc8] sm:$0xff]  ;;  %v1877_v11 = vld [vmem:[#allocation8 + $0xe0] sm:$0xff] }
 0x778   :  { %v6772_v15 = vpack.c.bf16 %v1877_v11, %v1874_v9  ;;  %v1896_v9 = vld [vmem:[#allocation8 + $0x178] sm:$0xff] }
 0x781   :  { %v5764_v61 = vpop.eup %5763 }
 0x782   :  { %v1621_v50 = vmul.f32 %v5764_v61, %v1620_v58  ;;  %v5135_v58 = vpack.c.bf16 %v1835_v27, %v1832_v22  ;;  %v1837_v61 = vld [vmem:[#allocation6 + $0x128] sm:$0xff]  ;;  %v1876_v22 = vld [vmem:[#allocation8 + $0xd8] sm:$0xff] }
 0x783   :  { %v5107_v59 = vpack.c.bf16 %v1840_v42, %v1837_v61  ;;  %v6774_v27 = vpack.c.bf16 %v1876_v22, %v1873_v20  ;;  %v1886_v42 = vld [vmem:[#allocation8 + $0x128] sm:$0xff] }
 0x784   :  { %v6721_v29 = vadd.f32 %v1622_v51, %v1621_v50  ;;  %v1841_v50 = vld [vmem:[#allocation6 + $0x148] sm:$0xff]  ;;  %v5105_v51 = vpack.c.bf16 %v1833_v36, %v1830_v33  ;;  %v1879_v33 = vld [vmem:[#allocation8 + $0xf0] sm:$0xff] }
 0x785   :  { %v5139_v44 = vpack.c.bf16 %v1841_v50, %v1838_v48  ;;  %v1882_v36 = vld [vmem:[#allocation8 + $0x108] sm:$0xff]  ;;  %v1889_v48 = vld [vmem:[#allocation8 + $0x140] sm:$0xff] }
 0x786   :  { %1690 = vmatmul.mubr.f32.vlgmr.msra.gmra.mrb[14].mxu0 %v6721_v29  ;;  %4262 = vmatmul.mubr.f32.vlgmr.msra.gmra.mrb[22].mxu1 %v6721_v29  ;;  %v6780_v61 = vpack.c.bf16 %v1882_v36, %v1879_v33  ;;  %v1885_v50 = vld [vmem:[#allocation8 + $0x120] sm:$0xff] }
 0x787   :  { %5086 = vmatpush1.bf16.msra.mxu0 %v5085_v2  ;;  %5118 = vmatpush3.bf16.msra.mxu1 %v5115_v34  ;;  %v5127_v34 = vpack.c.bf16 %v1823_v23, %v1820_v17  ;;  %v1836_v2 = vld [vmem:[#allocation6 + $0x120] sm:$0xff]  ;;  %v1858_v17 = vld [vmem:[#allocation8 + $0x48] sm:$0xff] }
 0x788   :  { %4296 = vmatprep.mubr.f32.mxu1 %v6459_v6  ;;  %5088 = vmatprep.subr.bf16.mxu0 %v5087_v40  ;;  %v1839_v40 = vld [vmem:[#allocation6 + $0x138] sm:$0xff]  ;;  %v6756_v23 = vpack.c.bf16 %v1858_v17, %v1855_v16  ;;  %v1875_v16 = vld [vmem:[#allocation8 + $0xd0] sm:$0xff]  ;;  %v1878_v17 = vld [vmem:[#allocation8 + $0xe8] sm:$0xff] }
 0x789   :  { %5120 = vmatprep.subr.bf16.mxu1 %v5119_v8  ;;  %1978 = vmatprep.mubr.f32.mxu0 %v5958_v0  ;;  %v5109_v13 = vpack.c.bf16 %v1839_v40, %v1836_v2  ;;  %v1854_v2 = vld [vmem:[#allocation8 + $0x28] sm:$0xff] }
 0x78b   :  { %5090 = vmatpush1.bf16.msra.mxu0 %v5089_v18  ;;  %5122 = vmatpush3.bf16.msra.mxu1 %v5119_v8  ;;  %v1847_v8 = vld [vmem:[#allocation6 + $0x178] sm:$0xff]  ;;  %v1842_v18 = vld [vmem:[#allocation6 + $0x150] sm:$0xff] }
 0x78c   :  { %5092 = vmatprep.subr.bf16.mxu0 %v5091_v19  ;;  %5124 = vmatprep.subr.bf16.mxu1 %v5123_v21  ;;  %v5143_v14 = vpack.c.bf16 %v1847_v8, %v1844_v10  ;;  %v1845_v19 = vld [vmem:[#allocation6 + $0x168] sm:$0xff]  ;;  %v1895_v10 = vld [vmem:[#allocation8 + $0x170] sm:$0xff] }
 0x78d   :  { %v6793_v8 = vpack.c.bf16 %v1895_v10, %v1892_v7  ;;  %v5855_v7 = vld [vmem:[%s7210_s4] ss:$0 sm:$0xff] }
 0x78f   :  { %5094 = vmatpush1.bf16.msra.mxu0 %v5093_v24  ;;  %5126 = vmatpush3.bf16.msra.mxu1 %v5123_v21  ;;  %v5113_v21 = vpack.c.bf16 %v1845_v19, %v1842_v18  ;;  %v1862_v24 = vld [vmem:[#allocation8 + $0x68] sm:$0xff]  ;;  %v1857_v18 = vld [vmem:[#allocation8 + $0x40] sm:$0xff]  ;;  %v1860_v19 = vld [vmem:[#allocation8 + $0x58] sm:$0xff] }
 0x790   :  { %5096 = vmatprep.subr.bf16.mxu0 %v5095_v32  ;;  %5128 = vmatprep.subr.bf16.mxu1 %v5127_v34  ;;  %v1865_v32 = vld [vmem:[#allocation8 + $0x80] sm:$0xff] }
 0x793   :  { %5098 = vmatpush1.bf16.msra.mxu0 %v5097_v62  ;;  %5130 = vmatpush3.bf16.msra.mxu1 %v5127_v34  ;;  %v6760_v34 = vpack.c.bf16 %v1865_v32, %v1862_v24  ;;  %v1867_v62 = vld [vmem:[#allocation8 + $0x90] sm:$0xff]  ;;  %v6812_v24 = vpack.c.bf16 %v1878_v17, %v1875_v16  ;;  %v1881_v32 = vld [vmem:[#allocation8 + $0x100] sm:$0xff] }
 0x794   :  { %5100 = vmatprep.subr.bf16.mxu0 %v5099_v1  ;;  %5132 = vmatprep.subr.bf16.mxu1 %v5131_v4  ;;  %v1870_v1 = vld [vmem:[#allocation8 + $0xa8] sm:$0xff]  ;;  %v6816_v43 = vpack.c.bf16 %v1884_v41, %v1881_v32 }
 0x797   :  { %5102 = vmatpush1.bf16.msra.mxu0 %v5101_v30  ;;  %5134 = vmatpush3.bf16.msra.mxu1 %v5131_v4  ;;  %v6768_v4 = vpack.c.bf16 %v1870_v1, %v1867_v62  ;;  %v1880_v30 = vld [vmem:[#allocation8 + $0xf8] sm:$0xff]  ;;  %v6820_v62 = vpack.c.bf16 %v1890_v54, %v1887_v52  ;;  %v1893_v1 = vld [vmem:[#allocation8 + $0x160] sm:$0xff] }
 0x798   :  { %5104 = vmatprep.subr.bf16.mxu0 %v5103_v35  ;;  %5136 = vmatprep.subr.bf16.mxu1 %v5135_v58  ;;  %v1883_v35 = vld [vmem:[#allocation8 + $0x110] sm:$0xff]  ;;  %v6824_v11 = vpack.c.bf16 %v1896_v9, %v1893_v1 }
 0x79b   :  { %5106 = vmatpush1.bf16.msra.mxu0 %v5105_v51  ;;  %5138 = vmatpush3.bf16.msra.mxu1 %v5135_v58  ;;  %v6778_v58 = vpack.c.bf16 %v1883_v35, %v1880_v30  ;;  %v6784_v51 = vpack.c.bf16 %v1889_v48, %v1886_v42 }
 0x79c   :  { %5108 = vmatprep.subr.bf16.mxu0 %v5107_v59  ;;  %5140 = vmatprep.subr.bf16.mxu1 %v5139_v44  ;;  %v1888_v59 = vld [vmem:[#allocation8 + $0x138] sm:$0xff] }
 0x79d   :  { %v6786_v40 = vpack.c.bf16 %v1888_v59, %v1885_v50 }
 0x79f   :  { %5110 = vmatpush1.bf16.msra.mxu0 %v5109_v13  ;;  %5142 = vmatpush3.bf16.msra.mxu1 %v5139_v44  ;;  %v1851_v44 = vld [vmem:[#allocation8 + $0x10] sm:$0xff] }
 0x7a0   :  { %5112 = vmatprep.subr.bf16.mxu0 %v5111_v12  ;;  %5144 = vmatprep.subr.bf16.mxu1 %v5143_v14  ;;  %v6788_v45 = vpack.c.bf16 %v1854_v2, %v1851_v44  ;;  %v1891_v13 = vld [vmem:[#allocation8 + $0x150] sm:$0xff]  ;;  %v1894_v12 = vld [vmem:[#allocation8 + $0x168] sm:$0xff] }
 0x7a3   :  { %5114 = vmatpush1.bf16.msra.mxu0 %v5113_v21  ;;  %5146 = vmatpush3.bf16.msra.mxu1 %v5143_v14  ;;  %v6796_v14 = vpack.c.bf16 %v1894_v12, %v1891_v13  ;;  %v6799_v21 = vpack.c.bf16 %v1860_v19, %v1857_v18 }
 0x7a4   :  { %5179 = vmatprep.subr.bf16.mxu1 %v5960_v49 }
 0x7a6   :  { %1979 = vmatmul.mubr.f32.vlgmr.msra.gmra.mrb[16].mxu0 %v6459_v6  ;;  %4297 = vmatmul.mubr.f32.vlgmr.msra.gmra.mrb[24].mxu1 %v6503_v63  ;;  %v1850_v6 = vld [vmem:[#allocation8 + $0x8] sm:$0xff] }
 0x7a7   :  { %4299 = vmatprep.mubr.f32.mxu1 %v6547_v55  ;;  %1984 = vmatprep.mubr.f32.mxu0 %v5958_v0 }
 0x7a8   :  { %5181 = vmatpush3.bf16.msra.mxu1 %v6788_v45 }
 0x7a9   :  { %5182 = vmatprep.subr.bf16.mxu1 %v5960_v49 }
 0x7aa   :  { %1985 = vmatmul.mubr.f32.gmra.mrb[18].mxu0 %v6503_v63  ;;  %4300 = vmatmul.mubr.f32.gmra.mrb[26].mxu1 %v6591_v47  ;;  %v1853_v63 = vld [vmem:[#allocation8 + $0x20] sm:$0xff] }
 0x7ab   :  { %4302 = vmatprep.mubr.f32.mxu1 %v6635_v39  ;;  %1990 = vmatprep.mubr.f32.mxu0 %v5958_v0 }
 0x7ac   :  { %5184 = vmatpush3.bf16.msra.mxu1 %v6799_v21 }
 0x7ad   :  { %5185 = vmatprep.subr.bf16.mxu1 %v5960_v49 }
 0x7ae   :  { %1991 = vmatmul.mubr.f32.gmra.mrb[20].mxu0 %v6547_v55  ;;  %4303 = vmatmul.mubr.f32.gmra.mrb[28].mxu1 %v6679_v31  ;;  %v6748_v55 = vpack.c.bf16 %v1853_v63, %v1850_v6  ;;  %v1863_v6 = vld [vmem:[#allocation8 + $0x70] sm:$0xff]  ;;  %v1866_v63 = vld [vmem:[#allocation8 + $0x88] sm:$0xff] }
 0x7af   :  { %4305 = vmatprep.mubr.f32.mxu1 %v6721_v29  ;;  %1996 = vmatprep.mubr.f32.mxu0 %v5958_v0 }
 0x7b0   :  { %5148 = vmatprep.subr.bf16.mxu0 %v6748_v55 }
 0x7b2   :  { %1997 = vmatmul.mubr.f32.gmra.mrb[22].mxu0 %v6591_v47  ;;  %v1852_v47 = vld [vmem:[#allocation8 + $0x18] sm:$0xff] }
 0x7b3   :  { %2002 = vmatprep.mubr.f32.mxu0 %v5958_v0  ;;  %v6750_v26 = vpack.c.bf16 %v1852_v47, %v1849_v25  ;;  %v1869_v25 = vld [vmem:[#allocation8 + $0xa0] sm:$0xff]  ;;  %v6805_v47 = vpack.c.bf16 %v1866_v63, %v1863_v6 }
 0x7b5   :  { %5150 = vmatpush1.bf16.msra.mxu0 %v6750_v26  ;;  %5187 = vmatpush3.bf16.msra.mxu1 %v6805_v47 }
 0x7b6   :  { %2003 = vmatmul.mubr.f32.gmra.mrb[24].mxu0 %v6635_v39  ;;  %v1856_v39 = vld [vmem:[#allocation8 + $0x38] sm:$0xff]  ;;  %5188 = vmatprep.subr.bf16.mxu1 %v5960_v49 }
 0x7b7   :  { %2008 = vmatprep.mubr.f32.mxu0 %v5958_v0 }
 0x7ba   :  { %2009 = vmatmul.mubr.f32.gmra.mrb[26].mxu0 %v6679_v31  ;;  %v1859_v31 = vld [vmem:[#allocation8 + $0x50] sm:$0xff] }
 0x7bb   :  { %2014 = vmatprep.mubr.f32.mxu0 %v5958_v0  ;;  %v6754_v28 = vpack.c.bf16 %v1859_v31, %v1856_v39  ;;  %v1872_v39 = vld [vmem:[#allocation8 + $0xb8] sm:$0xff] }
 0x7bc   :  { %v6808_v31 = vpack.c.bf16 %v1872_v39, %v1869_v25 }
 0x7bd   :  { %5152 = vmatprep.subr.bf16.mxu0 %v6754_v28 }
 0x7be   :  { %2015 = vmatmul.mubr.f32.gmra.mrb[28].mxu0 %v6721_v29  ;;  %5190 = vmatpush3.bf16.msra.mxu1 %v6808_v31 }
 0x7bf   :  { %2020 = vmatprep.mubr.f32.mxu0 %v5958_v0  ;;  %5154 = vmatpush1.bf16.msra.mxu0 %v6756_v23 }
 0x7c0   :  { %5156 = vmatprep.subr.bf16.mxu0 %v6760_v34  ;;  %5191 = vmatprep.subr.bf16.mxu1 %v5960_v49 }
 0x7c2   :  { %5193 = vmatpush3.bf16.msra.mxu1 %v6812_v24 }
 0x7c3   :  { %5158 = vmatpush1.bf16.msra.mxu0 %v6762_v46  ;;  %5194 = vmatprep.subr.bf16.mxu1 %v5960_v49 }
 0x7c4   :  { %5160 = vmatprep.subr.bf16.mxu0 %v6766_v57 }
 0x7c6   :  { %5196 = vmatpush3.bf16.msra.mxu1 %v6816_v43 }
 0x7c7   :  { %5162 = vmatpush1.bf16.msra.mxu0 %v6768_v4  ;;  %5197 = vmatprep.subr.bf16.mxu1 %v5960_v49 }
 0x7c8   :  { %5164 = vmatprep.subr.bf16.mxu0 %v6772_v15 }
 0x7ca   :  { %5199 = vmatpush3.bf16.msra.mxu1 %v6820_v62 }
 0x7cb   :  { %5166 = vmatpush1.bf16.msra.mxu0 %v6774_v27  ;;  %5200 = vmatprep.subr.bf16.mxu1 %v5960_v49 }
 0x7cc   :  { %5168 = vmatprep.subr.bf16.mxu0 %v6778_v58 }
 0x7ce   :  { %5202 = vmatpush3.bf16.msra.mxu1 %v6824_v11 }
 0x7cf   :  { %5170 = vmatpush1.bf16.msra.mxu0 %v6780_v61  ;;  %5235 = vmatprep.subr.bf16.mxu1 %v5960_v49 }
 0x7d0   :  { %5172 = vmatprep.subr.bf16.mxu0 %v6784_v51 }
 0x7d3   :  { %5174 = vmatpush1.bf16.msra.mxu0 %v6786_v40 }
 0x7d4   :  { %5176 = vmatprep.subr.bf16.mxu0 %v6793_v8 }
 0x7d7   :  { %5178 = vmatpush1.bf16.msra.mxu0 %v6796_v14 }
 0x7d8   :  { %5204 = vmatprep.subr.bf16.mxu0 %v6748_v55 }
 0x859   :  { %v1691_v20 = vpop.f32.mrb[14].mxu0  ;;  %v1762_v22 = vpop.f32.mrb[22].mxu1 }
 0x85a   :  { %v5633_v30 = vadd.f32 %v1691_v20, %v6439_v60  ;;  %v1693_v35 = vpop.f32.mrb[15].mxu0  ;;  %v4263_v33 = vpop.f32.mrb[23].mxu1  ;;  %v1783_v10 = vadd.f32 %v5855_v7, %v1762_v22 }
 0x85b   :  { %v5634_v42 = vadd.f32 %v1693_v35, %v6445_v3 }
 0x85c   :  { %v3625_v36 = vmul.f32 -1.442695, %v5633_v30 }
 0x85d   :  { %v3626_v48 = vmul.f32 -1.442695, %v5634_v42 }
 0x85e   :  { %5765 = vpow2.f32 %v3625_v36 }
 0x85f   :  { %5767 = vpow2.f32 %v3626_v48 }
 0x868   :  { %v5766_v50 = vpop.eup %5765 }
 0x869   :  { %v1773_v59 = vadd.f32 1.0, %v5766_v50  ;;  %v5768_v44 = vpop.eup %5767 }
 0x86a   :  { %v1780_v2 = vadd.f32 1.0, %v5768_v44 }
 0x86b   :  { %5769 = vrcp.f32 %v1773_v59 }
 0x86c   :  { %5771 = vrcp.f32 %v1780_v2 }
 0x875   :  { %v5770_v13 = vpop.eup %5769 }
 0x876   :  { %v1784_v60 = vmul.f32 %v5770_v13, %v1783_v10  ;;  %v5772_v63 = vpop.eup %5771 }
 0x877   :  { %v1787_v16 = vsub.f32 1.0, %v5772_v63  ;;  %v1789_v41 = vmul.f32 %v5772_v63, %v6721_v29  ;;  %v1848_v29 = vld [vmem:[%s7212_s6] sm:$0x7] }
 0x878   :  { %v1785_v12 = vadd.f32 %v1784_v60, %v6447_v5  ;;  %v6897_v1 = vrot.slane %v1848_v29, %v160_v53  ;;  %v6901_v20 = vrot.slane %v1848_v29, %v164_v56  ;;  %v6908_v56 = vld [vmem:[%s7214_s8] ss:$0 sm:$0xff]  ;;  %v6912_v44 = vrot.slane %v1848_v29, %v168_v38 }
 0x879   :  { %v6835_v18 = vpop.f32.mrb[24].mxu1 }
 0x87a   :  { %5773 = vtanh.f32 %v1785_v12  ;;  %v6837_v3 = vpop.f32.mrb[25].mxu1 }
 0x87b   :  { %v2094_v13 = vadd.f32 %v6837_v3, %v6912_v44 }
 0x87d   :  { %v6839_v19 = vpop.f32.mrb[26].mxu1 }
 0x87e   :  { %v6841_v6 = vpop.f32.mrb[27].mxu1 }
 0x881   :  { %v6843_v25 = vpop.f32.mrb[28].mxu1 }
 0x882   :  { %v6845_v39 = vpop.f32.mrb[29].mxu1 }
 0x884   :  { %v5774_v17 = vpop.eup %5773 }
 0x885   :  { %v1788_v32 = vmul.f32 %v5774_v17, %v1787_v16 }
 0x887   :  { %v1790_v5 = vadd.f32 %v1789_v41, %v1788_v32 }
 0x889   :  { %2021 = vmatmul.mubr.f32.gmra.mrb[30].mxu0 %v1790_v5  ;;  %4306 = vmatmul.mubr.f32.gmra.mrb[30].mxu1 %v1790_v5 }
 0x88a   :  { %2226 = vmatprep.mubr.f32.mxu0 %v5958_v0  ;;  %4340 = vmatprep.mubr.msk.f32.mxu1 %vm5961_vm4, %v5958_v0 }
 0x88d   :  { %2227 = vmatmul.mubr.f32.vlgmr.msra.gmra.mrb[16].mxu0 %v5958_v0  ;;  %4341 = vmatmul.mubr.f32.vlgmr.msra.gmra.mrb[32].mxu1 %v5958_v0 }
 0x88e   :  { %5206 = vmatpush1.bf16.msra.mxu0 %v6750_v26  ;;  %5237 = vmatpush3.bf16.msra.mxu1 %v6788_v45 }
 0x88f   :  { %5208 = vmatprep.subr.bf16.mxu0 %v6754_v28  ;;  %5238 = vmatprep.subr.bf16.mxu1 %v5960_v49 }
 0x890   :  { %2392 = vmatprep.mubr.f32.mxu0 %v5958_v0  ;;  %4375 = vmatprep.mubr.msk.f32.mxu1 %vm5961_vm4, %v5958_v0 }
 0x892   :  { %5210 = vmatpush1.bf16.msra.mxu0 %v6756_v23  ;;  %5240 = vmatpush3.bf16.msra.mxu1 %v6799_v21 }
 0x893   :  { %5212 = vmatprep.subr.bf16.mxu0 %v6760_v34  ;;  %5241 = vmatprep.subr.bf16.mxu1 %v5960_v49 }
 0x896   :  { %5214 = vmatpush1.bf16.msra.mxu0 %v6762_v46  ;;  %5243 = vmatpush3.bf16.msra.mxu1 %v6805_v47 }
 0x897   :  { %5216 = vmatprep.subr.bf16.mxu0 %v6766_v57  ;;  %5244 = vmatprep.subr.bf16.mxu1 %v5960_v49 }
 0x89a   :  { %5218 = vmatpush1.bf16.msra.mxu0 %v6768_v4  ;;  %5246 = vmatpush3.bf16.msra.mxu1 %v6808_v31 }
 0x89b   :  { %5220 = vmatprep.subr.bf16.mxu0 %v6772_v15  ;;  %5247 = vmatprep.subr.bf16.mxu1 %v5960_v49 }
 0x89e   :  { %5222 = vmatpush1.bf16.msra.mxu0 %v6774_v27  ;;  %5249 = vmatpush3.bf16.msra.mxu1 %v6812_v24 }
 0x89f   :  { %5224 = vmatprep.subr.bf16.mxu0 %v6778_v58  ;;  %5250 = vmatprep.subr.bf16.mxu1 %v5960_v49 }
 0x8a2   :  { %5226 = vmatpush1.bf16.msra.mxu0 %v6780_v61  ;;  %5252 = vmatpush3.bf16.msra.mxu1 %v6816_v43 }
 0x8a3   :  { %5228 = vmatprep.subr.bf16.mxu0 %v6784_v51  ;;  %5253 = vmatprep.subr.bf16.mxu1 %v5960_v49 }
 0x8a6   :  { %5230 = vmatpush1.bf16.msra.mxu0 %v6786_v40  ;;  %5255 = vmatpush3.bf16.msra.mxu1 %v6820_v62 }
 0x8a7   :  { %5232 = vmatprep.subr.bf16.mxu0 %v6793_v8  ;;  %5256 = vmatprep.subr.bf16.mxu1 %v5960_v49 }
 0x8aa   :  { %5234 = vmatpush1.bf16.msra.mxu0 %v6796_v14  ;;  %5258 = vmatpush3.bf16.msra.mxu1 %v6824_v11 }
 0x8ab   :  { %5260 = vmatprep.subr.bf16.mxu0 %v6748_v55  ;;  %5291 = vmatprep.subr.bf16.mxu1 %v5960_v49 }
 0x95c   :  { %v6891_v52 = vpop.f32.mrb[30].mxu1 }
 0x95d   :  { %v6893_v54 = vpop.f32.mrb[31].mxu1 }
 0x960   :  { %v2228_v9 = vpop.f32.mrb[16].mxu0  ;;  %v2299_v22 = vpop.f32.mrb[32].mxu1 }
 0x961   :  { %v5635_v30 = vadd.f32 %v2228_v9, %v6897_v1  ;;  %v2230_v35 = vpop.f32.mrb[17].mxu0  ;;  %v4342_v33 = vpop.f32.mrb[33].mxu1  ;;  %v2320_v7 = vadd.f32 %v6908_v56, %v2299_v22 }
 0x962   :  { %v5636_v42 = vadd.f32 %v2230_v35, %v6901_v20 }
 0x963   :  { %v3628_v36 = vmul.f32 -1.442695, %v5635_v30 }
 0x964   :  { %v3629_v48 = vmul.f32 -1.442695, %v5636_v42 }
 0x965   :  { %5775 = vpow2.f32 %v3628_v36 }
 0x966   :  { %5777 = vpow2.f32 %v3629_v48 }
 0x96f   :  { %v5776_v50 = vpop.eup %5775 }
 0x970   :  { %v2310_v59 = vadd.f32 1.0, %v5776_v50  ;;  %v5778_v53 = vpop.eup %5777 }
 0x971   :  { %v2317_v2 = vadd.f32 1.0, %v5778_v53  ;;  %v2099_v53 = vadd.f32 %v6835_v18, %v6912_v44 }
 0x972   :  { %5779 = vrcp.f32 %v2310_v59 }
 0x973   :  { %5781 = vrcp.f32 %v2317_v2 }
 0x97c   :  { %v5780_v10 = vpop.eup %5779 }
 0x97d   :  { %v2321_v60 = vmul.f32 %v5780_v10, %v2320_v7  ;;  %v5782_v63 = vpop.eup %5781 }
 0x97e   :  { %v2324_v16 = vsub.f32 1.0, %v5782_v63  ;;  %v2326_v41 = vmul.f32 0.0, %v5782_v63 }
 0x97f   :  { %v2322_v12 = vadd.f32 %v2321_v60, %v2094_v13 }
 0x981   :  { %5783 = vtanh.f32 %v2322_v12 }
 0x98b   :  { %v5784_v17 = vpop.eup %5783 }
 0x98c   :  { %v2325_v32 = vmul.f32 %v5784_v17, %v2324_v16 }
 0x98e   :  { %v6917_v5 = vadd.f32 %v2326_v41, %v2325_v32 }
 0x990   :  { %2393 = vmatmul.mubr.f32.vlgmr.msra.gmra.mrb[18].mxu0 %v6917_v5  ;;  %4376 = vmatmul.mubr.f32.vlgmr.msra.gmra.mrb[34].mxu1 %v6917_v5 }
 0x991   :  { %5262 = vmatpush1.bf16.msra.mxu0 %v6750_v26  ;;  %5293 = vmatpush3.bf16.msra.mxu1 %v6788_v45 }
 0x992   :  { %5264 = vmatprep.subr.bf16.mxu0 %v6754_v28  ;;  %5294 = vmatprep.subr.bf16.mxu1 %v5960_v49 }
 0x993   :  { %2558 = vmatprep.mubr.f32.mxu0 %v5958_v0  ;;  %4410 = vmatprep.mubr.msk.f32.mxu1 %vm5961_vm4, %v5958_v0 }
 0x995   :  { %5266 = vmatpush1.bf16.msra.mxu0 %v6756_v23  ;;  %5296 = vmatpush3.bf16.msra.mxu1 %v6799_v21 }
 0x996   :  { %5268 = vmatprep.subr.bf16.mxu0 %v6760_v34  ;;  %5297 = vmatprep.subr.bf16.mxu1 %v5960_v49 }
 0x999   :  { %5270 = vmatpush1.bf16.msra.mxu0 %v6762_v46  ;;  %5299 = vmatpush3.bf16.msra.mxu1 %v6805_v47 }
 0x99a   :  { %5272 = vmatprep.subr.bf16.mxu0 %v6766_v57  ;;  %5300 = vmatprep.subr.bf16.mxu1 %v5960_v49 }
 0x99d   :  { %5274 = vmatpush1.bf16.msra.mxu0 %v6768_v4  ;;  %5302 = vmatpush3.bf16.msra.mxu1 %v6808_v31 }
 0x99e   :  { %5276 = vmatprep.subr.bf16.mxu0 %v6772_v15  ;;  %5303 = vmatprep.subr.bf16.mxu1 %v5960_v49 }
 0x9a1   :  { %5278 = vmatpush1.bf16.msra.mxu0 %v6774_v27  ;;  %5305 = vmatpush3.bf16.msra.mxu1 %v6812_v24 }
 0x9a2   :  { %5280 = vmatprep.subr.bf16.mxu0 %v6778_v58  ;;  %5306 = vmatprep.subr.bf16.mxu1 %v5960_v49 }
 0x9a5   :  { %5282 = vmatpush1.bf16.msra.mxu0 %v6780_v61  ;;  %5308 = vmatpush3.bf16.msra.mxu1 %v6816_v43 }
 0x9a6   :  { %5284 = vmatprep.subr.bf16.mxu0 %v6784_v51  ;;  %5309 = vmatprep.subr.bf16.mxu1 %v5960_v49 }
 0x9a9   :  { %5286 = vmatpush1.bf16.msra.mxu0 %v6786_v40  ;;  %5311 = vmatpush3.bf16.msra.mxu1 %v6820_v62 }
 0x9aa   :  { %5288 = vmatprep.subr.bf16.mxu0 %v6793_v8  ;;  %5312 = vmatprep.subr.bf16.mxu1 %v5960_v49 }
 0x9ad   :  { %5290 = vmatpush1.bf16.msra.mxu0 %v6796_v14  ;;  %5314 = vmatpush3.bf16.msra.mxu1 %v6824_v11 }
 0x9ae   :  { %5316 = vmatprep.subr.bf16.mxu0 %v6748_v55  ;;  %5347 = vmatprep.subr.bf16.mxu1 %v5960_v49 }
 0xa63   :  { %v2394_v37 = vpop.f32.mrb[18].mxu0  ;;  %v2465_v38 = vpop.f32.mrb[34].mxu1 }
 0xa64   :  { %v5637_v3 = vadd.f32 %v2394_v37, %v6897_v1  ;;  %v2396_v29 = vpop.f32.mrb[19].mxu0  ;;  %v4377_v9 = vpop.f32.mrb[35].mxu1  ;;  %v2486_v50 = vadd.f32 %v6908_v56, %v2465_v38 }
 0xa65   :  { %v5638_v30 = vadd.f32 %v2396_v29, %v6901_v20 }
 0xa66   :  { %v3630_v22 = vmul.f32 -1.442695, %v5637_v3 }
 0xa67   :  { %v3631_v35 = vmul.f32 -1.442695, %v5638_v30 }
 0xa68   :  { %5785 = vpow2.f32 %v3630_v22 }
 0xa69   :  { %5787 = vpow2.f32 %v3631_v35 }
 0xa72   :  { %v5786_v33 = vpop.eup %5785 }
 0xa73   :  { %v2476_v36 = vadd.f32 1.0, %v5786_v33  ;;  %v5788_v42 = vpop.eup %5787 }
 0xa74   :  { %v2483_v48 = vadd.f32 1.0, %v5788_v42 }
 0xa75   :  { %5789 = vrcp.f32 %v2476_v36  ;;  %v2104_v36 = vadd.f32 %v6841_v6, %v6912_v44 }
 0xa76   :  { %5791 = vrcp.f32 %v2483_v48 }
 0xa7f   :  { %v5790_v59 = vpop.eup %5789 }
 0xa80   :  { %v2487_v2 = vmul.f32 %v5790_v59, %v2486_v50  ;;  %v5792_v10 = vpop.eup %5791 }
 0xa81   :  { %v2490_v13 = vsub.f32 1.0, %v5792_v10  ;;  %v2492_v63 = vmul.f32 %v5792_v10, %v6917_v5 }
 0xa82   :  { %v2488_v7 = vadd.f32 %v2487_v2, %v2099_v53 }
 0xa84   :  { %5793 = vtanh.f32 %v2488_v7 }
 0xa8e   :  { %v5794_v60 = vpop.eup %5793 }
 0xa8f   :  { %v2491_v12 = vmul.f32 %v5794_v60, %v2490_v13 }
 0xa91   :  { %v6962_v16 = vadd.f32 %v2492_v63, %v2491_v12 }
 0xa93   :  { %2559 = vmatmul.mubr.f32.vlgmr.msra.gmra.mrb[20].mxu0 %v6962_v16  ;;  %4411 = vmatmul.mubr.f32.vlgmr.msra.gmra.mrb[36].mxu1 %v6962_v16 }
 0xa94   :  { %5318 = vmatpush1.bf16.msra.mxu0 %v6750_v26  ;;  %5349 = vmatpush3.bf16.msra.mxu1 %v6788_v45 }
 0xa95   :  { %5320 = vmatprep.subr.bf16.mxu0 %v6754_v28  ;;  %5350 = vmatprep.subr.bf16.mxu1 %v5960_v49 }
 0xa96   :  { %2724 = vmatprep.mubr.f32.mxu0 %v5958_v0  ;;  %4445 = vmatprep.mubr.msk.f32.mxu1 %vm5961_vm4, %v5958_v0 }
 0xa98   :  { %5322 = vmatpush1.bf16.msra.mxu0 %v6756_v23  ;;  %5352 = vmatpush3.bf16.msra.mxu1 %v6799_v21 }
 0xa99   :  { %5324 = vmatprep.subr.bf16.mxu0 %v6760_v34  ;;  %5353 = vmatprep.subr.bf16.mxu1 %v5960_v49 }
 0xa9c   :  { %5326 = vmatpush1.bf16.msra.mxu0 %v6762_v46  ;;  %5355 = vmatpush3.bf16.msra.mxu1 %v6805_v47 }
 0xa9d   :  { %5328 = vmatprep.subr.bf16.mxu0 %v6766_v57  ;;  %5356 = vmatprep.subr.bf16.mxu1 %v5960_v49 }
 0xaa0   :  { %5330 = vmatpush1.bf16.msra.mxu0 %v6768_v4  ;;  %5358 = vmatpush3.bf16.msra.mxu1 %v6808_v31 }
 0xaa1   :  { %5332 = vmatprep.subr.bf16.mxu0 %v6772_v15  ;;  %5359 = vmatprep.subr.bf16.mxu1 %v5960_v49 }
 0xaa4   :  { %5334 = vmatpush1.bf16.msra.mxu0 %v6774_v27  ;;  %5361 = vmatpush3.bf16.msra.mxu1 %v6812_v24 }
 0xaa5   :  { %5336 = vmatprep.subr.bf16.mxu0 %v6778_v58  ;;  %5362 = vmatprep.subr.bf16.mxu1 %v5960_v49 }
 0xaa8   :  { %5338 = vmatpush1.bf16.msra.mxu0 %v6780_v61  ;;  %5364 = vmatpush3.bf16.msra.mxu1 %v6816_v43 }
 0xaa9   :  { %5340 = vmatprep.subr.bf16.mxu0 %v6784_v51  ;;  %5365 = vmatprep.subr.bf16.mxu1 %v5960_v49 }
 0xaac   :  { %5342 = vmatpush1.bf16.msra.mxu0 %v6786_v40  ;;  %5367 = vmatpush3.bf16.msra.mxu1 %v6820_v62 }
 0xaad   :  { %5344 = vmatprep.subr.bf16.mxu0 %v6793_v8  ;;  %5368 = vmatprep.subr.bf16.mxu1 %v5960_v49 }
 0xab0   :  { %5346 = vmatpush1.bf16.msra.mxu0 %v6796_v14  ;;  %5370 = vmatpush3.bf16.msra.mxu1 %v6824_v11 }
 0xab1   :  { %5372 = vmatprep.subr.bf16.mxu0 %v6748_v55  ;;  %5403 = vmatprep.subr.bf16.mxu1 %v5960_v49 }
 0xb66   :  { %v2560_v18 = vpop.f32.mrb[20].mxu0  ;;  %v2631_v17 = vpop.f32.mrb[36].mxu1 }
 0xb67   :  { %v5639_v32 = vadd.f32 %v2560_v18, %v6897_v1  ;;  %v2562_v41 = vpop.f32.mrb[21].mxu0  ;;  %v4412_v5 = vpop.f32.mrb[37].mxu1  ;;  %v2652_v35 = vadd.f32 %v6908_v56, %v2631_v17 }
 0xb68   :  { %v5640_v38 = vadd.f32 %v2562_v41, %v6901_v20 }
 0xb69   :  { %v3632_v37 = vmul.f32 -1.442695, %v5639_v32 }
 0xb6a   :  { %v3633_v3 = vmul.f32 -1.442695, %v5640_v38 }
 0xb6b   :  { %5795 = vpow2.f32 %v3632_v37 }
 0xb6c   :  { %5797 = vpow2.f32 %v3633_v3 }
 0xb75   :  { %v5796_v29 = vpop.eup %5795 }
 0xb76   :  { %v2642_v9 = vadd.f32 1.0, %v5796_v29  ;;  %v5798_v22 = vpop.eup %5797  ;;  %v2109_v29 = vadd.f32 %v6839_v19, %v6912_v44 }
 0xb77   :  { %v2649_v30 = vadd.f32 1.0, %v5798_v22 }
 0xb78   :  { %5799 = vrcp.f32 %v2642_v9 }
 0xb79   :  { %5801 = vrcp.f32 %v2649_v30 }
 0xb82   :  { %v5800_v33 = vpop.eup %5799 }
 0xb83   :  { %v2653_v42 = vmul.f32 %v5800_v33, %v2652_v35  ;;  %v5802_v50 = vpop.eup %5801 }
 0xb84   :  { %v2656_v59 = vsub.f32 1.0, %v5802_v50  ;;  %v2658_v7 = vmul.f32 %v5802_v50, %v6962_v16 }
 0xb85   :  { %v2654_v48 = vadd.f32 %v2653_v42, %v2104_v36 }
 0xb87   :  { %5803 = vtanh.f32 %v2654_v48 }
 0xb91   :  { %v5804_v53 = vpop.eup %5803 }
 0xb92   :  { %v2657_v2 = vmul.f32 %v5804_v53, %v2656_v59 }
 0xb94   :  { %v7007_v10 = vadd.f32 %v2658_v7, %v2657_v2 }
 0xb96   :  { %2725 = vmatmul.mubr.f32.vlgmr.msra.gmra.mrb[22].mxu0 %v7007_v10  ;;  %4446 = vmatmul.mubr.f32.vlgmr.msra.gmra.mrb[38].mxu1 %v7007_v10 }
 0xb97   :  { %5374 = vmatpush1.bf16.msra.mxu0 %v6750_v26  ;;  %5405 = vmatpush3.bf16.msra.mxu1 %v6788_v45 }
 0xb98   :  { %5376 = vmatprep.subr.bf16.mxu0 %v6754_v28  ;;  %5406 = vmatprep.subr.bf16.mxu1 %v5960_v49 }
 0xb99   :  { %2890 = vmatprep.mubr.f32.mxu0 %v5958_v0  ;;  %4480 = vmatprep.mubr.msk.f32.mxu1 %vm5961_vm4, %v5958_v0 }
 0xb9b   :  { %5378 = vmatpush1.bf16.msra.mxu0 %v6756_v23  ;;  %5408 = vmatpush3.bf16.msra.mxu1 %v6799_v21 }
 0xb9c   :  { %5380 = vmatprep.subr.bf16.mxu0 %v6760_v34  ;;  %5409 = vmatprep.subr.bf16.mxu1 %v5960_v49 }
 0xb9f   :  { %5382 = vmatpush1.bf16.msra.mxu0 %v6762_v46  ;;  %5411 = vmatpush3.bf16.msra.mxu1 %v6805_v47 }
 0xba0   :  { %5384 = vmatprep.subr.bf16.mxu0 %v6766_v57  ;;  %5412 = vmatprep.subr.bf16.mxu1 %v5960_v49 }
 0xba3   :  { %5386 = vmatpush1.bf16.msra.mxu0 %v6768_v4  ;;  %5414 = vmatpush3.bf16.msra.mxu1 %v6808_v31 }
 0xba4   :  { %5388 = vmatprep.subr.bf16.mxu0 %v6772_v15  ;;  %5415 = vmatprep.subr.bf16.mxu1 %v5960_v49 }
 0xba7   :  { %5390 = vmatpush1.bf16.msra.mxu0 %v6774_v27  ;;  %5417 = vmatpush3.bf16.msra.mxu1 %v6812_v24 }
 0xba8   :  { %5392 = vmatprep.subr.bf16.mxu0 %v6778_v58  ;;  %5418 = vmatprep.subr.bf16.mxu1 %v5960_v49 }
 0xbab   :  { %5394 = vmatpush1.bf16.msra.mxu0 %v6780_v61  ;;  %5420 = vmatpush3.bf16.msra.mxu1 %v6816_v43 }
 0xbac   :  { %5396 = vmatprep.subr.bf16.mxu0 %v6784_v51  ;;  %5421 = vmatprep.subr.bf16.mxu1 %v5960_v49 }
 0xbaf   :  { %5398 = vmatpush1.bf16.msra.mxu0 %v6786_v40  ;;  %5423 = vmatpush3.bf16.msra.mxu1 %v6820_v62 }
 0xbb0   :  { %5400 = vmatprep.subr.bf16.mxu0 %v6793_v8  ;;  %5424 = vmatprep.subr.bf16.mxu1 %v5960_v49 }
 0xbb3   :  { %5402 = vmatpush1.bf16.msra.mxu0 %v6796_v14  ;;  %5426 = vmatpush3.bf16.msra.mxu1 %v6824_v11 }
 0xbb4   :  { %5428 = vmatprep.subr.bf16.mxu0 %v6748_v55  ;;  %5459 = vmatprep.subr.bf16.mxu1 %v5960_v49 }
 0xc69   :  { %v2726_v6 = vpop.f32.mrb[22].mxu0  ;;  %v2797_v13 = vpop.f32.mrb[38].mxu1 }
 0xc6a   :  { %v5641_v60 = vadd.f32 %v2726_v6, %v6897_v1  ;;  %v2728_v12 = vpop.f32.mrb[23].mxu0  ;;  %v4447_v63 = vpop.f32.mrb[39].mxu1  ;;  %v2818_v38 = vadd.f32 %v6908_v56, %v2797_v13 }
 0xc6b   :  { %v5642_v18 = vadd.f32 %v2728_v12, %v6901_v20 }
 0xc6c   :  { %v3634_v16 = vmul.f32 -1.442695, %v5641_v60 }
 0xc6d   :  { %v3635_v17 = vmul.f32 -1.442695, %v5642_v18 }
 0xc6e   :  { %5805 = vpow2.f32 %v3634_v16 }
 0xc6f   :  { %5807 = vpow2.f32 %v3635_v17  ;;  %v2114_v17 = vadd.f32 %v6845_v39, %v6912_v44 }
 0xc78   :  { %v5806_v32 = vpop.eup %5805 }
 0xc79   :  { %v2808_v41 = vadd.f32 1.0, %v5806_v32  ;;  %v5808_v5 = vpop.eup %5807 }
 0xc7a   :  { %v2815_v37 = vadd.f32 1.0, %v5808_v5 }
 0xc7b   :  { %5809 = vrcp.f32 %v2808_v41 }
 0xc7c   :  { %5811 = vrcp.f32 %v2815_v37 }
 0xc85   :  { %v5810_v3 = vpop.eup %5809 }
 0xc86   :  { %v2819_v9 = vmul.f32 %v5810_v3, %v2818_v38  ;;  %v5812_v30 = vpop.eup %5811 }
 0xc87   :  { %v2822_v35 = vsub.f32 1.0, %v5812_v30  ;;  %v2824_v42 = vmul.f32 %v5812_v30, %v7007_v10 }
 0xc88   :  { %v2820_v22 = vadd.f32 %v2819_v9, %v2109_v29 }
 0xc8a   :  { %5813 = vtanh.f32 %v2820_v22 }
 0xc94   :  { %v5814_v33 = vpop.eup %5813 }
 0xc95   :  { %v2823_v36 = vmul.f32 %v5814_v33, %v2822_v35 }
 0xc97   :  { %v7052_v48 = vadd.f32 %v2824_v42, %v2823_v36 }
 0xc99   :  { %2891 = vmatmul.mubr.f32.vlgmr.msra.gmra.mrb[24].mxu0 %v7052_v48  ;;  %4481 = vmatmul.mubr.f32.vlgmr.msra.gmra.mrb[40].mxu1 %v7052_v48 }
 0xc9a   :  { %5430 = vmatpush1.bf16.msra.mxu0 %v6750_v26  ;;  %5461 = vmatpush3.bf16.msra.mxu1 %v6788_v45 }
 0xc9b   :  { %5432 = vmatprep.subr.bf16.mxu0 %v6754_v28  ;;  %5462 = vmatprep.subr.bf16.mxu1 %v5960_v49 }
 0xc9c   :  { %3056 = vmatprep.mubr.f32.mxu0 %v5958_v0  ;;  %4515 = vmatprep.mubr.msk.f32.mxu1 %vm5961_vm4, %v5958_v0 }
 0xc9e   :  { %5434 = vmatpush1.bf16.msra.mxu0 %v6756_v23  ;;  %5464 = vmatpush3.bf16.msra.mxu1 %v6799_v21 }
 0xc9f   :  { %5436 = vmatprep.subr.bf16.mxu0 %v6760_v34  ;;  %5465 = vmatprep.subr.bf16.mxu1 %v5960_v49 }
 0xca2   :  { %5438 = vmatpush1.bf16.msra.mxu0 %v6762_v46  ;;  %5467 = vmatpush3.bf16.msra.mxu1 %v6805_v47 }
 0xca3   :  { %5440 = vmatprep.subr.bf16.mxu0 %v6766_v57  ;;  %5468 = vmatprep.subr.bf16.mxu1 %v5960_v49 }
 0xca6   :  { %5442 = vmatpush1.bf16.msra.mxu0 %v6768_v4  ;;  %5470 = vmatpush3.bf16.msra.mxu1 %v6808_v31 }
 0xca7   :  { %5444 = vmatprep.subr.bf16.mxu0 %v6772_v15  ;;  %5471 = vmatprep.subr.bf16.mxu1 %v5960_v49 }
 0xcaa   :  { %5446 = vmatpush1.bf16.msra.mxu0 %v6774_v27  ;;  %5473 = vmatpush3.bf16.msra.mxu1 %v6812_v24 }
 0xcab   :  { %5448 = vmatprep.subr.bf16.mxu0 %v6778_v58  ;;  %5474 = vmatprep.subr.bf16.mxu1 %v5960_v49 }
 0xcae   :  { %5450 = vmatpush1.bf16.msra.mxu0 %v6780_v61  ;;  %5476 = vmatpush3.bf16.msra.mxu1 %v6816_v43 }
 0xcaf   :  { %5452 = vmatprep.subr.bf16.mxu0 %v6784_v51  ;;  %5477 = vmatprep.subr.bf16.mxu1 %v5960_v49 }
 0xcb2   :  { %5454 = vmatpush1.bf16.msra.mxu0 %v6786_v40  ;;  %5479 = vmatpush3.bf16.msra.mxu1 %v6820_v62 }
 0xcb3   :  { %5456 = vmatprep.subr.bf16.mxu0 %v6793_v8  ;;  %5480 = vmatprep.subr.bf16.mxu1 %v5960_v49 }
 0xcb6   :  { %5458 = vmatpush1.bf16.msra.mxu0 %v6796_v14  ;;  %5482 = vmatpush3.bf16.msra.mxu1 %v6824_v11 }
 0xcb7   :  { %5484 = vmatprep.subr.bf16.mxu0 %v6748_v55  ;;  %5515 = vmatprep.subr.bf16.mxu1 %v5960_v49 }
 0xd6c   :  { %v2892_v19 = vpop.f32.mrb[24].mxu0  ;;  %v2963_v50 = vpop.f32.mrb[40].mxu1 }
 0xd6d   :  { %v5643_v59 = vadd.f32 %v2892_v19, %v6897_v1  ;;  %v2894_v53 = vpop.f32.mrb[25].mxu0  ;;  %v4482_v2 = vpop.f32.mrb[41].mxu1  ;;  %v2984_v16 = vadd.f32 %v6908_v56, %v2963_v50 }
 0xd6e   :  { %v5644_v10 = vadd.f32 %v2894_v53, %v6901_v20 }
 0xd6f   :  { %v3636_v7 = vmul.f32 -1.442695, %v5643_v59 }
 0xd70   :  { %v3637_v6 = vmul.f32 -1.442695, %v5644_v10 }
 0xd71   :  { %5815 = vpow2.f32 %v3636_v7  ;;  %v2119_v7 = vadd.f32 %v6843_v25, %v6912_v44  ;;  %v3490_v25 = vld [vmem:[#allocation9] sm:$0xff] }
 0xd72   :  { %5817 = vpow2.f32 %v3637_v6 }
 0xd7b   :  { %v5816_v13 = vpop.eup %5815 }
 0xd7c   :  { %v2974_v60 = vadd.f32 1.0, %v5816_v13  ;;  %v5818_v12 = vpop.eup %5817 }
 0xd7d   :  { %v2981_v63 = vadd.f32 1.0, %v5818_v12 }
 0xd7e   :  { %5819 = vrcp.f32 %v2974_v60 }
 0xd7f   :  { %5821 = vrcp.f32 %v2981_v63 }
 0xd88   :  { %v5820_v18 = vpop.eup %5819 }
 0xd89   :  { %v2985_v32 = vmul.f32 %v5820_v18, %v2984_v16  ;;  %v5822_v5 = vpop.eup %5821 }
 0xd8a   :  { %v2988_v37 = vsub.f32 1.0, %v5822_v5  ;;  %v2990_v29 = vmul.f32 %v5822_v5, %v7052_v48 }
 0xd8b   :  { %v2986_v41 = vadd.f32 %v2985_v32, %v2114_v17  ;;  %v3492_v32 = vld [vmem:[#allocation9 + $0x10] sm:$0xff] }
 0xd8d   :  { %5823 = vtanh.f32 %v2986_v41  ;;  %v3493_v41 = vld [vmem:[#allocation9 + $0x18] sm:$0xff] }
 0xd8e   :  { %v5599_v5 = vpack.c.bf16 %v3493_v41, %v3492_v32 }
 0xd97   :  { %v5824_v38 = vpop.eup %5823 }
 0xd98   :  { %v2989_v3 = vmul.f32 %v5824_v38, %v2988_v37  ;;  %v3494_v37 = vld [vmem:[#allocation9 + $0x20] sm:$0xff]  ;;  %v3495_v38 = vld [vmem:[#allocation9 + $0x28] sm:$0xff] }
 0xd9a   :  { %v7097_v9 = vadd.f32 %v2990_v29, %v2989_v3  ;;  %v5602_v3 = vpack.c.bf16 %v3495_v38, %v3494_v37  ;;  %v3496_v29 = vld [vmem:[#allocation9 + $0x30] sm:$0xff] }
 0xd9c   :  { %3057 = vmatmul.mubr.f32.vlgmr.msra.gmra.mrb[26].mxu0 %v7097_v9  ;;  %4516 = vmatmul.mubr.f32.vlgmr.msra.gmra.mrb[42].mxu1 %v7097_v9 }
 0xd9d   :  { %5486 = vmatpush1.bf16.msra.mxu0 %v6750_v26  ;;  %5517 = vmatpush3.bf16.msra.mxu1 %v6788_v45 }
 0xd9e   :  { %5488 = vmatprep.subr.bf16.mxu0 %v6754_v28  ;;  %5518 = vmatprep.subr.bf16.mxu1 %v5960_v49 }
 0xd9f   :  { %3222 = vmatprep.mubr.f32.mxu0 %v5958_v0  ;;  %4550 = vmatprep.mubr.msk.f32.mxu1 %vm5961_vm4, %v5958_v0 }
 0xda1   :  { %5490 = vmatpush1.bf16.msra.mxu0 %v6756_v23  ;;  %5520 = vmatpush3.bf16.msra.mxu1 %v6799_v21 }
 0xda2   :  { %5492 = vmatprep.subr.bf16.mxu0 %v6760_v34  ;;  %5521 = vmatprep.subr.bf16.mxu1 %v5960_v49 }
 0xda5   :  { %5494 = vmatpush1.bf16.msra.mxu0 %v6762_v46  ;;  %5523 = vmatpush3.bf16.msra.mxu1 %v6805_v47 }
 0xda6   :  { %5496 = vmatprep.subr.bf16.mxu0 %v6766_v57  ;;  %5524 = vmatprep.subr.bf16.mxu1 %v5960_v49 }
 0xda9   :  { %5498 = vmatpush1.bf16.msra.mxu0 %v6768_v4  ;;  %5526 = vmatpush3.bf16.msra.mxu1 %v6808_v31 }
 0xdaa   :  { %5500 = vmatprep.subr.bf16.mxu0 %v6772_v15  ;;  %5527 = vmatprep.subr.bf16.mxu1 %v5960_v49 }
 0xdad   :  { %5502 = vmatpush1.bf16.msra.mxu0 %v6774_v27  ;;  %5529 = vmatpush3.bf16.msra.mxu1 %v6812_v24 }
 0xdae   :  { %5504 = vmatprep.subr.bf16.mxu0 %v6778_v58  ;;  %5530 = vmatprep.subr.bf16.mxu1 %v5960_v49 }
 0xdb1   :  { %5506 = vmatpush1.bf16.msra.mxu0 %v6780_v61  ;;  %5532 = vmatpush3.bf16.msra.mxu1 %v6816_v43 }
 0xdb2   :  { %5508 = vmatprep.subr.bf16.mxu0 %v6784_v51  ;;  %5533 = vmatprep.subr.bf16.mxu1 %v5960_v49 }
 0xdb5   :  { %5510 = vmatpush1.bf16.msra.mxu0 %v6786_v40  ;;  %5535 = vmatpush3.bf16.msra.mxu1 %v6820_v62 }
 0xdb6   :  { %5512 = vmatprep.subr.bf16.mxu0 %v6793_v8  ;;  %5536 = vmatprep.subr.bf16.mxu1 %v5960_v49 }
 0xdb9   :  { %5514 = vmatpush1.bf16.msra.mxu0 %v6796_v14  ;;  %5538 = vmatpush3.bf16.msra.mxu1 %v6824_v11 }
 0xdba   :  { %5540 = vmatprep.subr.bf16.mxu0 %v6748_v55  ;;  %5571 = vmatprep.subr.bf16.mxu1 %v5960_v49 }
 0xe6f   :  { %v3058_v39 = vpop.f32.mrb[26].mxu0  ;;  %v3129_v22 = vpop.f32.mrb[42].mxu1 }
 0xe70   :  { %v5645_v30 = vadd.f32 %v3058_v39, %v6897_v1  ;;  %v3060_v35 = vpop.f32.mrb[27].mxu0  ;;  %v4517_v33 = vpop.f32.mrb[43].mxu1  ;;  %v3150_v55 = vadd.f32 %v6908_v56, %v3129_v22  ;;  %v3498_v39 = vld [vmem:[#allocation9 + $0x40] sm:$0xff]  ;;  %v3499_v22 = vld [vmem:[#allocation9 + $0x48] sm:$0xff] }
 0xe71   :  { %v5646_v42 = vadd.f32 %v3060_v35, %v6901_v20  ;;  %v3500_v35 = vld [vmem:[#allocation9 + $0x50] sm:$0xff]  ;;  %v3501_v33 = vld [vmem:[#allocation9 + $0x58] sm:$0xff] }
 0xe72   :  { %v3638_v36 = vmul.f32 -1.442695, %v5645_v30  ;;  %v5608_v30 = vpack.c.bf16 %v3499_v22, %v3498_v39 }
 0xe73   :  { %v3639_v48 = vmul.f32 -1.442695, %v5646_v42  ;;  %v3502_v42 = vld [vmem:[#allocation9 + $0x60] sm:$0xff] }
 0xe74   :  { %5825 = vpow2.f32 %v3638_v36  ;;  %v5611_v36 = vpack.c.bf16 %v3501_v33, %v3500_v35 }
 0xe75   :  { %5827 = vpow2.f32 %v3639_v48  ;;  %v3503_v48 = vld [vmem:[#allocation9 + $0x68] sm:$0xff] }
 0xe7e   :  { %v5826_v19 = vpop.eup %5825 }
 0xe7f   :  { %v3140_v50 = vadd.f32 1.0, %v5826_v19  ;;  %v5828_v59 = vpop.eup %5827  ;;  %v5614_v19 = vpack.c.bf16 %v3503_v48, %v3502_v42 }
 0xe80   :  { %v3147_v53 = vadd.f32 1.0, %v5828_v59  ;;  %v3505_v59 = vld [vmem:[#allocation9 + $0x78] sm:$0xff] }
 0xe81   :  { %5829 = vrcp.f32 %v3140_v50  ;;  %v3504_v50 = vld [vmem:[#allocation9 + $0x70] sm:$0xff] }
 0xe82   :  { %5831 = vrcp.f32 %v3147_v53  ;;  %v5617_v53 = vpack.c.bf16 %v3505_v59, %v3504_v50 }
 0xe8b   :  { %v5830_v2 = vpop.eup %5829 }
 0xe8c   :  { %v3151_v10 = vmul.f32 %v5830_v2, %v3150_v55  ;;  %v5832_v13 = vpop.eup %5831 }
 0xe8d   :  { %v3154_v60 = vsub.f32 1.0, %v5832_v13  ;;  %v3156_v16 = vmul.f32 %v5832_v13, %v7097_v9 }
 0xe8e   :  { %v3152_v6 = vadd.f32 %v3151_v10, %v2119_v7 }
 0xe90   :  { %5833 = vtanh.f32 %v3152_v6 }
 0xe9a   :  { %v5834_v12 = vpop.eup %5833 }
 0xe9b   :  { %v3155_v63 = vmul.f32 %v5834_v12, %v3154_v60 }
 0xe9d   :  { %v3157_v18 = vadd.f32 %v3156_v16, %v3155_v63 }
 0xe9f   :  { %3223 = vmatmul.mubr.f32.vlgmr.msra.gmra.mrb[28].mxu0 %v3157_v18  ;;  %4551 = vmatmul.mubr.f32.vlgmr.msra.gmra.mrb[44].mxu1 %v3157_v18 }
 0xea0   :  { %5542 = vmatpush1.bf16.msra.mxu0 %v6750_v26  ;;  %5573 = vmatpush3.bf16.msra.mxu1 %v6788_v45 }
 0xea1   :  { %5544 = vmatprep.subr.bf16.mxu0 %v6754_v28  ;;  %5574 = vmatprep.subr.bf16.mxu1 %v5960_v49 }
 0xea2   :  { %3388 = vmatprep.mubr.f32.mxu0 %v5958_v0  ;;  %4585 = vmatprep.mubr.msk.f32.mxu1 %vm5961_vm4, %v5958_v0 }
 0xea4   :  { %5546 = vmatpush1.bf16.msra.mxu0 %v6756_v23  ;;  %5576 = vmatpush3.bf16.msra.mxu1 %v6799_v21 }
 0xea5   :  { %5548 = vmatprep.subr.bf16.mxu0 %v6760_v34  ;;  %5577 = vmatprep.subr.bf16.mxu1 %v5960_v49 }
 0xea8   :  { %5550 = vmatpush1.bf16.msra.mxu0 %v6762_v46  ;;  %5579 = vmatpush3.bf16.msra.mxu1 %v6805_v47 }
 0xea9   :  { %5552 = vmatprep.subr.bf16.mxu0 %v6766_v57  ;;  %5580 = vmatprep.subr.bf16.mxu1 %v5960_v49 }
 0xeac   :  { %5554 = vmatpush1.bf16.msra.mxu0 %v6768_v4  ;;  %5582 = vmatpush3.bf16.msra.mxu1 %v6808_v31 }
 0xead   :  { %5556 = vmatprep.subr.bf16.mxu0 %v6772_v15  ;;  %5583 = vmatprep.subr.bf16.mxu1 %v5960_v49 }
 0xeb0   :  { %5558 = vmatpush1.bf16.msra.mxu0 %v6774_v27  ;;  %5585 = vmatpush3.bf16.msra.mxu1 %v6812_v24 }
 0xeb1   :  { %5560 = vmatprep.subr.bf16.mxu0 %v6778_v58  ;;  %5586 = vmatprep.subr.bf16.mxu1 %v5960_v49 }
 0xeb4   :  { %5562 = vmatpush1.bf16.msra.mxu0 %v6780_v61  ;;  %5588 = vmatpush3.bf16.msra.mxu1 %v6816_v43 }
 0xeb5   :  { %5564 = vmatprep.subr.bf16.mxu0 %v6784_v51  ;;  %5589 = vmatprep.subr.bf16.mxu1 %v5960_v49 }
 0xeb8   :  { %5566 = vmatpush1.bf16.msra.mxu0 %v6786_v40  ;;  %5591 = vmatpush3.bf16.msra.mxu1 %v6820_v62 }
 0xeb9   :  { %5568 = vmatprep.subr.bf16.mxu0 %v6793_v8  ;;  %5592 = vmatprep.subr.bf16.mxu1 %v5960_v49  ;;  %v2124_v8 = vadd.f32 %v6893_v54, %v6912_v44  ;;  %v3491_v54 = vld [vmem:[#allocation9 + $0x8] sm:$0xff] }
 0xeba   :  { %v5596_v17 = vpack.c.bf16 %v3491_v54, %v3490_v25 }
 0xebc   :  { %5570 = vmatpush1.bf16.msra.mxu0 %v6796_v14  ;;  %5594 = vmatpush3.bf16.msra.mxu1 %v6824_v11 }
 0xebd   :  { %5595 = vmatprep.subr.bf16.mxu0 %v5960_v49 }
 0xf72   :  { %v3224_v26 = vpop.f32.mrb[28].mxu0  ;;  %v3295_v28 = vpop.f32.mrb[44].mxu1 }
 0xf73   :  { %v5647_v23 = vadd.f32 %v3224_v26, %v6897_v1  ;;  %v3226_v34 = vpop.f32.mrb[29].mxu0  ;;  %v4552_v46 = vpop.f32.mrb[45].mxu1  ;;  %v3316_v40 = vadd.f32 %v6908_v56, %v3295_v28 }
 0xf74   :  { %v5648_v4 = vadd.f32 %v3226_v34, %v6901_v20 }
 0xf75   :  { %v3640_v57 = vmul.f32 -1.442695, %v5647_v23  ;;  %v2129_v23 = vadd.f32 %v6891_v52, %v6912_v44 }
 0xf76   :  { %v3641_v15 = vmul.f32 -1.442695, %v5648_v4 }
 0xf77   :  { %5835 = vpow2.f32 %v3640_v57 }
 0xf78   :  { %5837 = vpow2.f32 %v3641_v15 }
 0xf81   :  { %v5836_v27 = vpop.eup %5835 }
 0xf82   :  { %v3306_v58 = vadd.f32 1.0, %v5836_v27  ;;  %v5838_v61 = vpop.eup %5837 }
 0xf83   :  { %v3313_v51 = vadd.f32 1.0, %v5838_v61 }
 0xf84   :  { %5839 = vrcp.f32 %v3306_v58 }
 0xf85   :  { %5841 = vrcp.f32 %v3313_v51 }
 0xf8e   :  { %v5840_v45 = vpop.eup %5839 }
 0xf8f   :  { %v3317_v14 = vmul.f32 %v5840_v45, %v3316_v40  ;;  %v5842_v47 = vpop.eup %5841 }
 0xf90   :  { %v3320_v31 = vsub.f32 1.0, %v5842_v47  ;;  %v3322_v62 = vmul.f32 %v5842_v47, %v3157_v18 }
 0xf91   :  { %v3318_v21 = vadd.f32 %v3317_v14, %v2124_v8 }
 0xf93   :  { %5843 = vtanh.f32 %v3318_v21 }
 0xf9d   :  { %v5844_v24 = vpop.eup %5843 }
 0xf9e   :  { %v3321_v43 = vmul.f32 %v5844_v24, %v3320_v31 }
 0xfa0   :  { %v7181_v11 = vadd.f32 %v3322_v62, %v3321_v43 }
 0xfa2   :  { %3389 = vmatmul.mubr.f32.vlgmr.msra.gmra.mrb[30].mxu0 %v7181_v11  ;;  %4586 = vmatmul.mubr.f32.vlgmr.msra.gmra.mrb[46].mxu1 %v7181_v11 }
 0xfa3   :  { %4620 = vmatprep.mubr.msk.f32.mxu0 %vm5961_vm4, %v5958_v0  ;;  %5597 = vmatpush3.bf16.msra.mxu0 %v5596_v17  ;;  %v3497_v0 = vld [vmem:[#allocation9 + $0x38] sm:$0xff] }
 0xfa4   :  { %5598 = vmatprep.subr.bf16.mxu0 %v5960_v49  ;;  %v5605_v9 = vpack.c.bf16 %v3497_v0, %v3496_v29 }
 0xfa7   :  { %5600 = vmatpush3.bf16.msra.mxu0 %v5599_v5 }
 0xfa8   :  { %5601 = vmatprep.subr.bf16.mxu0 %v5960_v49 }
 0xfab   :  { %5603 = vmatpush3.bf16.msra.mxu0 %v5602_v3 }
 0xfac   :  { %5604 = vmatprep.subr.bf16.mxu0 %v5960_v49 }
 0xfaf   :  { %5606 = vmatpush3.bf16.msra.mxu0 %v5605_v9 }
 0xfb0   :  { %5607 = vmatprep.subr.bf16.mxu0 %v5960_v49 }
 0xfb3   :  { %5609 = vmatpush3.bf16.msra.mxu0 %v5608_v30 }
 0xfb4   :  { %5610 = vmatprep.subr.bf16.mxu0 %v5960_v49 }
 0xfb7   :  { %5612 = vmatpush3.bf16.msra.mxu0 %v5611_v36 }
 0xfb8   :  { %5613 = vmatprep.subr.bf16.mxu0 %v5960_v49 }
 0xfbb   :  { %5615 = vmatpush3.bf16.msra.mxu0 %v5614_v19 }
 0xfbc   :  { %5616 = vmatprep.subr.bf16.mxu0 %v5960_v49 }
 0xfbf   :  { %5618 = vmatpush3.bf16.msra.mxu0 %v5617_v53 }
0x1075   :  { %v3390_v55 = vpop.f32.mrb[30].mxu0  ;;  %v3461_v2 = vpop.f32.mrb[46].mxu1 }
0x1076   :  { %v5649_v7 = vadd.f32 %v3390_v55, %v6897_v1  ;;  %v3392_v10 = vpop.f32.mrb[31].mxu0  ;;  %v4587_v6 = vpop.f32.mrb[47].mxu1  ;;  %v3482_v49 = vadd.f32 %v6908_v56, %v3461_v2  ;;  %v3644_v56 = vld [vmem:[%s7216_s10] ss:$0 sm:$0xff] }
0x1077   :  { %v5650_v60 = vadd.f32 %v3392_v10, %v6901_v20 }
0x1078   :  { %v3642_v13 = vmul.f32 -1.442695, %v5649_v7 }
0x1079   :  { %v3643_v12 = vmul.f32 -1.442695, %v5650_v60 }
0x107a   :  { %5845 = vpow2.f32 %v3642_v13 }
0x107b   :  { %5847 = vpow2.f32 %v3643_v12 }
0x1084   :  { %v5846_v63 = vpop.eup %5845 }
0x1085   :  { %v3472_v16 = vadd.f32 1.0, %v5846_v63  ;;  %v5848_v18 = vpop.eup %5847 }
0x1086   :  { %v3479_v26 = vadd.f32 1.0, %v5848_v18 }
0x1087   :  { %5849 = vrcp.f32 %v3472_v16 }
0x1088   :  { %5851 = vrcp.f32 %v3479_v26 }
0x1091   :  { %v5850_v28 = vpop.eup %5849 }
0x1092   :  { %v3483_v1 = vmul.f32 %v5850_v28, %v3482_v49  ;;  %v5852_v46 = vpop.eup %5851 }
0x1093   :  { %v3486_v20 = vsub.f32 1.0, %v5852_v46  ;;  %v3488_v15 = vmul.f32 %v5852_v46, %v7181_v11 }
0x1094   :  { %v3484_v34 = vadd.f32 %v3483_v1, %v2129_v23 }
0x1096   :  { %5853 = vtanh.f32 %v3484_v34 }
0x10a0   :  { %v5854_v57 = vpop.eup %5853 }
0x10a1   :  { %v3487_v4 = vmul.f32 %v5854_v57, %v3486_v20 }
0x10a3   :  { %v3489_v27 = vadd.f32 %v3488_v15, %v3487_v4 }
0x10a5   :  { %4621 = vmatmul.mubr.f32.vlgmr.msra.gmra.mrb[32].mxu0 %v3489_v27 }
0x1178   :  { %v3579_v58 = vpop.f32.mrb[32].mxu0 }
0x1179   :  { %v3580_v61 = vadd.f32 %v3644_v56, %v3579_v58  ;;  %v4622_v51 = vpop.f32.mrb[33].mxu0 }
0x117b   :  { %3583 = vst [vmem:[%s7217_s11] sm:$0xff] %v3580_v61 }
0x117c   :  { %3588 = vsyncpa [#allocation5], 1 }
0x117d   :  { %3589 = vsyncpa [#allocation7], 1 }
0x117e   :  { %3590 = vsyncpa [#allocation10], 1 }

</bundles_post_ra>
